<compile_context>
chip_gen: v5e
topology: v5e:2x2
jax: 0.10.0
libtpu: 0.0.40
codegen_flags: <defaults>
</compile_context>

<pallas_src>
import jax
import jax.numpy as jnp
from jax.experimental import pallas as pl
from jax.experimental.pallas import tpu as pltpu


# logical (PyTorch) dims
D_IN, D_H, D_Z = 784, 400, 20
# padded dims used inside the kernel
D_H_P = 512            # hidden 400 -> 512 (4*128); h1/h3 never leave VMEM
D_Z_P = 128            # latent slab width (mu / z live in lanes [0:20])
ENC_W = 2 * D_Z_P      # fused head output: lanes [0:128]=mu slab, [128:256]=logvar slab
LOGVAR_OFF = D_Z_P     # lane offset of logvar inside the fused head output


def _round_up(n, m):
    return ((n + m - 1) // m) * m


def _choose_tile(batch, max_tile):
    """Batch tile: multiple of 8, capped at max_tile; prefer >= 2 tiles."""
    tb = min(max_tile, _round_up(batch, 8))
    # Keep >= 2 grid steps whenever the batch allows so the "parallel" batch
    # axis can shard across both TensorCores on v7x (a 1-step grid idles one
    # core); e.g. B=256 -> TB=128/grid=2 rather than TB=256/grid=1.
    if _round_up(batch, tb) // tb < 2 and tb >= 16:
        tb = _round_up((tb + 1) // 2, 8)
    return tb


def vae_kernel(x_ref, eps_ref,
               w1_ref, b1_ref,
               w2_ref, b2_ref,
               w3_ref, b3_ref,
               w4_ref, b4_ref,
               xrec_ref, enc_ref):
    """One batch tile of the fused VAE forward pass.

    Weights are bf16 and VMEM-resident across the whole grid (constant
    index_map, single-buffered); x/eps arrive bf16; all accumulation and
    elementwise math stays f32 (v5e has no bf16 VPU/EUP).
    """
    # ---- encoder: layer1 + relu ----------------------------------------
    h1 = jnp.dot(x_ref[...], w1_ref[...],
                 preferred_element_type=jnp.float32) + b1_ref[...]
    h1 = jnp.maximum(h1, 0.0)                                    # (TB, 512) f32

    # ---- fused mu / logvar head: one 256-wide MXU pass ------------------
    # column layout of `enc`: [0:20]=mu, [128:148]=logvar, rest exactly zero.
    # Both slabs are 128-lane aligned, so no cross-lane roll is needed below.
    enc = jnp.dot(h1.astype(jnp.bfloat16), w2_ref[...],
                  preferred_element_type=jnp.float32) + b2_ref[...]
    enc_ref[...] = enc                                           # (TB, 256) lane-dense

    # ---- reparameterization: z = mu + eps * exp(0.5 * logvar) -----------
    mu_slab = enc[:, :D_Z_P]
    lv_slab = enc[:, D_Z_P:]
    # Padded lanes: logvar lanes 20:128 are exactly 0 -> exp(0)=1, eps pad = 0,
    # so padded z lanes stay finite (0); no inf*0 NaN hazard.
    z = mu_slab + eps_ref[...].astype(jnp.float32) * jnp.exp(0.5 * lv_slab)

    # ---- decoder ---------------------------------------------------------
    # Only lanes 0:20 of z are meaningful; w3 rows 20:128 are zero so the
    # remaining lanes never contribute.
    h3 = jnp.dot(z.astype(jnp.bfloat16), w3_ref[...],
                 preferred_element_type=jnp.float32) + b3_ref[...]
    h3 = jnp.maximum(h3, 0.0)                                    # (TB, 512) f32
    logits = jnp.dot(h3.astype(jnp.bfloat16), w4_ref[...],
                     preferred_element_type=jnp.float32) + b4_ref[...]
    xrec_ref[...] = jax.nn.sigmoid(logits)                       # (TB, 784)


def init_params(key):
    """Deterministic synthetic parameters (shapes match the PyTorch module)."""
    def linear(key, d_in, d_out):
        kw, kb = jax.random.split(key)
        bound = 1.0 / (d_in ** 0.5)
        w = jax.random.uniform(kw, (d_in, d_out), jnp.float32, -bound, bound)
        b = jax.random.uniform(kb, (1, d_out), jnp.float32, -bound, bound)
        return w, b

    keys = jax.random.split(key, 5)
    return (
        linear(keys[0], D_IN, D_H),   # layer1
        linear(keys[1], D_H, D_Z),    # layer21 (mu)
        linear(keys[2], D_H, D_Z),    # layer22 (logvar)
        linear(keys[3], D_Z, D_H),    # layer3
        linear(keys[4], D_H, D_IN),   # layer4
    )


def pack_params(params):
    """Pad / fuse / bf16-cast the f32 parameters into the kernel layout."""
    (w1, b1), (w21, b21), (w22, b22), (w3, b3), (w4, b4) = params
    bf = jnp.bfloat16

    # layer1: K stays at the logical 784 (no feature padding of x)
    w1p = jnp.zeros((D_IN, D_H_P), bf).at[:, :D_H].set(w1.astype(bf))
    b1p = jnp.zeros((1, D_H_P), jnp.float32).at[:, :D_H].set(b1)

    # fused mu/logvar head: mu -> lanes [0:20], logvar -> lanes [128:148]
    w2p = (jnp.zeros((D_H_P, ENC_W), bf)
           .at[:D_H, :D_Z].set(w21.astype(bf))
           .at[:D_H, LOGVAR_OFF:LOGVAR_OFF + D_Z].set(w22.astype(bf)))
    b2p = (jnp.zeros((1, ENC_W), jnp.float32)
           .at[:, :D_Z].set(b21)
           .at[:, LOGVAR_OFF:LOGVAR_OFF + D_Z].set(b22))

    w3p = jnp.zeros((D_Z_P, D_H_P), bf).at[:D_Z, :D_H].set(w3.astype(bf))
    b3p = jnp.zeros((1, D_H_P), jnp.float32).at[:, :D_H].set(b3)

    # layer4: output stays at the logical 784 width (lane-dense enough:
    # only the last 16 lanes of the final vreg group are masked on store)
    w4p = jnp.zeros((D_H_P, D_IN), bf).at[:D_H, :].set(w4.astype(bf))
    b4p = b4.astype(jnp.float32)

    return (w1p, b1p, w2p, b2p, w3p, b3p, w4p, b4p)


def vae_forward(x_in, eps, packed, *, max_tile=512):
    """x_in: any shape with trailing 784 elements per row (e.g. (B,1,28,28));
    eps: (B, 20) standard-normal noise (replaces torch.randn_like)."""
    x = x_in.reshape(-1, D_IN)                  # == x.view(-1, 784)
    B = x.shape[0]

    w1p, b1p, w2p, b2p, w3p, b3p, w4p, b4p = packed

    TB = _choose_tile(B, max_tile)
    B_pad = _round_up(B, TB)
    grid = (B_pad // TB,)

    # bf16 activation inputs (halves the dominant input DMA stream); the
    # batch pad — only when B % TB != 0 — is fused with the cast.
    if B_pad == B:
        xp = x.astype(jnp.bfloat16)
    else:
        xp = (jnp.zeros((B_pad, D_IN), jnp.bfloat16)
              .at[:B].set(x.astype(jnp.bfloat16)))
    epsp = (jnp.zeros((B_pad, D_Z_P), jnp.bfloat16)
            .at[:B, :D_Z].set(eps.astype(jnp.bfloat16)))

    def batch_spec(width):
        return pl.BlockSpec((TB, width), lambda i: (i, 0))

    def resident_spec(shape):
        # Constant index_map -> block stays VMEM-resident across the grid;
        # single-buffered (no point double-buffering a block that never moves).
        return pl.BlockSpec(shape, lambda i: (0, 0),
                            pipeline_mode=pl.Buffered(1))

    in_specs = [
        batch_spec(D_IN),              # x
        batch_spec(D_Z_P),             # eps
        resident_spec(w1p.shape), resident_spec(b1p.shape),
        resident_spec(w2p.shape), resident_spec(b2p.shape),
        resident_spec(w3p.shape), resident_spec(b3p.shape),
        resident_spec(w4p.shape), resident_spec(b4p.shape),
    ]
    out_specs = (batch_spec(D_IN), batch_spec(ENC_W))
    out_shape = (jax.ShapeDtypeStruct((B_pad, D_IN), jnp.float32),
                 jax.ShapeDtypeStruct((B_pad, ENC_W), jnp.float32))

    weight_bytes = sum(int(a.size) * a.dtype.itemsize for a in packed)
    flops = 2 * B_pad * (D_IN * D_H_P + D_H_P * ENC_W
                         + D_Z_P * D_H_P + D_H_P * D_IN)
    bytes_accessed = (weight_bytes
                      + int(xp.size) * 2 + int(epsp.size) * 2     # bf16 inputs
                      + B_pad * (D_IN + ENC_W) * 4)               # f32 outputs
    cost = pl.CostEstimate(flops=flops,
                           transcendentals=B_pad * (D_Z_P + D_IN),
                           bytes_accessed=bytes_accessed)

    xrec_p, enc = pl.pallas_call(
        vae_kernel,
        out_shape=out_shape,
        grid_spec=pltpu.PrefetchScalarGridSpec(
            num_scalar_prefetch=0,
            grid=grid,
            in_specs=in_specs,
            out_specs=out_specs,
        ),
        compiler_params=pltpu.CompilerParams(
            dimension_semantics=("parallel",),   # batch tiles are independent
            vmem_limit_bytes=32 * 1024 * 1024,   # fits TB=512 on every generation
        ),
        cost_estimate=cost,
    )(xp, epsp, w1p, b1p, w2p, b2p, w3p, b3p, w4p, b4p)

    xrec = xrec_p if B_pad == B else xrec_p[:B]   # no feature un-pad needed
    mu = enc[:B, :D_Z]
    logvar = enc[:B, LOGVAR_OFF:LOGVAR_OFF + D_Z]
    return xrec, mu, logvar


if __name__ == "__main__":
    key = jax.random.PRNGKey(0)
    k_params, k_x, k_eps = jax.random.split(key, 3)

    params = init_params(k_params)
    packed = pack_params(params)

    B = 2
    x = jax.random.uniform(k_x, (B, 1, 28, 28), jnp.float32)   # NCHW, like MNIST
    eps = jax.random.normal(k_eps, (B, D_Z), jnp.float32)      # randn_like(mu)

    xrec, mu, logvar = vae_forward(x, eps, packed)
    jax.block_until_ready((xrec, mu, logvar))

    # Pure-JAX f32 reference.  Kernel matmuls use bf16 weights/activations
    # with f32 accumulation, so the comparison tolerance is relaxed.
    (w1, b1), (w21, b21), (w22, b22), (w3, b3), (w4, b4) = params
    xf = x.reshape(B, D_IN)
    h1 = jnp.maximum(xf @ w1 + b1, 0.0)
    mu_r = h1 @ w21 + b21
    lv_r = h1 @ w22 + b22
    z_r = mu_r + eps * jnp.exp(0.5 * lv_r)
    h3 = jnp.maximum(z_r @ w3 + b3, 0.0)
    xr_r = jax.nn.sigmoid(h3 @ w4 + b4)

    assert xrec.shape == (B, D_IN) and mu.shape == (B, D_Z) and logvar.shape == (B, D_Z)
    assert jnp.allclose(mu, mu_r, atol=5e-2, rtol=5e-2)
    assert jnp.allclose(logvar, lv_r, atol=5e-2, rtol=5e-2)
    assert jnp.allclose(xrec, xr_r, atol=5e-2, rtol=5e-2)

    print("KERNEL_OK")
</pallas_src>

<mosaic_0001>
module attributes {stable_mosaic.version = 11 : i64} {
  func.func @vae_kernel(%arg0: i32, %arg1: memref<8x784xbf16, #tpu.memory_space<vmem>>, %arg2: memref<8x128xbf16, #tpu.memory_space<vmem>>, %arg3: memref<784x512xbf16, #tpu.memory_space<vmem>>, %arg4: memref<1x512xf32, #tpu.memory_space<vmem>>, %arg5: memref<512x256xbf16, #tpu.memory_space<vmem>>, %arg6: memref<1x256xf32, #tpu.memory_space<vmem>>, %arg7: memref<128x512xbf16, #tpu.memory_space<vmem>>, %arg8: memref<1x512xf32, #tpu.memory_space<vmem>>, %arg9: memref<512x784xbf16, #tpu.memory_space<vmem>>, %arg10: memref<1x784xf32, #tpu.memory_space<vmem>>, %arg11: memref<8x784xf32, #tpu.memory_space<vmem>>, %arg12: memref<8x256xf32, #tpu.memory_space<vmem>>) attributes {dimension_semantics = [#tpu.dimension_semantics<parallel>], iteration_bounds = array<i64: 1>, scalar_prefetch = 0 : i64, scratch_operands = 0 : i64, tpu.core_type = #tpu.core_type<tc>, window_params = [{transform_indices = @transform_0, window_bounds = array<i64: 8, 784>}, {transform_indices = @transform_1, window_bounds = array<i64: 8, 128>}, {pipeline_mode = #tpu.pipeline_mode<synchronous>, transform_indices = @transform_2, window_bounds = array<i64: 784, 512>}, {pipeline_mode = #tpu.pipeline_mode<synchronous>, transform_indices = @transform_3, window_bounds = array<i64: 1, 512>}, {pipeline_mode = #tpu.pipeline_mode<synchronous>, transform_indices = @transform_4, window_bounds = array<i64: 512, 256>}, {pipeline_mode = #tpu.pipeline_mode<synchronous>, transform_indices = @transform_5, window_bounds = array<i64: 1, 256>}, {pipeline_mode = #tpu.pipeline_mode<synchronous>, transform_indices = @transform_6, window_bounds = array<i64: 128, 512>}, {pipeline_mode = #tpu.pipeline_mode<synchronous>, transform_indices = @transform_7, window_bounds = array<i64: 1, 512>}, {pipeline_mode = #tpu.pipeline_mode<synchronous>, transform_indices = @transform_8, window_bounds = array<i64: 512, 784>}, {pipeline_mode = #tpu.pipeline_mode<synchronous>, transform_indices = @transform_9, window_bounds = array<i64: 1, 784>}, {transform_indices = @transform_10, window_bounds = array<i64: 8, 784>}, {transform_indices = @transform_11, window_bounds = array<i64: 8, 256>}]} {
    %c0 = arith.constant 0 : index
    %c0_0 = arith.constant 0 : index
    %0 = vector.load %arg1[%c0, %c0_0] : memref<8x784xbf16, #tpu.memory_space<vmem>>, vector<8x784xbf16>
    %c0_1 = arith.constant 0 : index
    %c0_2 = arith.constant 0 : index
    %1 = vector.load %arg3[%c0_1, %c0_2] : memref<784x512xbf16, #tpu.memory_space<vmem>>, vector<784x512xbf16>
    %cst = arith.constant dense<0.000000e+00> : vector<8x512xf32>
    %2 = tpu.matmul %0, %1, %cst {dimension_numbers = #tpu.dot_dimension_numbers<[1], [0], [0], [1], [0, 0, 1, 1], [], []>} : vector<8x784xbf16>, vector<784x512xbf16>, vector<8x512xf32> -> vector<8x512xf32>
    %c0_3 = arith.constant 0 : index
    %c0_4 = arith.constant 0 : index
    %3 = vector.load %arg4[%c0_3, %c0_4] : memref<1x512xf32, #tpu.memory_space<vmem>>, vector<1x512xf32>
    %4 = vector.broadcast %3 : vector<1x512xf32> to vector<8x512xf32>
    %5 = arith.addf %2, %4 : vector<8x512xf32>
    %cst_5 = arith.constant 0.000000e+00 : f32
    %6 = vector.broadcast %cst_5 : f32 to vector<8x512xf32>
    %7 = arith.maximumf %5, %6 : vector<8x512xf32>
    %8 = arith.truncf %7 : vector<8x512xf32> to vector<8x512xbf16>
    %c0_6 = arith.constant 0 : index
    %c0_7 = arith.constant 0 : index
    %9 = vector.load %arg5[%c0_6, %c0_7] : memref<512x256xbf16, #tpu.memory_space<vmem>>, vector<512x256xbf16>
    %cst_8 = arith.constant dense<0.000000e+00> : vector<8x256xf32>
    %10 = tpu.matmul %8, %9, %cst_8 {dimension_numbers = #tpu.dot_dimension_numbers<[1], [0], [0], [1], [0, 0, 1, 1], [], []>} : vector<8x512xbf16>, vector<512x256xbf16>, vector<8x256xf32> -> vector<8x256xf32>
    %c0_9 = arith.constant 0 : index
    %c0_10 = arith.constant 0 : index
    %11 = vector.load %arg6[%c0_9, %c0_10] : memref<1x256xf32, #tpu.memory_space<vmem>>, vector<1x256xf32>
    %12 = vector.broadcast %11 : vector<1x256xf32> to vector<8x256xf32>
    %13 = arith.addf %10, %12 : vector<8x256xf32>
    %c0_11 = arith.constant 0 : index
    %c0_12 = arith.constant 0 : index
    %14 = vector.load %arg12[%c0_11, %c0_12] : memref<8x256xf32, #tpu.memory_space<vmem>>, vector<8x256xf32>
    tpu.vector_store %arg12[%c0_11, %c0_12], %13 {strides = array<i32>} : memref<8x256xf32, #tpu.memory_space<vmem>>, vector<8x256xf32>,
    %15 = vector.extract_strided_slice %13 {offsets = [0, 0], sizes = [8, 128], strides = [1, 1]} : vector<8x256xf32> to vector<8x128xf32>
    %16 = vector.extract_strided_slice %13 {offsets = [0, 128], sizes = [8, 128], strides = [1, 1]} : vector<8x256xf32> to vector<8x128xf32>
    %c0_13 = arith.constant 0 : index
    %c0_14 = arith.constant 0 : index
    %17 = vector.load %arg2[%c0_13, %c0_14] : memref<8x128xbf16, #tpu.memory_space<vmem>>, vector<8x128xbf16>
    %18 = arith.extf %17 : vector<8x128xbf16> to vector<8x128xf32>
    %cst_15 = arith.constant 5.000000e-01 : f32
    %19 = vector.broadcast %cst_15 : f32 to vector<8x128xf32>
    %20 = arith.mulf %19, %16 : vector<8x128xf32>
    %21 = math.exp %20 : vector<8x128xf32>
    %22 = arith.mulf %18, %21 : vector<8x128xf32>
    %23 = arith.addf %15, %22 : vector<8x128xf32>
    %24 = arith.truncf %23 : vector<8x128xf32> to vector<8x128xbf16>
    %c0_16 = arith.constant 0 : index
    %c0_17 = arith.constant 0 : index
    %25 = vector.load %arg7[%c0_16, %c0_17] : memref<128x512xbf16, #tpu.memory_space<vmem>>, vector<128x512xbf16>
    %cst_18 = arith.constant dense<0.000000e+00> : vector<8x512xf32>
    %26 = tpu.matmul %24, %25, %cst_18 {dimension_numbers = #tpu.dot_dimension_numbers<[1], [0], [0], [1], [0, 0, 1, 1], [], []>} : vector<8x128xbf16>, vector<128x512xbf16>, vector<8x512xf32> -> vector<8x512xf32>
    %c0_19 = arith.constant 0 : index
    %c0_20 = arith.constant 0 : index
    %27 = vector.load %arg8[%c0_19, %c0_20] : memref<1x512xf32, #tpu.memory_space<vmem>>, vector<1x512xf32>
    %28 = vector.broadcast %27 : vector<1x512xf32> to vector<8x512xf32>
    %29 = arith.addf %26, %28 : vector<8x512xf32>
    %cst_21 = arith.constant 0.000000e+00 : f32
    %30 = vector.broadcast %cst_21 : f32 to vector<8x512xf32>
    %31 = arith.maximumf %29, %30 : vector<8x512xf32>
    %32 = arith.truncf %31 : vector<8x512xf32> to vector<8x512xbf16>
    %c0_22 = arith.constant 0 : index
    %c0_23 = arith.constant 0 : index
    %33 = vector.load %arg9[%c0_22, %c0_23] : memref<512x784xbf16, #tpu.memory_space<vmem>>, vector<512x784xbf16>
    %cst_24 = arith.constant dense<0.000000e+00> : vector<8x784xf32>
    %34 = tpu.matmul %32, %33, %cst_24 {dimension_numbers = #tpu.dot_dimension_numbers<[1], [0], [0], [1], [0, 0, 1, 1], [], []>} : vector<8x512xbf16>, vector<512x784xbf16>, vector<8x784xf32> -> vector<8x784xf32>
    %c0_25 = arith.constant 0 : index
    %c0_26 = arith.constant 0 : index
    %35 = vector.load %arg10[%c0_25, %c0_26] : memref<1x784xf32, #tpu.memory_space<vmem>>, vector<1x784xf32>
    %36 = vector.broadcast %35 : vector<1x784xf32> to vector<8x784xf32>
    %37 = arith.addf %34, %36 : vector<8x784xf32>
    %38 = arith.negf %37 : vector<8x784xf32>
    %39 = math.exp %38 : vector<8x784xf32>
    %cst_27 = arith.constant 1.000000e+00 : f32
    %40 = vector.broadcast %cst_27 : f32 to vector<8x784xf32>
    %41 = arith.addf %40, %39 : vector<8x784xf32>
    %42 = arith.divf %40, %41 : vector<8x784xf32>
    %c0_28 = arith.constant 0 : index
    %c0_29 = arith.constant 0 : index
    %43 = vector.load %arg11[%c0_28, %c0_29] : memref<8x784xf32, #tpu.memory_space<vmem>>, vector<8x784xf32>
    tpu.vector_store %arg11[%c0_28, %c0_29], %42 {strides = array<i32>} : memref<8x784xf32, #tpu.memory_space<vmem>>, vector<8x784xf32>,
    return
  }
  func.func @transform_0(%arg0: i32) -> (i32, i32) {
    %c0_i32 = arith.constant 0 : i32
    %c0_i32_0 = arith.constant 0 : i32
    return %arg0, %c0_i32 : i32, i32
  }
  func.func @transform_1(%arg0: i32) -> (i32, i32) {
    %c0_i32 = arith.constant 0 : i32
    %c0_i32_0 = arith.constant 0 : i32
    return %arg0, %c0_i32 : i32, i32
  }
  func.func @transform_2(%arg0: i32) -> (i32, i32) {
    %c0_i32 = arith.constant 0 : i32
    %c0_i32_0 = arith.constant 0 : i32
    %c0_i32_1 = arith.constant 0 : i32
    return %c0_i32, %c0_i32_0 : i32, i32
  }
  func.func @transform_3(%arg0: i32) -> (i32, i32) {
    %c0_i32 = arith.constant 0 : i32
    %c0_i32_0 = arith.constant 0 : i32
    %c0_i32_1 = arith.constant 0 : i32
    return %c0_i32, %c0_i32_0 : i32, i32
  }
  func.func @transform_4(%arg0: i32) -> (i32, i32) {
    %c0_i32 = arith.constant 0 : i32
    %c0_i32_0 = arith.constant 0 : i32
    %c0_i32_1 = arith.constant 0 : i32
    return %c0_i32, %c0_i32_0 : i32, i32
  }
  func.func @transform_5(%arg0: i32) -> (i32, i32) {
    %c0_i32 = arith.constant 0 : i32
    %c0_i32_0 = arith.constant 0 : i32
    %c0_i32_1 = arith.constant 0 : i32
    return %c0_i32, %c0_i32_0 : i32, i32
  }
  func.func @transform_6(%arg0: i32) -> (i32, i32) {
    %c0_i32 = arith.constant 0 : i32
    %c0_i32_0 = arith.constant 0 : i32
    %c0_i32_1 = arith.constant 0 : i32
    return %c0_i32, %c0_i32_0 : i32, i32
  }
  func.func @transform_7(%arg0: i32) -> (i32, i32) {
    %c0_i32 = arith.constant 0 : i32
    %c0_i32_0 = arith.constant 0 : i32
    %c0_i32_1 = arith.constant 0 : i32
    return %c0_i32, %c0_i32_0 : i32, i32
  }
  func.func @transform_8(%arg0: i32) -> (i32, i32) {
    %c0_i32 = arith.constant 0 : i32
    %c0_i32_0 = arith.constant 0 : i32
    %c0_i32_1 = arith.constant 0 : i32
    return %c0_i32, %c0_i32_0 : i32, i32
  }
  func.func @transform_9(%arg0: i32) -> (i32, i32) {
    %c0_i32 = arith.constant 0 : i32
    %c0_i32_0 = arith.constant 0 : i32
    %c0_i32_1 = arith.constant 0 : i32
    return %c0_i32, %c0_i32_0 : i32, i32
  }
  func.func @transform_10(%arg0: i32) -> (i32, i32) {
    %c0_i32 = arith.constant 0 : i32
    %c0_i32_0 = arith.constant 0 : i32
    return %arg0, %c0_i32 : i32, i32
  }
  func.func @transform_11(%arg0: i32) -> (i32, i32) {
    %c0_i32 = arith.constant 0 : i32
    %c0_i32_0 = arith.constant 0 : i32
    return %arg0, %c0_i32 : i32, i32
  }
}

</mosaic_0001>

<bundles_post_ra>
// kernel: tpu_custom_call.1
= control target key start
LH: loop header
LB: loop body
LE: loop exit
PB: predicated region body
PF: predicated region fallthrough
CT: control target
= control target key end

     0   :  { %17 = vsyncpa [#allocation3], 0  ;;  %vm1254_vm0 = vcmask 130048   ;;  %s10367_s0 = inlined_call_operand.vmem [shape: bf16[8,784], index: 0, kind: input, shape index: {}]   ;;  %s10368_s1 = inlined_call_operand.vmem [shape: bf16[8,128], index: 1, kind: input, shape index: {}]   ;;  %s10369_s2 = inlined_call_operand.vmem [shape: bf16[784,512], index: 2, kind: input, shape index: {}]   ;;  %s10370_s3 = inlined_call_operand.vmem [shape: f32[1,512], index: 3, kind: input, shape index: {}]   ;;  %s10371_s4 = inlined_call_operand.vmem [shape: bf16[512,256], index: 4, kind: input, shape index: {}]   ;;  %s10372_s5 = inlined_call_operand.vmem [shape: f32[1,256], index: 5, kind: input, shape index: {}]   ;;  %s10373_s6 = inlined_call_operand.vmem [shape: bf16[128,512], index: 6, kind: input, shape index: {}]   ;;  %s10374_s7 = inlined_call_operand.vmem [shape: f32[1,512], index: 7, kind: input, shape index: {}]   ;;  %s10375_s8 = inlined_call_operand.vmem [shape: bf16[512,784], index: 8, kind: input, shape index: {}]   ;;  %s10376_s9 = inlined_call_operand.vmem [shape: f32[1,784], index: 9, kind: input, shape index: {}]   ;;  %s10377_s10 = inlined_call_operand.hbm [shape: f32[8,784], index: 10, kind: output, shape index: {0}]   ;;  %s10378_s11 = inlined_call_operand.hbm [shape: f32[8,256], index: 11, kind: output, shape index: {1}]  }
   0x1   :  { %v4470_v0 = vld [vmem:[%s10369_s2 + $0xe0] sm:$0xf]  ;;  %v6461_v1 = vld [vmem:[%s10369_s2 + $0xec] sm:$0xf0] }
   0x2   :  { %v4598_v2 = vld [vmem:[%s10369_s2 + $0x1e0] sm:$0xf]  ;;  %v4471_v3 = vor.u32 %v6461_v1, %v4470_v0  ;;  %v6493_v4 = vld [vmem:[%s10369_s2 + $0x1ec] sm:$0xf0] }
   0x3   :  { %v4726_v5 = vld [vmem:[%s10369_s2 + $0x2e0] sm:$0xf]  ;;  %v6525_v6 = vld [vmem:[%s10369_s2 + $0x2ec] sm:$0xf0]  ;;  %v4599_v7 = vor.u32 %v6493_v4, %v4598_v2 }
   0x4   :  { %v4727_v8 = vor.u32 %v6525_v6, %v4726_v5  ;;  %v4854_v9 = vld [vmem:[%s10369_s2 + $0x3e0] sm:$0xf]  ;;  %v6557_v10 = vld [vmem:[%s10369_s2 + $0x3ec] sm:$0xf0]  ;;  %1258 = vmatpush.bf16.msra.mxu0 %v4471_v3 }
   0x5   :  { %v4454_v11 = vld [vmem:[%s10369_s2 + $0xc0] sm:$0xf]  ;;  %v4855_v12 = vor.u32 %v6557_v10, %v4854_v9  ;;  %v6457_v13 = vld [vmem:[%s10369_s2 + $0xcc] sm:$0xf0]  ;;  %1271 = vmatpush.bf16.msra.mxu1 %v4599_v7 }
   0x6   :  { %v4582_v14 = vld [vmem:[%s10369_s2 + $0x1c0] sm:$0xf]  ;;  %v6489_v15 = vld [vmem:[%s10369_s2 + $0x1cc] sm:$0xf0]  ;;  %1284 = vmatpush.bf16.msra.mxu2 %v4727_v8  ;;  %v4455_v16 = vor.u32 %v6457_v13, %v4454_v11 }
   0x7   :  { %v4583_v17 = vor.u32 %v6489_v15, %v4582_v14  ;;  %v4710_v18 = vld [vmem:[%s10369_s2 + $0x2c0] sm:$0xf]  ;;  %v6521_v19 = vld [vmem:[%s10369_s2 + $0x2cc] sm:$0xf0]  ;;  %1297 = vmatpush.bf16.msra.mxu3 %v4855_v12 }
   0x8   :  { %v4838_v20 = vld [vmem:[%s10369_s2 + $0x3c0] sm:$0xf]  ;;  %v4711_v21 = vor.u32 %v6521_v19, %v4710_v18  ;;  %v6553_v22 = vld [vmem:[%s10369_s2 + $0x3cc] sm:$0xf0]  ;;  %1259 = vmatpush.bf16.msra.mxu0 %v4455_v16 }
   0x9   :  { %v4438_v23 = vld [vmem:[%s10369_s2 + $0xa0] sm:$0xf]  ;;  %v6453_v24 = vld [vmem:[%s10369_s2 + $0xac] sm:$0xf0]  ;;  %v4839_v25 = vor.u32 %v6553_v22, %v4838_v20  ;;  %1272 = vmatpush.bf16.msra.mxu1 %v4583_v17 }
   0xa   :  { %v4566_v26 = vld [vmem:[%s10369_s2 + $0x1a0] sm:$0xf]  ;;  %v6485_v27 = vld [vmem:[%s10369_s2 + $0x1ac] sm:$0xf0]  ;;  %v4439_v29 = vor.u32 %v6453_v24, %v4438_v23  ;;  %1285 = vmatpush.bf16.msra.mxu2 %v4711_v21 }
   0xb   :  { %v4694_v28 = vld [vmem:[%s10369_s2 + $0x2a0] sm:$0xf]  ;;  %v6517_v30 = vld [vmem:[%s10369_s2 + $0x2ac] sm:$0xf0]  ;;  %v4567_v33 = vor.u32 %v6485_v27, %v4566_v26  ;;  %1298 = vmatpush.bf16.msra.mxu3 %v4839_v25  ;;  %v41_v25 = vld [vmem:[%s10367_s0 + $0x8] sm:$0xff] }
   0xc   :  { %v4822_v31 = vld [vmem:[%s10369_s2 + $0x3a0] sm:$0xf]  ;;  %v6549_v32 = vld [vmem:[%s10369_s2 + $0x3ac] sm:$0xf0]  ;;  %v4695_v34 = vor.u32 %v6517_v30, %v4694_v28  ;;  %1260 = vmatpush.bf16.msra.mxu0 %v4439_v29 }
   0xd   :  { %v4422_v35 = vld [vmem:[%s10369_s2 + $0x80] sm:$0xf]  ;;  %v6449_v36 = vld [vmem:[%s10369_s2 + $0x8c] sm:$0xf0]  ;;  %v4823_v38 = vor.u32 %v6549_v32, %v4822_v31  ;;  %1273 = vmatpush.bf16.msra.mxu1 %v4567_v33 }
   0xe   :  { %v4550_v37 = vld [vmem:[%s10369_s2 + $0x180] sm:$0xf]  ;;  %v6481_v39 = vld [vmem:[%s10369_s2 + $0x18c] sm:$0xf0]  ;;  %v4423_v44 = vor.u32 %v6449_v36, %v4422_v35  ;;  %1286 = vmatpush.bf16.msra.mxu2 %v4695_v34  ;;  %v6459_v34 = vld [vmem:[%s10369_s2 + $0xe4] sm:$0xf]  ;;  %v256_v36 = vunpack.c.l.b16 %v41_v25 }
   0xf   :  { %v4678_v40 = vld [vmem:[%s10369_s2 + $0x280] sm:$0xf]  ;;  %v6513_v41 = vld [vmem:[%s10369_s2 + $0x28c] sm:$0xf0]  ;;  %v4551_v45 = vor.u32 %v6481_v39, %v4550_v37  ;;  %1299 = vmatpush.bf16.msra.mxu3 %v4823_v38  ;;  %v4472_v35 = vld [vmem:[%s10369_s2 + $0xf0] sm:$0xf0] }
  0x10   :  { %v4806_v42 = vld [vmem:[%s10369_s2 + $0x380] sm:$0xf]  ;;  %v6545_v43 = vld [vmem:[%s10369_s2 + $0x38c] sm:$0xf0]  ;;  %v4679_v46 = vor.u32 %v6513_v41, %v4678_v40  ;;  %1261 = vmatpush.bf16.msra.mxu0 %v4423_v44 }
  0x11   :  { %v4406_v47 = vld [vmem:[%s10369_s2 + $0x60] sm:$0xf]  ;;  %v6445_v48 = vld [vmem:[%s10369_s2 + $0x6c] sm:$0xf0]  ;;  %v4807_v50 = vor.u32 %v6545_v43, %v4806_v42  ;;  %1274 = vmatpush.bf16.msra.mxu1 %v4551_v45  ;;  %v257_v42 = vunpack.c.h.b16 %v41_v25  ;;  %v6479_v25 = vld [vmem:[%s10369_s2 + $0x184] sm:$0xf] }
  0x12   :  { %v4534_v49 = vld [vmem:[%s10369_s2 + $0x160] sm:$0xf]  ;;  %v6477_v51 = vld [vmem:[%s10369_s2 + $0x16c] sm:$0xf0]  ;;  %v4407_v56 = vor.u32 %v6445_v48, %v4406_v47  ;;  %1287 = vmatpush.bf16.msra.mxu2 %v4679_v46  ;;  %v6491_v46 = vld [vmem:[%s10369_s2 + $0x1e4] sm:$0xf] }
  0x13   :  { %v4662_v52 = vld [vmem:[%s10369_s2 + $0x260] sm:$0xf]  ;;  %v6509_v53 = vld [vmem:[%s10369_s2 + $0x26c] sm:$0xf0]  ;;  %v4535_v57 = vor.u32 %v6477_v51, %v4534_v49  ;;  %1300 = vmatpush.bf16.msra.mxu3 %v4807_v50  ;;  %v4600_v47 = vld [vmem:[%s10369_s2 + $0x1f0] sm:$0xf0]  ;;  %v4475_v49 = vor.u32 %v6459_v34, %v4472_v35 }
  0x14   :  { %v4790_v54 = vld [vmem:[%s10369_s2 + $0x360] sm:$0xf]  ;;  %v6541_v55 = vld [vmem:[%s10369_s2 + $0x36c] sm:$0xf0]  ;;  %v4663_v58 = vor.u32 %v6509_v53, %v4662_v52  ;;  %1262 = vmatpush.bf16.msra.mxu0 %v4407_v56  ;;  %v7330_v53 = vpack.c.b16 %v256_v36, %v256_v36  ;;  %v4456_v56 = vld [vmem:[%s10369_s2 + $0xd0] sm:$0xf0] }
  0x15   :  { %v4390_v59 = vld [vmem:[%s10369_s2 + $0x40] sm:$0xf]  ;;  %v6441_v60 = vld [vmem:[%s10369_s2 + $0x4c] sm:$0xf0]  ;;  %v4791_v62 = vor.u32 %v6541_v55, %v4790_v54  ;;  %1275 = vmatpush.bf16.msra.mxu1 %v4535_v57  ;;  %v6455_v55 = vld [vmem:[%s10369_s2 + $0xc4] sm:$0xf] }
  0x16   :  { %v4518_v61 = vld [vmem:[%s10369_s2 + $0x140] sm:$0xf]  ;;  %v6473_v63 = vld [vmem:[%s10369_s2 + $0x14c] sm:$0xf0]  ;;  %v4391_v4 = vor.u32 %v6441_v60, %v4390_v59  ;;  %1288 = vmatpush.bf16.msra.mxu2 %v4663_v58  ;;  %v7343_v60 = vpack.c.b16 %v257_v42, %v257_v42  ;;  %v4408_v34 = vld [vmem:[%s10369_s2 + $0x70] sm:$0xf0] }
  0x17   :  { %v4646_v0 = vld [vmem:[%s10369_s2 + $0x240] sm:$0xf]  ;;  %v6505_v1 = vld [vmem:[%s10369_s2 + $0x24c] sm:$0xf0]  ;;  %v4519_v5 = vor.u32 %v6473_v63, %v4518_v61  ;;  %1301 = vmatpush.bf16.msra.mxu3 %v4791_v62  ;;  %v4603_v61 = vor.u32 %v6491_v46, %v4600_v47  ;;  %v6487_v63 = vld [vmem:[%s10369_s2 + $0x1c4] sm:$0xf] }
  0x18   :  { %v4774_v2 = vld [vmem:[%s10369_s2 + $0x340] sm:$0xf]  ;;  %v6537_v3 = vld [vmem:[%s10369_s2 + $0x34c] sm:$0xf0]  ;;  %v4647_v6 = vor.u32 %v6505_v1, %v4646_v0  ;;  %1263 = vmatpush.bf16.msra.mxu0 %v4391_v4  ;;  %v4584_v0 = vld [vmem:[%s10369_s2 + $0x1d0] sm:$0xf0] }
  0x19   :  { %v4374_v7 = vld [vmem:[%s10369_s2 + $0x20] sm:$0xf]  ;;  %v6437_v8 = vld [vmem:[%s10369_s2 + $0x2c] sm:$0xf0]  ;;  %v4775_v10 = vor.u32 %v6537_v3, %v4774_v2  ;;  %1276 = vmatpush.bf16.msra.mxu1 %v4519_v5  ;;  %v4459_v2 = vor.u32 %v6455_v55, %v4456_v56  ;;  %v6439_v46 = vld [vmem:[%s10369_s2 + $0x44] sm:$0xf] }
  0x1a   :  { %v4502_v9 = vld [vmem:[%s10369_s2 + $0x120] sm:$0xf]  ;;  %v6469_v11 = vld [vmem:[%s10369_s2 + $0x12c] sm:$0xf0]  ;;  %v4375_v17 = vor.u32 %v6437_v8, %v4374_v7  ;;  %1289 = vmatpush.bf16.msra.mxu2 %v4647_v6  ;;  %v6451_v7 = vld [vmem:[%s10369_s2 + $0xa4] sm:$0xf] }
  0x1b   :  { %v4630_v12 = vld [vmem:[%s10369_s2 + $0x220] sm:$0xf]  ;;  %v6501_v13 = vld [vmem:[%s10369_s2 + $0x22c] sm:$0xf0]  ;;  %v4503_v21 = vor.u32 %v6469_v11, %v4502_v9  ;;  %1302 = vmatpush.bf16.msra.mxu3 %v4775_v10  ;;  %v4440_v8 = vld [vmem:[%s10369_s2 + $0xb0] sm:$0xf0]  ;;  %v4587_v10 = vor.u32 %v6487_v63, %v4584_v0 }
  0x1c   :  { %v4758_v14 = vld [vmem:[%s10369_s2 + $0x320] sm:$0xf]  ;;  %v6533_v15 = vld [vmem:[%s10369_s2 + $0x32c] sm:$0xf0]  ;;  %v4631_v22 = vor.u32 %v6501_v13, %v4630_v12  ;;  %1264 = vmatpush.bf16.msra.mxu0 %v4375_v17  ;;  %v6483_v12 = vld [vmem:[%s10369_s2 + $0x1a4] sm:$0xf] }
  0x1d   :  { %v4358_v16 = vld [vmem:[%s10369_s2] sm:$0xf]  ;;  %v6433_v18 = vld [vmem:[%s10369_s2 + $0xc] sm:$0xf0]  ;;  %v4759_v26 = vor.u32 %v6533_v15, %v4758_v14  ;;  %1277 = vmatpush.bf16.msra.mxu1 %v4503_v21  ;;  %v4568_v13 = vld [vmem:[%s10369_s2 + $0x1b0] sm:$0xf0]  ;;  %v4443_v15 = vor.u32 %v6451_v7, %v4440_v8 }
  0x1e   :  { %v4486_v19 = vld [vmem:[%s10369_s2 + $0x100] sm:$0xf]  ;;  %v6465_v20 = vld [vmem:[%s10369_s2 + $0x10c] sm:$0xf0]  ;;  %v4359_v33 = vor.u32 %v6433_v18, %v4358_v16  ;;  %1290 = vmatpush.bf16.msra.mxu2 %v4631_v22  ;;  %v4424_v21 = vld [vmem:[%s10369_s2 + $0x90] sm:$0xf0] }
  0x1f   :  { %v4614_v23 = vld [vmem:[%s10369_s2 + $0x200] sm:$0xf]  ;;  %v6497_v24 = vld [vmem:[%s10369_s2 + $0x20c] sm:$0xf0]  ;;  %v4487_v38 = vor.u32 %v6465_v20, %v4486_v19  ;;  %1303 = vmatpush.bf16.msra.mxu3 %v4759_v26  ;;  %v6447_v20 = vld [vmem:[%s10369_s2 + $0x84] sm:$0xf] }
  0x20   :  { %v4742_v27 = vld [vmem:[%s10369_s2 + $0x300] sm:$0xf]  ;;  %v6529_v28 = vld [vmem:[%s10369_s2 + $0x30c] sm:$0xf0]  ;;  %v4615_v39 = vor.u32 %v6497_v24, %v4614_v23  ;;  %1265 = vmatpush.bf16.msra.mxu0 %v4359_v33  ;;  %v43_v22 = vld [vmem:[%s10367_s0 + $0x18] sm:$0xf]  ;;  %v4571_v23 = vor.u32 %v6483_v12, %v4568_v13 }
  0x21   :  { %v4982_v29 = vld [vmem:[%s10369_s2 + $0x4e0] sm:$0xf]  ;;  %v6589_v30 = vld [vmem:[%s10369_s2 + $0x4ec] sm:$0xf0]  ;;  %v4743_v43 = vor.u32 %v6529_v28, %v4742_v27  ;;  %1278 = vmatpush.bf16.msra.mxu1 %v4487_v38  ;;  %v4552_v26 = vld [vmem:[%s10369_s2 + $0x190] sm:$0xf0]  ;;  %v4427_v28 = vor.u32 %v6447_v20, %v4424_v21  ;;  %v260_v35 = vunpack.c.l.b16 %v43_v22 }
  0x22   :  { %v5110_v31 = vld [vmem:[%s10369_s2 + $0x5e0] sm:$0xf]  ;;  %v6621_v32 = vld [vmem:[%s10369_s2 + $0x5ec] sm:$0xf0]  ;;  %v4983_v44 = vor.u32 %v6589_v30, %v4982_v29  ;;  %1291 = vmatpush.bf16.msra.mxu2 %v4615_v39  ;;  %v6443_v33 = vld [vmem:[%s10369_s2 + $0x64] sm:$0xf]  ;;  %v4555_v36 = vor.u32 %v6479_v25, %v4552_v26 }
  0x23   :  { %v40_v37 = vld [vmem:[%s10367_s0] sm:$0xff]  ;;  %v6625_v45 = vld [vmem:[%s10369_s2 + $0x60c] sm:$0xf0]  ;;  %v5111_v48 = vor.u32 %v6621_v32, %v5110_v31  ;;  %1304 = vmatpush.bf16.msra.mxu3 %v4743_v43  ;;  %v4536_v39 = vld [vmem:[%s10369_s2 + $0x170] sm:$0xf0] }
  0x24   :  { %v5126_v40 = vld [vmem:[%s10369_s2 + $0x600] sm:$0xf]  ;;  %v254_v41 = vunpack.c.l.b16 %v40_v37  ;;  %v6585_v51 = vld [vmem:[%s10369_s2 + $0x4cc] sm:$0xf0]  ;;  %v255_v58 = vunpack.c.h.b16 %v40_v37  ;;  %1310 = vmatpush.bf16.msrb.mxu0 %v4983_v44  ;;  %v6475_v38 = vld [vmem:[%s10369_s2 + $0x164] sm:$0xf] }
  0x25   :  { %v4966_v50 = vld [vmem:[%s10369_s2 + $0x4c0] sm:$0xf]  ;;  %v6617_v54 = vld [vmem:[%s10369_s2 + $0x5cc] sm:$0xf0]  ;;  %v5127_v59 = vor.u32 %v6625_v45, %v5126_v40  ;;  %1323 = vmatpush.bf16.msrb.mxu1 %v5111_v48  ;;  %1292 = vmatmul.bf16.vlgmr.msra.gmra.mxu2 %v7330_v53  ;;  %v4392_v47 = vld [vmem:[%s10369_s2 + $0x50] sm:$0xf0]  ;;  %v7450_v48 = vpack.c.b16 %v260_v35, %v260_v35 }
  0x26   :  { %v5094_v52 = vld [vmem:[%s10369_s2 + $0x5c0] sm:$0xf]  ;;  %v7341_v57 = vpack.c.b16 %v254_v41, %v254_v41  ;;  %v4967_v62 = vor.u32 %v6585_v51, %v4966_v50  ;;  %v6581_v4 = vld [vmem:[%s10369_s2 + $0x4ac] sm:$0xf0]  ;;  %v7371_v9 = vpack.c.b16 %v255_v58, %v255_v58  ;;  %1305 = vmatmul.bf16.vlgmr.msra.gmra.mxu3 %v7343_v60  ;;  %v4411_v41 = vor.u32 %v6443_v33, %v4408_v34  ;;  %v6471_v51 = vld [vmem:[%s10369_s2 + $0x144] sm:$0xf] }
  0x27   :  { %1349 = vmatpush.bf16.msrb.mxu3 %v4475_v49  ;;  %v5095_v1 = vor.u32 %v6617_v54, %v5094_v52  ;;  %v4950_v3 = vld [vmem:[%s10369_s2 + $0x4a0] sm:$0xf]  ;;  %v6613_v6 = vld [vmem:[%s10369_s2 + $0x5ac] sm:$0xf0]  ;;  %1343 = vmatpush.bf16.msrb.mxu2 %v5127_v59  ;;  %v4539_v49 = vor.u32 %v6475_v38, %v4536_v39  ;;  %v4520_v52 = vld [vmem:[%s10369_s2 + $0x150] sm:$0xf0]  ;;  %v4395_v55 = vor.u32 %v6439_v46, %v4392_v47 }
  0x28   :  { %v5078_v5 = vld [vmem:[%s10369_s2 + $0x5a0] sm:$0xf]  ;;  %1266 = vmatmul.bf16.vlgmr.msra.gmra.mxu0 %v7341_v57  ;;  %v4951_v11 = vor.u32 %v6581_v4, %v4950_v3  ;;  %v6577_v17 = vld [vmem:[%s10369_s2 + $0x48c] sm:$0xf0]  ;;  %1279 = vmatmul.bf16.vlgmr.msra.gmra.mxu1 %v7371_v9  ;;  %v4376_v63 = vld [vmem:[%s10369_s2 + $0x30] sm:$0xf0] }
  0x29   :  { %1311 = vmatpush.bf16.msrb.mxu0 %v4967_v62  ;;  %1324 = vmatpush.bf16.msrb.mxu1 %v5095_v1  ;;  %v5079_v14 = vor.u32 %v6613_v6, %v5078_v5  ;;  %v4934_v16 = vld [vmem:[%s10369_s2 + $0x480] sm:$0xf]  ;;  %v6609_v19 = vld [vmem:[%s10369_s2 + $0x58c] sm:$0xf0]  ;;  %v6435_v62 = vld [vmem:[%s10369_s2 + $0x24] sm:$0xf]  ;;  %v4523_v1 = vor.u32 %v6471_v51, %v4520_v52 }
  0x2a   :  { %v5062_v18 = vld [vmem:[%s10369_s2 + $0x580] sm:$0xf]  ;;  %v4935_v24 = vor.u32 %v6577_v17, %v4934_v16  ;;  %v6573_v30 = vld [vmem:[%s10369_s2 + $0x46c] sm:$0xf0]  ;;  %v6467_v0 = vld [vmem:[%s10369_s2 + $0x124] sm:$0xf]  ;;  %v4379_v7 = vor.u32 %v6435_v62, %v4376_v63 }
  0x2b   :  { %1362 = vmatpush.bf16.msra.mxu2 %v4603_v61  ;;  %1350 = vmatpush.bf16.msrb.mxu3 %v4459_v2  ;;  %v5063_v27 = vor.u32 %v6609_v19, %v5062_v18  ;;  %v4918_v29 = vld [vmem:[%s10369_s2 + $0x460] sm:$0xf]  ;;  %v6605_v32 = vld [vmem:[%s10369_s2 + $0x56c] sm:$0xf0]  ;;  %v4504_v3 = vld [vmem:[%s10369_s2 + $0x130] sm:$0xf0] }
  0x2c   :  { %v5046_v31 = vld [vmem:[%s10369_s2 + $0x560] sm:$0xf]  ;;  %v4919_v37 = vor.u32 %v6573_v30, %v4918_v29  ;;  %v6569_v43 = vld [vmem:[%s10369_s2 + $0x44c] sm:$0xf0]  ;;  %v6431_v12 = vld [vmem:[%s10369_s2 + $0x4] sm:$0xf]  ;;  %v4507_v19 = vor.u32 %v6467_v0, %v4504_v3 }
  0x2d   :  { %1312 = vmatpush.bf16.msrb.mxu0 %v4951_v11  ;;  %1325 = vmatpush.bf16.msrb.mxu1 %v5079_v14  ;;  %v5047_v40 = vor.u32 %v6605_v32, %v5046_v31  ;;  %v4902_v42 = vld [vmem:[%s10369_s2 + $0x440] sm:$0xf]  ;;  %v6601_v45 = vld [vmem:[%s10369_s2 + $0x54c] sm:$0xf0]  ;;  %v4360_v13 = vld [vmem:[%s10369_s2 + $0x10] sm:$0xf0] }
  0x2e   :  { %v5030_v44 = vld [vmem:[%s10369_s2 + $0x540] sm:$0xf]  ;;  %v4903_v50 = vor.u32 %v6569_v43, %v4902_v42  ;;  %v6565_v58 = vld [vmem:[%s10369_s2 + $0x42c] sm:$0xf0]  ;;  %v6523_v14 = vld [vmem:[%s10369_s2 + $0x2e4] sm:$0xf]  ;;  %v4363_v25 = vor.u32 %v6431_v12, %v4360_v13 }
  0x2f   :  { %1363 = vmatpush.bf16.msra.mxu2 %v4587_v10  ;;  %1351 = vmatpush.bf16.msrb.mxu3 %v4443_v15  ;;  %v5031_v54 = vor.u32 %v6601_v45, %v5030_v44  ;;  %v4886_v56 = vld [vmem:[%s10369_s2 + $0x420] sm:$0xf]  ;;  %v6597_v61 = vld [vmem:[%s10369_s2 + $0x52c] sm:$0xf0]  ;;  %v4728_v15 = vld [vmem:[%s10369_s2 + $0x2f0] sm:$0xf0] }
  0x30   :  { %v5014_v59 = vld [vmem:[%s10369_s2 + $0x520] sm:$0xf]  ;;  %v4887_v2 = vor.u32 %v6565_v58, %v4886_v56  ;;  %v42_v5 = vld [vmem:[%s10367_s0 + $0x10] sm:$0xff]  ;;  %v6555_v16 = vld [vmem:[%s10369_s2 + $0x3e4] sm:$0xf] }
  0x31   :  { %1313 = vmatpush.bf16.msrb.mxu0 %v4935_v24  ;;  %1326 = vmatpush.bf16.msrb.mxu1 %v5063_v27  ;;  %v4870_v4 = vld [vmem:[%s10369_s2 + $0x400] sm:$0xf]  ;;  %v5015_v6 = vor.u32 %v6597_v61, %v5014_v59  ;;  %v6561_v8 = vld [vmem:[%s10369_s2 + $0x40c] sm:$0xf0]  ;;  %v4856_v17 = vld [vmem:[%s10369_s2 + $0x3f0] sm:$0xf0]  ;;  %v258_v18 = vunpack.c.l.b16 %v42_v5 }
  0x32   :  { %v4998_v10 = vld [vmem:[%s10369_s2 + $0x500] sm:$0xf]  ;;  %v6593_v11 = vld [vmem:[%s10369_s2 + $0x50c] sm:$0xf0]  ;;  %v4871_v20 = vor.u32 %v6561_v8, %v4870_v4  ;;  %v6587_v21 = vld [vmem:[%s10369_s2 + $0x4e4] sm:$0xf]  ;;  %v4859_v29 = vor.u32 %v6555_v16, %v4856_v17 }
  0x33   :  { %1364 = vmatpush.bf16.msra.mxu2 %v4571_v23  ;;  %1352 = vmatpush.bf16.msrb.mxu3 %v4427_v28  ;;  %v4984_v22 = vld [vmem:[%s10369_s2 + $0x4f0] sm:$0xf0]  ;;  %v259_v23 = vunpack.c.h.b16 %v42_v5  ;;  %v4999_v24 = vor.u32 %v6593_v11, %v4998_v10  ;;  %v6463_v26 = vld [vmem:[%s10369_s2 + $0x104] sm:$0xf]  ;;  %v4731_v28 = vor.u32 %v6523_v14, %v4728_v15  ;;  %v7538_v34 = vpack.c.b16 %v258_v18, %v258_v18 }
  0x34   :  { %v4488_v27 = vld [vmem:[%s10369_s2 + $0x110] sm:$0xf0]  ;;  %v6619_v30 = vld [vmem:[%s10369_s2 + $0x5e4] sm:$0xf]  ;;  %v4987_v33 = vor.u32 %v6587_v21, %v4984_v22 }
  0x35   :  { %1314 = vmatpush.bf16.msrb.mxu0 %v4919_v37  ;;  %1327 = vmatpush.bf16.msrb.mxu1 %v5047_v40  ;;  %v5112_v31 = vld [vmem:[%s10369_s2 + $0x5f0] sm:$0xf0]  ;;  %v6519_v32 = vld [vmem:[%s10369_s2 + $0x2c4] sm:$0xf]  ;;  %v4491_v38 = vor.u32 %v6463_v26, %v4488_v27  ;;  %v7549_v39 = vpack.c.b16 %v259_v23, %v259_v23 }
  0x36   :  { %5140 = vmatmul.msk.bf16.vlgmr.msrb.gmra.mxu2 %vm1254_vm0, %v7450_v48  ;;  %v4712_v35 = vld [vmem:[%s10369_s2 + $0x2d0] sm:$0xf0]  ;;  %v6583_v40 = vld [vmem:[%s10369_s2 + $0x4c4] sm:$0xf]  ;;  %v5115_v42 = vor.u32 %v6619_v30, %v5112_v31 }
  0x37   :  { %1365 = vmatpush.bf16.msra.mxu2 %v4555_v36  ;;  %1353 = vmatpush.bf16.msrb.mxu3 %v4411_v41  ;;  %v6551_v36 = vld [vmem:[%s10369_s2 + $0x3c4] sm:$0xf]  ;;  %v4840_v37 = vld [vmem:[%s10369_s2 + $0x3d0] sm:$0xf0]  ;;  %v4715_v43 = vor.u32 %v6519_v32, %v4712_v35 }
  0x38   :  { %v4968_v41 = vld [vmem:[%s10369_s2 + $0x4d0] sm:$0xf0]  ;;  %v4843_v44 = vor.u32 %v6551_v36, %v4840_v37  ;;  %v6615_v45 = vld [vmem:[%s10369_s2 + $0x5c4] sm:$0xf] }
  0x39   :  { %1315 = vmatpush.bf16.msrb.mxu0 %v4903_v50  ;;  %1328 = vmatpush.bf16.msrb.mxu1 %v5031_v54  ;;  %v5096_v46 = vld [vmem:[%s10369_s2 + $0x5d0] sm:$0xf0]  ;;  %v6515_v47 = vld [vmem:[%s10369_s2 + $0x2a4] sm:$0xf] }
  0x3a   :  { %v4696_v50 = vld [vmem:[%s10369_s2 + $0x2b0] sm:$0xf0]  ;;  %v6547_v51 = vld [vmem:[%s10369_s2 + $0x3a4] sm:$0xf]  ;;  %v5099_v56 = vor.u32 %v6615_v45, %v5096_v46 }
  0x3b   :  { %1366 = vmatpush.bf16.msra.mxu2 %v4539_v49  ;;  %1354 = vmatpush.bf16.msrb.mxu3 %v4395_v55  ;;  %v4971_v49 = vor.u32 %v6583_v40, %v4968_v41  ;;  %v4824_v52 = vld [vmem:[%s10369_s2 + $0x3b0] sm:$0xf0]  ;;  %v6579_v54 = vld [vmem:[%s10369_s2 + $0x4a4] sm:$0xf]  ;;  %v4699_v58 = vor.u32 %v6515_v47, %v4696_v50 }
  0x3c   :  { %v4952_v55 = vld [vmem:[%s10369_s2 + $0x4b0] sm:$0xf0]  ;;  %v4827_v59 = vor.u32 %v6547_v51, %v4824_v52  ;;  %v6611_v61 = vld [vmem:[%s10369_s2 + $0x5a4] sm:$0xf] }
  0x3d   :  { %1316 = vmatpush.bf16.msrb.mxu0 %v4887_v2  ;;  %1329 = vmatpush.bf16.msrb.mxu1 %v5015_v6  ;;  %v5080_v62 = vld [vmem:[%s10369_s2 + $0x5b0] sm:$0xf0]  ;;  %v6511_v63 = vld [vmem:[%s10369_s2 + $0x284] sm:$0xf]  ;;  %v4955_v0 = vor.u32 %v6579_v54, %v4952_v55 }
  0x3e   :  { %v6543_v2 = vld [vmem:[%s10369_s2 + $0x384] sm:$0xf]  ;;  %v4808_v3 = vld [vmem:[%s10369_s2 + $0x390] sm:$0xf0]  ;;  %v5083_v6 = vor.u32 %v6611_v61, %v5080_v62 }
  0x3f   :  { %1367 = vmatpush.bf16.msra.mxu2 %v4523_v1  ;;  %1355 = vmatpush.bf16.msrb.mxu3 %v4379_v7  ;;  %v4680_v1 = vld [vmem:[%s10369_s2 + $0x290] sm:$0xf0]  ;;  %v6575_v4 = vld [vmem:[%s10369_s2 + $0x484] sm:$0xf]  ;;  %v4811_v8 = vor.u32 %v6543_v2, %v4808_v3 }
  0x40   :  { %v4936_v5 = vld [vmem:[%s10369_s2 + $0x490] sm:$0xf0]  ;;  %v4683_v7 = vor.u32 %v6511_v63, %v4680_v1  ;;  %v6607_v10 = vld [vmem:[%s10369_s2 + $0x584] sm:$0xf] }
  0x41   :  { %1317 = vmatpush.bf16.msrb.mxu0 %v4871_v20  ;;  %1330 = vmatpush.bf16.msrb.mxu1 %v4999_v24  ;;  %v5064_v11 = vld [vmem:[%s10369_s2 + $0x590] sm:$0xf0]  ;;  %v6507_v12 = vld [vmem:[%s10369_s2 + $0x264] sm:$0xf]  ;;  %v4939_v13 = vor.u32 %v6575_v4, %v4936_v5 }
  0x42   :  { %v4664_v14 = vld [vmem:[%s10369_s2 + $0x270] sm:$0xf0]  ;;  %v6539_v15 = vld [vmem:[%s10369_s2 + $0x364] sm:$0xf] }
  0x43   :  { %1368 = vmatpush.bf16.msra.mxu2 %v4507_v19  ;;  %1356 = vmatpush.bf16.msrb.mxu3 %v4363_v25  ;;  %v4792_v16 = vld [vmem:[%s10369_s2 + $0x370] sm:$0xf0]  ;;  %v6571_v17 = vld [vmem:[%s10369_s2 + $0x464] sm:$0xf]  ;;  %v5067_v19 = vor.u32 %v6607_v10, %v5064_v11  ;;  %v4667_v20 = vor.u32 %v6507_v12, %v4664_v14 }
  0x44   :  { %1318 = vmatmul.bf16.vlgmr.msrb.gmra.mxu0 %v7538_v34  ;;  %1331 = vmatmul.bf16.vlgmr.msrb.gmra.mxu1 %v7549_v39  ;;  %v4920_v18 = vld [vmem:[%s10369_s2 + $0x470] sm:$0xf0]  ;;  %v4795_v21 = vor.u32 %v6539_v15, %v4792_v16  ;;  %v6603_v22 = vld [vmem:[%s10369_s2 + $0x564] sm:$0xf] }
  0x45   :  { %1375 = vmatpush.bf16.msra.mxu0 %v4731_v28  ;;  %1388 = vmatpush.bf16.msra.mxu1 %v4859_v29  ;;  %v5048_v23 = vld [vmem:[%s10369_s2 + $0x570] sm:$0xf0]  ;;  %v6503_v24 = vld [vmem:[%s10369_s2 + $0x244] sm:$0xf]  ;;  %v4923_v25 = vor.u32 %v6571_v17, %v4920_v18 }
  0x46   :  { %1357 = vmatmul.bf16.vlgmr.msrb.gmra.mxu3 %v7341_v57  ;;  %v4648_v26 = vld [vmem:[%s10369_s2 + $0x250] sm:$0xf0]  ;;  %v6535_v27 = vld [vmem:[%s10369_s2 + $0x344] sm:$0xf]  ;;  %v5051_v31 = vor.u32 %v6603_v22, %v5048_v23 }
  0x47   :  { %1401 = vmatpush.bf16.msra.mxu3 %v4987_v33  ;;  %1369 = vmatpush.bf16.msra.mxu2 %v4491_v38  ;;  %v4776_v28 = vld [vmem:[%s10369_s2 + $0x350] sm:$0xf0]  ;;  %v6567_v29 = vld [vmem:[%s10369_s2 + $0x444] sm:$0xf]  ;;  %v4651_v33 = vor.u32 %v6503_v24, %v4648_v26 }
  0x48   :  { %v4904_v30 = vld [vmem:[%s10369_s2 + $0x450] sm:$0xf0]  ;;  %v6599_v32 = vld [vmem:[%s10369_s2 + $0x544] sm:$0xf]  ;;  %v4779_v35 = vor.u32 %v6535_v27, %v4776_v28 }
  0x49   :  { %1376 = vmatpush.bf16.msra.mxu0 %v4715_v43  ;;  %1389 = vmatpush.bf16.msra.mxu1 %v4843_v44  ;;  %v5032_v36 = vld [vmem:[%s10369_s2 + $0x550] sm:$0xf0]  ;;  %v6499_v37 = vld [vmem:[%s10369_s2 + $0x224] sm:$0xf]  ;;  %v4907_v40 = vor.u32 %v6567_v29, %v4904_v30 }
  0x4a   :  { %1370 = vmatmul.bf16.vlgmr.msra.gmra.mxu2 %v7371_v9  ;;  %v4632_v38 = vld [vmem:[%s10369_s2 + $0x230] sm:$0xf0]  ;;  %v6531_v41 = vld [vmem:[%s10369_s2 + $0x324] sm:$0xf] }
  0x4b   :  { %1414 = vmatpush.bf16.msrb.mxu2 %v5115_v42  ;;  %1402 = vmatpush.bf16.msra.mxu3 %v4971_v49  ;;  %v4760_v42 = vld [vmem:[%s10369_s2 + $0x330] sm:$0xf0] }
  0x4d   :  { %1377 = vmatpush.bf16.msra.mxu0 %v4699_v58  ;;  %1390 = vmatpush.bf16.msra.mxu1 %v4827_v59 }
  0x4f   :  { %1415 = vmatpush.bf16.msrb.mxu2 %v5099_v56  ;;  %1403 = vmatpush.bf16.msra.mxu3 %v4955_v0 }
  0x51   :  { %1378 = vmatpush.bf16.msra.mxu0 %v4683_v7  ;;  %1391 = vmatpush.bf16.msra.mxu1 %v4811_v8 }
  0x53   :  { %1416 = vmatpush.bf16.msrb.mxu2 %v5083_v6  ;;  %1404 = vmatpush.bf16.msra.mxu3 %v4939_v13 }
  0x55   :  { %1379 = vmatpush.bf16.msra.mxu0 %v4667_v20  ;;  %1392 = vmatpush.bf16.msra.mxu1 %v4795_v21 }
  0x57   :  { %1417 = vmatpush.bf16.msrb.mxu2 %v5067_v19  ;;  %1405 = vmatpush.bf16.msra.mxu3 %v4923_v25 }
  0x58   :  { %18 = vsyncpa [#allocation5], 0  ;;  %v6563_v43 = vld [vmem:[%s10369_s2 + $0x424] sm:$0xf]  ;;  %v4888_v44 = vld [vmem:[%s10369_s2 + $0x430] sm:$0xf0]  ;;  %v5035_v45 = vor.u32 %v6599_v32, %v5032_v36  ;;  %v4635_v49 = vor.u32 %v6499_v37, %v4632_v38  ;;  %v4763_v50 = vor.u32 %v6531_v41, %v4760_v42 }
  0x59   :  { %v6595_v46 = vld [vmem:[%s10369_s2 + $0x524] sm:$0xf]  ;;  %v5016_v47 = vld [vmem:[%s10369_s2 + $0x530] sm:$0xf0]  ;;  %1380 = vmatpush.bf16.msra.mxu0 %v4651_v33  ;;  %1393 = vmatpush.bf16.msra.mxu1 %v4779_v35  ;;  %v4891_v55 = vor.u32 %v6563_v43, %v4888_v44  ;;  %v4478_v61 = vld [vmem:[%s10369_s2 + $0xe8] sm:$0xf] }
  0x5a   :  { %v6495_v51 = vld [vmem:[%s10369_s2 + $0x204] sm:$0xf]  ;;  %v4616_v52 = vld [vmem:[%s10369_s2 + $0x210] sm:$0xf0]  ;;  %v6462_v62 = vld [vmem:[%s10369_s2 + $0xf4] sm:$0xf0]  ;;  %v5019_v0 = vor.u32 %v6595_v46, %v5016_v47 }
  0x5b   :  { %1418 = vmatpush.bf16.msrb.mxu2 %v5051_v31  ;;  %v6527_v54 = vld [vmem:[%s10369_s2 + $0x304] sm:$0xf]  ;;  %1406 = vmatpush.bf16.msra.mxu3 %v4907_v40  ;;  %v4744_v56 = vld [vmem:[%s10369_s2 + $0x310] sm:$0xf0]  ;;  %v4734_v2 = vld [vmem:[%s10369_s2 + $0x2e8] sm:$0xf]  ;;  %v4619_v4 = vor.u32 %v6495_v51, %v4616_v52  ;;  %v4479_v10 = vor.u32 %v6462_v62, %v4478_v61 }
  0x5c   :  { %v6559_v58 = vld [vmem:[%s10369_s2 + $0x404] sm:$0xf]  ;;  %v4872_v59 = vld [vmem:[%s10369_s2 + $0x410] sm:$0xf0]  ;;  %v6526_v3 = vld [vmem:[%s10369_s2 + $0x2f4] sm:$0xf0]  ;;  %v4747_v5 = vor.u32 %v6527_v54, %v4744_v56 }
  0x5d   :  { %v6623_v63 = vld [vmem:[%s10369_s2 + $0x604] sm:$0xf]  ;;  %v5128_v1 = vld [vmem:[%s10369_s2 + $0x610] sm:$0xf0]  ;;  %1381 = vmatpush.bf16.msra.mxu0 %v4635_v49  ;;  %1394 = vmatpush.bf16.msra.mxu1 %v4763_v50  ;;  %v4875_v8 = vor.u32 %v6559_v58, %v4872_v59  ;;  %v4862_v11 = vld [vmem:[%s10369_s2 + $0x3e8] sm:$0xf]  ;;  %v4735_v16 = vor.u32 %v6526_v3, %v4734_v2 }
  0x5e   :  { %v6591_v6 = vld [vmem:[%s10369_s2 + $0x504] sm:$0xf]  ;;  %v5000_v7 = vld [vmem:[%s10369_s2 + $0x510] sm:$0xf0]  ;;  %v6558_v12 = vld [vmem:[%s10369_s2 + $0x3f4] sm:$0xf0]  ;;  %v5131_v13 = vor.u32 %v6623_v63, %v5128_v1 }
  0x5f   :  { %1419 = vmatpush.bf16.msrb.mxu2 %v5035_v45  ;;  %1407 = vmatpush.bf16.msra.mxu3 %v4891_v55  ;;  %v4606_v14 = vld [vmem:[%s10369_s2 + $0x1e8] sm:$0xf]  ;;  %v6494_v15 = vld [vmem:[%s10369_s2 + $0x1f4] sm:$0xf0]  ;;  %v5003_v17 = vor.u32 %v6591_v6, %v5000_v7  ;;  %v4863_v20 = vor.u32 %v6558_v12, %v4862_v11  ;;  %s4342_s21 = sshll.u32 %s10378_s11, 4  ;;  %s7032_s11 = smov [#allocation2]   ;;  %s4343_s21 = int_to_ptr.hbm [resolvable:$true] %s4342_s21 }
  0x60   :  { %v4462_v18 = vld [vmem:[%s10369_s2 + $0xc8] sm:$0xf]  ;;  %v6458_v19 = vld [vmem:[%s10369_s2 + $0xd4] sm:$0xf0]  ;;  %v4607_v23 = vor.u32 %v6494_v15, %v4606_v14  ;;  %s4329_s22 = sshll.u32 %s7032_s11, 4  ;;  %s4331_s24 = sshll.u32 %s10377_s10, 4  ;;  %s4330_s22 = int_to_ptr.vmem [resolvable:$true] %s4329_s22  ;;  %s4332_s24 = int_to_ptr.hbm [resolvable:$true] %s4331_s24 }
  0x61   :  { %1382 = vmatpush.bf16.msra.mxu0 %v4619_v4  ;;  %1395 = vmatpush.bf16.msra.mxu1 %v4747_v5  ;;  %v4718_v21 = vld [vmem:[%s10369_s2 + $0x2c8] sm:$0xf]  ;;  %v6522_v22 = vld [vmem:[%s10369_s2 + $0x2d4] sm:$0xf0]  ;;  %v4463_v26 = vor.u32 %v6458_v19, %v4462_v18 }
  0x62   :  { %v4846_v24 = vld [vmem:[%s10369_s2 + $0x3c8] sm:$0xf]  ;;  %v6554_v25 = vld [vmem:[%s10369_s2 + $0x3d4] sm:$0xf0]  ;;  %v4719_v29 = vor.u32 %v6522_v22, %v4718_v21 }
  0x63   :  { %1420 = vmatpush.bf16.msrb.mxu2 %v5019_v0  ;;  %1408 = vmatpush.bf16.msra.mxu3 %v4875_v8  ;;  %v4590_v27 = vld [vmem:[%s10369_s2 + $0x1c8] sm:$0xf]  ;;  %v6490_v28 = vld [vmem:[%s10369_s2 + $0x1d4] sm:$0xf0]  ;;  %v4847_v32 = vor.u32 %v6554_v25, %v4846_v24 }
  0x64   :  { %1383 = vmatmul.bf16.vlgmr.msra.gmra.mxu0 %v7330_v53  ;;  %v4446_v30 = vld [vmem:[%s10369_s2 + $0xa8] sm:$0xf]  ;;  %v6454_v31 = vld [vmem:[%s10369_s2 + $0xb4] sm:$0xf0]  ;;  %1396 = vmatmul.bf16.vlgmr.msra.gmra.mxu1 %v7343_v60  ;;  %v4591_v36 = vor.u32 %v6490_v28, %v4590_v27 }
  0x65   :  { %1440 = vmatpush.bf16.msrb.mxu1 %v4479_v10  ;;  %1466 = vmatpush.bf16.msrb.mxu0 %v4735_v16  ;;  %v4702_v33 = vld [vmem:[%s10369_s2 + $0x2a8] sm:$0xf]  ;;  %v6518_v35 = vld [vmem:[%s10369_s2 + $0x2b4] sm:$0xf0]  ;;  %v4447_v40 = vor.u32 %v6454_v31, %v4446_v30 }
  0x66   :  { %1409 = vmatmul.bf16.vlgmr.msra.gmra.mxu3 %v7538_v34  ;;  %v4830_v37 = vld [vmem:[%s10369_s2 + $0x3a8] sm:$0xf]  ;;  %v6550_v38 = vld [vmem:[%s10369_s2 + $0x3b4] sm:$0xf0]  ;;  %v4703_v43 = vor.u32 %v6518_v35, %v4702_v33 }
  0x67   :  { %1434 = vmatpush.bf16.msrb.mxu3 %v5131_v13  ;;  %1421 = vmatpush.bf16.msrb.mxu2 %v5003_v17  ;;  %v4574_v41 = vld [vmem:[%s10369_s2 + $0x1a8] sm:$0xf]  ;;  %v6486_v42 = vld [vmem:[%s10369_s2 + $0x1b4] sm:$0xf0]  ;;  %v4831_v46 = vor.u32 %v6550_v38, %v4830_v37 }
  0x68   :  { %v4430_v44 = vld [vmem:[%s10369_s2 + $0x88] sm:$0xf]  ;;  %v6450_v45 = vld [vmem:[%s10369_s2 + $0x94] sm:$0xf0]  ;;  %v4575_v50 = vor.u32 %v6486_v42, %v4574_v41 }
  0x69   :  { %1441 = vmatpush.bf16.msrb.mxu1 %v4463_v26  ;;  %1467 = vmatpush.bf16.msrb.mxu0 %v4719_v29  ;;  %v4686_v47 = vld [vmem:[%s10369_s2 + $0x288] sm:$0xf]  ;;  %v6514_v49 = vld [vmem:[%s10369_s2 + $0x294] sm:$0xf0]  ;;  %v4431_v54 = vor.u32 %v6450_v45, %v4430_v44 }
  0x6a   :  { %1422 = vmatmul.bf16.vlgmr.msrb.gmra.mxu2 %v7549_v39  ;;  %v4814_v51 = vld [vmem:[%s10369_s2 + $0x388] sm:$0xf]  ;;  %v6546_v52 = vld [vmem:[%s10369_s2 + $0x394] sm:$0xf0]  ;;  %v4687_v58 = vor.u32 %v6514_v49, %v4686_v47 }
  0x6b   :  { %1479 = vmatpush.bf16.msra.mxu2 %v4863_v20  ;;  %1453 = vmatpush.bf16.msra.mxu3 %v4607_v23  ;;  %v4558_v55 = vld [vmem:[%s10369_s2 + $0x188] sm:$0xf]  ;;  %v6482_v56 = vld [vmem:[%s10369_s2 + $0x194] sm:$0xf0]  ;;  %v4815_v62 = vor.u32 %v6546_v52, %v4814_v51  ;;  %v6460_v51 = vld [vmem:[%s10369_s2 + $0xec] sm:$0xf] }
  0x6c   :  { %v4414_v59 = vld [vmem:[%s10369_s2 + $0x68] sm:$0xf]  ;;  %v6446_v61 = vld [vmem:[%s10369_s2 + $0x74] sm:$0xf0]  ;;  %v4559_v1 = vor.u32 %v6482_v56, %v4558_v55  ;;  %v4480_v52 = vld [vmem:[%s10369_s2 + $0xf8] sm:$0xf0] }
  0x6d   :  { %1442 = vmatpush.bf16.msrb.mxu1 %v4447_v40  ;;  %1468 = vmatpush.bf16.msrb.mxu0 %v4703_v43  ;;  %v4670_v63 = vld [vmem:[%s10369_s2 + $0x268] sm:$0xf]  ;;  %v6510_v0 = vld [vmem:[%s10369_s2 + $0x274] sm:$0xf0]  ;;  %v4415_v4 = vor.u32 %v6446_v61, %v4414_v59 }
  0x6e   :  { %v4798_v2 = vld [vmem:[%s10369_s2 + $0x368] sm:$0xf]  ;;  %v6542_v3 = vld [vmem:[%s10369_s2 + $0x374] sm:$0xf0]  ;;  %v4671_v7 = vor.u32 %v6510_v0, %v4670_v63  ;;  %v6492_v0 = vld [vmem:[%s10369_s2 + $0x1ec] sm:$0xf] }
  0x6f   :  { %1480 = vmatpush.bf16.msra.mxu2 %v4847_v32  ;;  %1454 = vmatpush.bf16.msra.mxu3 %v4591_v36  ;;  %v4542_v5 = vld [vmem:[%s10369_s2 + $0x168] sm:$0xf]  ;;  %v6478_v6 = vld [vmem:[%s10369_s2 + $0x174] sm:$0xf0]  ;;  %v4799_v11 = vor.u32 %v6542_v3, %v4798_v2  ;;  %v4483_v3 = vor.u32 %v6460_v51, %v4480_v52 }
  0x70   :  { %v4398_v8 = vld [vmem:[%s10369_s2 + $0x48] sm:$0xf]  ;;  %v6442_v10 = vld [vmem:[%s10369_s2 + $0x54] sm:$0xf0]  ;;  %v4543_v14 = vor.u32 %v6478_v6, %v4542_v5  ;;  %v6456_v5 = vld [vmem:[%s10369_s2 + $0xcc] sm:$0xf] }
  0x71   :  { %1443 = vmatpush.bf16.msrb.mxu1 %v4431_v54  ;;  %1469 = vmatpush.bf16.msrb.mxu0 %v4687_v58  ;;  %v4654_v12 = vld [vmem:[%s10369_s2 + $0x248] sm:$0xf]  ;;  %v6506_v13 = vld [vmem:[%s10369_s2 + $0x254] sm:$0xf0]  ;;  %v4399_v17 = vor.u32 %v6442_v10, %v4398_v8  ;;  %v4464_v6 = vld [vmem:[%s10369_s2 + $0xd8] sm:$0xf0] }
  0x72   :  { %v4782_v15 = vld [vmem:[%s10369_s2 + $0x348] sm:$0xf]  ;;  %v6538_v16 = vld [vmem:[%s10369_s2 + $0x354] sm:$0xf0]  ;;  %v4655_v20 = vor.u32 %v6506_v13, %v4654_v12 }
  0x73   :  { %1481 = vmatpush.bf16.msra.mxu2 %v4831_v46  ;;  %1455 = vmatpush.bf16.msra.mxu3 %v4575_v50  ;;  %v4526_v18 = vld [vmem:[%s10369_s2 + $0x148] sm:$0xf]  ;;  %v6474_v19 = vld [vmem:[%s10369_s2 + $0x154] sm:$0xf0]  ;;  %v4783_v23 = vor.u32 %v6538_v16, %v4782_v15  ;;  %v4592_v15 = vld [vmem:[%s10369_s2 + $0x1d8] sm:$0xf0]  ;;  %v4467_v16 = vor.u32 %v6456_v5, %v4464_v6 }
  0x74   :  { %v4382_v21 = vld [vmem:[%s10369_s2 + $0x28] sm:$0xf]  ;;  %v6438_v22 = vld [vmem:[%s10369_s2 + $0x34] sm:$0xf0]  ;;  %v4527_v26 = vor.u32 %v6474_v19, %v4526_v18  ;;  %v6452_v18 = vld [vmem:[%s10369_s2 + $0xac] sm:$0xf] }
  0x75   :  { %1444 = vmatpush.bf16.msrb.mxu1 %v4415_v4  ;;  %1470 = vmatpush.bf16.msrb.mxu0 %v4671_v7  ;;  %v4638_v24 = vld [vmem:[%s10369_s2 + $0x228] sm:$0xf]  ;;  %v6502_v25 = vld [vmem:[%s10369_s2 + $0x234] sm:$0xf0]  ;;  %v4383_v29 = vor.u32 %v6438_v22, %v4382_v21  ;;  %v4448_v19 = vld [vmem:[%s10369_s2 + $0xb8] sm:$0xf0] }
  0x76   :  { %5141 = vmatmul.msk.bf16.vlgmr.msrb.gmra.mxu3 %vm1254_vm0, %v7450_v48  ;;  %v4766_v27 = vld [vmem:[%s10369_s2 + $0x328] sm:$0xf]  ;;  %v6534_v28 = vld [vmem:[%s10369_s2 + $0x334] sm:$0xf0]  ;;  %v4639_v33 = vor.u32 %v6502_v25, %v4638_v24  ;;  %v4528_v5 = vld [vmem:[%s10369_s2 + $0x158] sm:$0xf0] }
  0x77   :  { %1482 = vmatpush.bf16.msra.mxu2 %v4815_v62  ;;  %1456 = vmatpush.bf16.msra.mxu3 %v4559_v1  ;;  %v4510_v30 = vld [vmem:[%s10369_s2 + $0x128] sm:$0xf]  ;;  %v6470_v31 = vld [vmem:[%s10369_s2 + $0x134] sm:$0xf0]  ;;  %v4767_v38 = vor.u32 %v6534_v28, %v4766_v27  ;;  %v4608_v1 = vld [vmem:[%s10369_s2 + $0x1f8] sm:$0xf0]  ;;  %v4451_v28 = vor.u32 %v6452_v18, %v4448_v19 }
  0x78   :  { %v4366_v32 = vld [vmem:[%s10369_s2 + $0x8] sm:$0xf]  ;;  %v6434_v35 = vld [vmem:[%s10369_s2 + $0x14] sm:$0xf0]  ;;  %v4511_v44 = vor.u32 %v6470_v31, %v4510_v30  ;;  %v4611_v8 = vor.u32 %v6492_v0, %v4608_v1  ;;  %v4576_v27 = vld [vmem:[%s10369_s2 + $0x1b8] sm:$0xf0] }
  0x79   :  { %1445 = vmatpush.bf16.msrb.mxu1 %v4399_v17  ;;  %1471 = vmatpush.bf16.msrb.mxu0 %v4655_v20  ;;  %v4990_v36 = vld [vmem:[%s10369_s2 + $0x4e8] sm:$0xf]  ;;  %v6590_v37 = vld [vmem:[%s10369_s2 + $0x4f4] sm:$0xf0]  ;;  %v4367_v49 = vor.u32 %v6434_v35, %v4366_v32  ;;  %v6448_v30 = vld [vmem:[%s10369_s2 + $0x8c] sm:$0xf] }
  0x7a   :  { %v4494_v40 = vld [vmem:[%s10369_s2 + $0x108] sm:$0xf]  ;;  %v6498_v42 = vld [vmem:[%s10369_s2 + $0x214] sm:$0xf0]  ;;  %v4991_v54 = vor.u32 %v6590_v37, %v4990_v36  ;;  %v4432_v31 = vld [vmem:[%s10369_s2 + $0x98] sm:$0xf0] }
  0x7b   :  { %1483 = vmatpush.bf16.msra.mxu2 %v4799_v11  ;;  %1457 = vmatpush.bf16.msra.mxu3 %v4543_v14  ;;  %v4622_v41 = vld [vmem:[%s10369_s2 + $0x208] sm:$0xf]  ;;  %v6530_v45 = vld [vmem:[%s10369_s2 + $0x314] sm:$0xf0]  ;;  %v6488_v14 = vld [vmem:[%s10369_s2 + $0x1cc] sm:$0xf] }
  0x7c   :  { %v4750_v43 = vld [vmem:[%s10369_s2 + $0x308] sm:$0xf]  ;;  %v6626_v47 = vld [vmem:[%s10369_s2 + $0x614] sm:$0xf0]  ;;  %v4623_v55 = vor.u32 %v6498_v42, %v4622_v41  ;;  %v4595_v21 = vor.u32 %v6488_v14, %v4592_v15  ;;  %v4560_v41 = vld [vmem:[%s10369_s2 + $0x198] sm:$0xf0]  ;;  %v4435_v42 = vor.u32 %v6448_v30, %v4432_v31 }
  0x7d   :  { %v5134_v46 = vld [vmem:[%s10369_s2 + $0x608] sm:$0xf]  ;;  %1446 = vmatpush.bf16.msrb.mxu1 %v4383_v29  ;;  %v6466_v50 = vld [vmem:[%s10369_s2 + $0x114] sm:$0xf0]  ;;  %1472 = vmatpush.bf16.msrb.mxu0 %v4639_v33  ;;  %v4751_v61 = vor.u32 %v6530_v45, %v4750_v43  ;;  %v4416_v45 = vld [vmem:[%s10369_s2 + $0x78] sm:$0xf0] }
  0x7e   :  { %v5118_v56 = vld [vmem:[%s10369_s2 + $0x5e8] sm:$0xf]  ;;  %v6622_v58 = vld [vmem:[%s10369_s2 + $0x5f4] sm:$0xf0]  ;;  %v5135_v63 = vor.u32 %v6626_v47, %v5134_v46  ;;  %v4495_v2 = vor.u32 %v6466_v50, %v4494_v40  ;;  %v6480_v40 = vld [vmem:[%s10369_s2 + $0x18c] sm:$0xf] }
  0x7f   :  { %1484 = vmatpush.bf16.msra.mxu2 %v4783_v23  ;;  %1458 = vmatpush.bf16.msra.mxu3 %v4527_v26  ;;  %v4974_v59 = vld [vmem:[%s10369_s2 + $0x4c8] sm:$0xf]  ;;  %v6586_v62 = vld [vmem:[%s10369_s2 + $0x4d4] sm:$0xf0]  ;;  %v5119_v4 = vor.u32 %v6622_v58, %v5118_v56  ;;  %v6484_v26 = vld [vmem:[%s10369_s2 + $0x1ac] sm:$0xf]  ;;  %v4563_v47 = vor.u32 %v6480_v40, %v4560_v41 }
  0x80   :  { %v4975_v7 = vor.u32 %v6586_v62, %v4974_v59  ;;  %v5102_v10 = vld [vmem:[%s10369_s2 + $0x5c8] sm:$0xf]  ;;  %v6618_v11 = vld [vmem:[%s10369_s2 + $0x5d4] sm:$0xf0]  ;;  %v4579_v33 = vor.u32 %v6484_v26, %v4576_v27  ;;  %v6440_v59 = vld [vmem:[%s10369_s2 + $0x4c] sm:$0xf] }
  0x81   :  { %1447 = vmatpush.bf16.msrb.mxu1 %v4367_v49  ;;  %1473 = vmatpush.bf16.msrb.mxu0 %v4623_v55  ;;  %v4958_v12 = vld [vmem:[%s10369_s2 + $0x4a8] sm:$0xf]  ;;  %v6582_v13 = vld [vmem:[%s10369_s2 + $0x4b4] sm:$0xf0]  ;;  %v5103_v17 = vor.u32 %v6618_v11, %v5102_v10  ;;  %v4544_v55 = vld [vmem:[%s10369_s2 + $0x178] sm:$0xf0] }
  0x82   :  { %v4959_v20 = vor.u32 %v6582_v13, %v4958_v12  ;;  %v5086_v22 = vld [vmem:[%s10369_s2 + $0x5a8] sm:$0xf]  ;;  %v6614_v23 = vld [vmem:[%s10369_s2 + $0x5b4] sm:$0xf0]  ;;  %v4384_v10 = vld [vmem:[%s10369_s2 + $0x38] sm:$0xf0] }
  0x83   :  { %1485 = vmatpush.bf16.msra.mxu2 %v4767_v38  ;;  %1459 = vmatpush.bf16.msra.mxu3 %v4511_v44  ;;  %v4942_v24 = vld [vmem:[%s10369_s2 + $0x488] sm:$0xf]  ;;  %v6578_v25 = vld [vmem:[%s10369_s2 + $0x494] sm:$0xf0]  ;;  %v5087_v29 = vor.u32 %v6614_v23, %v5086_v22  ;;  %v6444_v44 = vld [vmem:[%s10369_s2 + $0x6c] sm:$0xf] }
  0x84   :  { %1474 = vmatmul.bf16.vlgmr.msrb.gmra.mxu0 %v7330_v53  ;;  %1448 = vmatmul.bf16.vlgmr.msrb.gmra.mxu1 %v7341_v57  ;;  %v4943_v32 = vor.u32 %v6578_v25, %v4942_v24  ;;  %v5070_v35 = vld [vmem:[%s10369_s2 + $0x588] sm:$0xf]  ;;  %v6610_v36 = vld [vmem:[%s10369_s2 + $0x594] sm:$0xf0]  ;;  %v4419_v56 = vor.u32 %v6444_v44, %v4416_v45  ;;  %v4512_v18 = vld [vmem:[%s10369_s2 + $0x138] sm:$0xf0] }
  0x85   :  { %1492 = vmatpush.bf16.msra.mxu1 %v4991_v54  ;;  %1525 = vmatpush.bf16.msra.mxu0 %v5135_v63  ;;  %v4926_v37 = vld [vmem:[%s10369_s2 + $0x468] sm:$0xf]  ;;  %v6574_v38 = vld [vmem:[%s10369_s2 + $0x474] sm:$0xf0]  ;;  %v5071_v43 = vor.u32 %v6610_v36, %v5070_v35  ;;  %v6476_v54 = vld [vmem:[%s10369_s2 + $0x16c] sm:$0xf] }
  0x86   :  { %v4927_v46 = vor.u32 %v6574_v38, %v4926_v37  ;;  %v5054_v49 = vld [vmem:[%s10369_s2 + $0x568] sm:$0xf]  ;;  %v6606_v50 = vld [vmem:[%s10369_s2 + $0x574] sm:$0xf0]  ;;  %v4547_v63 = vor.u32 %v6476_v54, %v4544_v55  ;;  %v6432_v24 = vld [vmem:[%s10369_s2 + $0xc] sm:$0xf] }
  0x87   :  { %1486 = vmatpush.bf16.msra.mxu2 %v4751_v61  ;;  %1460 = vmatpush.bf16.msra.mxu3 %v4495_v2  ;;  %v4910_v51 = vld [vmem:[%s10369_s2 + $0x448] sm:$0xf]  ;;  %v6570_v52 = vld [vmem:[%s10369_s2 + $0x454] sm:$0xf0]  ;;  %v5055_v58 = vor.u32 %v6606_v50, %v5054_v49  ;;  %v4400_v61 = vld [vmem:[%s10369_s2 + $0x58] sm:$0xf0] }
  0x88   :  { %v4911_v62 = vor.u32 %v6570_v52, %v4910_v51  ;;  %v5038_v0 = vld [vmem:[%s10369_s2 + $0x548] sm:$0xf]  ;;  %v6602_v1 = vld [vmem:[%s10369_s2 + $0x554] sm:$0xf0]  ;;  %v4403_v6 = vor.u32 %v6440_v59, %v4400_v61  ;;  %v4368_v25 = vld [vmem:[%s10369_s2 + $0x18] sm:$0xf0] }
  0x89   :  { %1493 = vmatpush.bf16.msra.mxu1 %v4975_v7  ;;  %1544 = vmatpush.bf16.msrb.mxu0 %v4611_v8  ;;  %v4894_v2 = vld [vmem:[%s10369_s2 + $0x428] sm:$0xf]  ;;  %v5039_v7 = vor.u32 %v6602_v1, %v5038_v0  ;;  %v6436_v8 = vld [vmem:[%s10369_s2 + $0x2c] sm:$0xf]  ;;  %v6598_v14 = vld [vmem:[%s10369_s2 + $0x534] sm:$0xf0]  ;;  %v4371_v36 = vor.u32 %v6432_v24, %v4368_v25 }
  0x8a   :  { %1461 = vmatmul.bf16.vlgmr.msra.gmra.mxu3 %v7371_v9  ;;  %1487 = vmatmul.bf16.vlgmr.msra.gmra.mxu2 %v7343_v60  ;;  %v5022_v13 = vld [vmem:[%s10369_s2 + $0x528] sm:$0xf]  ;;  %v4387_v19 = vor.u32 %v6436_v8, %v4384_v10  ;;  %v4864_v30 = vld [vmem:[%s10369_s2 + $0x3f8] sm:$0xf0]  ;;  %v6520_v35 = vld [vmem:[%s10369_s2 + $0x2cc] sm:$0xf] }
  0x8b   :  { %1531 = vmatpush.bf16.msrb.mxu2 %v4483_v3  ;;  %1505 = vmatpush.bf16.msrb.mxu3 %v5119_v4  ;;  %v6566_v3 = vld [vmem:[%s10369_s2 + $0x434] sm:$0xf0]  ;;  %v6472_v4 = vld [vmem:[%s10369_s2 + $0x14c] sm:$0xf]  ;;  %v4878_v15 = vld [vmem:[%s10369_s2 + $0x408] sm:$0xf]  ;;  %v5023_v22 = vor.u32 %v6598_v14, %v5022_v13 }
  0x8c   :  { %v4895_v11 = vor.u32 %v6566_v3, %v4894_v2  ;;  %v4531_v12 = vor.u32 %v6472_v4, %v4528_v5  ;;  %v5006_v23 = vld [vmem:[%s10369_s2 + $0x508] sm:$0xf]  ;;  %v4720_v37 = vld [vmem:[%s10369_s2 + $0x2d8] sm:$0xf0]  ;;  %v6464_v38 = vld [vmem:[%s10369_s2 + $0x10c] sm:$0xf] }
  0x8d   :  { %1494 = vmatpush.bf16.msra.mxu1 %v4959_v20  ;;  %1545 = vmatpush.bf16.msrb.mxu0 %v4595_v21  ;;  %v6524_v20 = vld [vmem:[%s10369_s2 + $0x2ec] sm:$0xf]  ;;  %v4736_v21 = vld [vmem:[%s10369_s2 + $0x2f8] sm:$0xf0] }
  0x8e   :  { %v4739_v31 = vor.u32 %v6524_v20, %v4736_v21  ;;  %v4496_v40 = vld [vmem:[%s10369_s2 + $0x118] sm:$0xf0]  ;;  %v6584_v51 = vld [vmem:[%s10369_s2 + $0x4cc] sm:$0xf] }
  0x8f   :  { %1532 = vmatpush.bf16.msrb.mxu2 %v4467_v16  ;;  %1506 = vmatpush.bf16.msrb.mxu3 %v5103_v17  ;;  %v6562_v16 = vld [vmem:[%s10369_s2 + $0x414] sm:$0xf0]  ;;  %v6468_v17 = vld [vmem:[%s10369_s2 + $0x12c] sm:$0xf]  ;;  %v4499_v49 = vor.u32 %v6464_v38, %v4496_v40  ;;  %v4848_v50 = vld [vmem:[%s10369_s2 + $0x3d8] sm:$0xf0] }
  0x90   :  { %v4879_v26 = vor.u32 %v6562_v16, %v4878_v15  ;;  %v4515_v27 = vor.u32 %v6468_v17, %v4512_v18  ;;  %v4976_v52 = vld [vmem:[%s10369_s2 + $0x4d8] sm:$0xf0]  ;;  %v6516_v55 = vld [vmem:[%s10369_s2 + $0x2ac] sm:$0xf] }
  0x91   :  { %1495 = vmatpush.bf16.msra.mxu1 %v4943_v32  ;;  %1546 = vmatpush.bf16.msrb.mxu0 %v4579_v33  ;;  %v6588_v32 = vld [vmem:[%s10369_s2 + $0x4ec] sm:$0xf]  ;;  %v4992_v33 = vld [vmem:[%s10369_s2 + $0x4f8] sm:$0xf0] }
  0x92   :  { %v4995_v45 = vor.u32 %v6588_v32, %v4992_v33  ;;  %v5104_v59 = vld [vmem:[%s10369_s2 + $0x5d8] sm:$0xf0]  ;;  %v6580_v2 = vld [vmem:[%s10369_s2 + $0x4ac] sm:$0xf] }
  0x93   :  { %1533 = vmatpush.bf16.msrb.mxu2 %v4451_v28  ;;  %1507 = vmatpush.bf16.msrb.mxu3 %v5087_v29  ;;  %v6594_v28 = vld [vmem:[%s10369_s2 + $0x514] sm:$0xf0]  ;;  %v6556_v29 = vld [vmem:[%s10369_s2 + $0x3ec] sm:$0xf]  ;;  %v4832_v1 = vld [vmem:[%s10369_s2 + $0x3b8] sm:$0xf0] }
  0x94   :  { %5142 = vmatmul.msk.bf16.vlgmr.msra.gmra.mxu0 %vm1254_vm0, %v7450_v48  ;;  %v5007_v41 = vor.u32 %v6594_v28, %v5006_v23  ;;  %v4867_v44 = vor.u32 %v6556_v29, %v4864_v30  ;;  %v4960_v3 = vld [vmem:[%s10369_s2 + $0x4b8] sm:$0xf0]  ;;  %v6512_v5 = vld [vmem:[%s10369_s2 + $0x28c] sm:$0xf] }
  0x95   :  { %1496 = vmatpush.bf16.msra.mxu1 %v4927_v46  ;;  %1547 = vmatpush.bf16.msrb.mxu0 %v4563_v47  ;;  %v6552_v46 = vld [vmem:[%s10369_s2 + $0x3cc] sm:$0xf]  ;;  %v4723_v47 = vor.u32 %v6520_v35, %v4720_v37  ;;  %v5088_v8 = vld [vmem:[%s10369_s2 + $0x5b8] sm:$0xf0] }
  0x96   :  { %v4851_v61 = vor.u32 %v6552_v46, %v4848_v50  ;;  %v6576_v14 = vld [vmem:[%s10369_s2 + $0x48c] sm:$0xf]  ;;  %v4944_v15 = vld [vmem:[%s10369_s2 + $0x498] sm:$0xf0] }
  0x97   :  { %1534 = vmatpush.bf16.msrb.mxu2 %v4435_v42  ;;  %1508 = vmatpush.bf16.msrb.mxu3 %v5071_v43  ;;  %v6620_v42 = vld [vmem:[%s10369_s2 + $0x5ec] sm:$0xf]  ;;  %v5120_v43 = vld [vmem:[%s10369_s2 + $0x5f8] sm:$0xf0] }
  0x98   :  { %v5123_v54 = vor.u32 %v6620_v42, %v5120_v43  ;;  %v6508_v17 = vld [vmem:[%s10369_s2 + $0x26c] sm:$0xf]  ;;  %v4672_v18 = vld [vmem:[%s10369_s2 + $0x278] sm:$0xf0] }
  0x99   :  { %1497 = vmatpush.bf16.msra.mxu1 %v4911_v62  ;;  %1548 = vmatpush.bf16.msrb.mxu0 %v4547_v63  ;;  %v4979_v62 = vor.u32 %v6584_v51, %v4976_v52  ;;  %v6548_v63 = vld [vmem:[%s10369_s2 + $0x3ac] sm:$0xf]  ;;  %v4675_v24 = vor.u32 %v6508_v17, %v4672_v18  ;;  %v4800_v25 = vld [vmem:[%s10369_s2 + $0x378] sm:$0xf0]  ;;  %v5202_v17 = vld [vmem:[%s10371_s4 + $0x70] sm:$0xf] }
  0x9a   :  { %v4835_v10 = vor.u32 %v6548_v63, %v4832_v1  ;;  %v6608_v20 = vld [vmem:[%s10369_s2 + $0x58c] sm:$0xf]  ;;  %v5056_v33 = vld [vmem:[%s10369_s2 + $0x578] sm:$0xf0]  ;;  %v6642_v18 = vld [vmem:[%s10371_s4 + $0x74] sm:$0xf0] }
  0x9b   :  { %1535 = vmatpush.bf16.msrb.mxu2 %v4419_v56  ;;  %1509 = vmatpush.bf16.msrb.mxu3 %v5055_v58  ;;  %v4704_v56 = vld [vmem:[%s10369_s2 + $0x2b8] sm:$0xf0]  ;;  %v6616_v58 = vld [vmem:[%s10369_s2 + $0x5cc] sm:$0xf] }
  0x9c   :  { %v4707_v0 = vor.u32 %v6516_v55, %v4704_v56  ;;  %v5107_v4 = vor.u32 %v6616_v58, %v5104_v59  ;;  %v6540_v23 = vld [vmem:[%s10369_s2 + $0x36c] sm:$0xf]  ;;  %v4784_v42 = vld [vmem:[%s10369_s2 + $0x358] sm:$0xf0] }
  0x9d   :  { %1498 = vmatpush.bf16.msra.mxu1 %v4895_v11  ;;  %1549 = vmatpush.bf16.msrb.mxu0 %v4531_v12  ;;  %v4963_v11 = vor.u32 %v6580_v2, %v4960_v3  ;;  %v6544_v12 = vld [vmem:[%s10369_s2 + $0x38c] sm:$0xf]  ;;  %v5040_v51 = vld [vmem:[%s10369_s2 + $0x558] sm:$0xf0] }
  0x9e   :  { %v6504_v30 = vld [vmem:[%s10369_s2 + $0x24c] sm:$0xf]  ;;  %v4768_v58 = vld [vmem:[%s10369_s2 + $0x338] sm:$0xf0] }
  0x9f   :  { %1536 = vmatpush.bf16.msrb.mxu2 %v4403_v6  ;;  %1510 = vmatpush.bf16.msrb.mxu3 %v5039_v7  ;;  %v4688_v6 = vld [vmem:[%s10369_s2 + $0x298] sm:$0xf0]  ;;  %v6612_v7 = vld [vmem:[%s10369_s2 + $0x5ac] sm:$0xf] }
  0xa0   :  { %v4691_v13 = vor.u32 %v6512_v5, %v4688_v6  ;;  %v5091_v16 = vor.u32 %v6612_v7, %v5088_v8  ;;  %v6604_v32 = vld [vmem:[%s10369_s2 + $0x56c] sm:$0xf]  ;;  %v5024_v3 = vld [vmem:[%s10369_s2 + $0x538] sm:$0xf0]  ;;  %v8314_v6 = vld [vmem:[%s10370_s3] sm:$0xf] }
  0xa1   :  { %1499 = vmatpush.bf16.msra.mxu1 %v4879_v26  ;;  %1550 = vmatpush.bf16.msrb.mxu0 %v4515_v27  ;;  %v6572_v26 = vld [vmem:[%s10369_s2 + $0x46c] sm:$0xf]  ;;  %v4928_v27 = vld [vmem:[%s10369_s2 + $0x478] sm:$0xf0] }
  0xa2   :  { %v4931_v37 = vor.u32 %v6572_v26, %v4928_v27  ;;  %v6536_v38 = vld [vmem:[%s10369_s2 + $0x34c] sm:$0xf]  ;;  %v5136_v5 = vld [vmem:[%s10369_s2 + $0x618] sm:$0xf0]  ;;  %v5203_v27 = vor.u32 %v6642_v18, %v5202_v17  ;;  %v5146_v17 = vld [vmem:[%s10371_s4] sm:$0xf] }
  0xa3   :  { %1537 = vmatpush.bf16.msrb.mxu2 %v4387_v19  ;;  %1511 = vmatpush.bf16.msrb.mxu3 %v5023_v22  ;;  %v4947_v22 = vor.u32 %v6576_v14, %v4944_v15  ;;  %v6568_v43 = vld [vmem:[%s10369_s2 + $0x44c] sm:$0xf]  ;;  %v4787_v52 = vor.u32 %v6536_v38, %v4784_v42  ;;  %v4880_v14 = vld [vmem:[%s10369_s2 + $0x418] sm:$0xf0]  ;;  %v5186_v42 = vld [vmem:[%s10371_s4 + $0x50] sm:$0xf] }
  0xa4   :  { %1500 = vmatmul.bf16.vlgmr.msra.gmra.mxu1 %v7538_v34  ;;  %v6500_v46 = vld [vmem:[%s10369_s2 + $0x22c] sm:$0xf]  ;;  %v6628_v18 = vld [vmem:[%s10371_s4 + $0x4] sm:$0xf0] }
  0xa5   :  { %1557 = vmatpush.bf16.msrb.mxu1 %v4739_v31  ;;  %1551 = vmatpush.bf16.msrb.mxu0 %v4499_v49  ;;  %v8219_v19 = vpop.f32.mrf.mxu0  ;;  %v8239_v29 = vpop.f32.mrf.mxu1  ;;  %v4656_v31 = vld [vmem:[%s10369_s2 + $0x258] sm:$0xf0]  ;;  %v6600_v50 = vld [vmem:[%s10369_s2 + $0x54c] sm:$0xf] }
  0xa6   :  { %v4659_v40 = vor.u32 %v6504_v30, %v4656_v31  ;;  %v6532_v55 = vld [vmem:[%s10369_s2 + $0x32c] sm:$0xf]  ;;  %v5194_v30 = vld [vmem:[%s10371_s4 + $0x60] sm:$0xf]  ;;  %v6640_v31 = vld [vmem:[%s10371_s4 + $0x64] sm:$0xf0] }
  0xa7   :  { %1538 = vmatpush.bf16.msrb.mxu2 %v4371_v36  ;;  %1512 = vmatpush.bf16.msrb.mxu3 %v5007_v41  ;;  %v4803_v36 = vor.u32 %v6540_v23, %v4800_v25  ;;  %v6564_v59 = vld [vmem:[%s10369_s2 + $0x42c] sm:$0xf]  ;;  %v4771_v8 = vor.u32 %v6532_v55, %v4768_v58  ;;  %v6658_v23 = vld [vmem:[%s10371_s4 + $0xf4] sm:$0xf0]  ;;  %v5170_v55 = vld [vmem:[%s10371_s4 + $0x30] sm:$0xf] }
  0xa8   :  { %1552 = vmatmul.bf16.vlgmr.msrb.gmra.mxu0 %v7371_v9  ;;  %v5072_v9 = vld [vmem:[%s10369_s2 + $0x598] sm:$0xf0]  ;;  %v8253_v35 = vpop.f32.mrf.mxu2  ;;  %v6496_v63 = vld [vmem:[%s10369_s2 + $0x20c] sm:$0xf] }
  0xa9   :  { %1558 = vmatpush.bf16.msrb.mxu1 %v4723_v47  ;;  %1596 = vmatpush.bf16.msra.mxu0 %v5123_v54  ;;  %v5075_v28 = vor.u32 %v6608_v20, %v5072_v9  ;;  %v8258_v41 = vpop.f32.mrf.mxu3  ;;  %v4640_v47 = vld [vmem:[%s10369_s2 + $0x238] sm:$0xf0]  ;;  %v6596_v1 = vld [vmem:[%s10369_s2 + $0x52c] sm:$0xf] }
  0xaa   :  { %1513 = vmatmul.bf16.vlgmr.msrb.gmra.mxu3 %v7549_v39  ;;  %1539 = vmatmul.bf16.vlgmr.msrb.gmra.mxu2 %v7341_v57  ;;  %v4816_v57 = vld [vmem:[%s10369_s2 + $0x398] sm:$0xf0]  ;;  %v4643_v56 = vor.u32 %v6500_v46, %v4640_v47  ;;  %v6592_v20 = vld [vmem:[%s10369_s2 + $0x50c] sm:$0xf]  ;;  %v6636_v47 = vld [vmem:[%s10371_s4 + $0x44] sm:$0xf0] }
  0xab   :  { %1570 = vmatpush.bf16.msra.mxu3 %v4867_v44  ;;  %1583 = vmatpush.bf16.msra.mxu2 %v4995_v45  ;;  %v4819_v21 = vor.u32 %v6544_v12, %v4816_v57  ;;  %v4912_v44 = vld [vmem:[%s10369_s2 + $0x458] sm:$0xf0]  ;;  %v5059_v45 = vor.u32 %v6604_v32, %v5056_v33  ;;  %v6560_v57 = vld [vmem:[%s10369_s2 + $0x40c] sm:$0xf]  ;;  %v5258_v33 = vld [vmem:[%s10371_s4 + $0xe0] sm:$0xf] }
  0xac   :  { %v4915_v54 = vor.u32 %v6568_v43, %v4912_v44  ;;  %v4883_v26 = vor.u32 %v6560_v57, %v4880_v14  ;;  %v6638_v43 = vld [vmem:[%s10371_s4 + $0x54] sm:$0xf0] }
  0xad   :  { %1559 = vmatpush.bf16.msrb.mxu1 %v4707_v0  ;;  %1597 = vmatpush.bf16.msra.mxu0 %v5107_v4  ;;  %v1269_v49 = vpop.f32.mrf.mxu0  ;;  %v4624_v0 = vld [vmem:[%s10369_s2 + $0x218] sm:$0xf0]  ;;  %v1282_v2 = vpop.f32.mrf.mxu1  ;;  %v6624_v4 = vld [vmem:[%s10369_s2 + $0x60c] sm:$0xf]  ;;  %v5187_v46 = vor.u32 %v6638_v43, %v5186_v42  ;;  %v6646_v14 = vld [vmem:[%s10371_s4 + $0x94] sm:$0xf0] }
  0xae   :  { %v4627_v12 = vor.u32 %v6496_v63, %v4624_v0  ;;  %v5139_v9 = vor.u32 %v6624_v4, %v5136_v5  ;;  %v5162_v0 = vld [vmem:[%s10371_s4 + $0x20] sm:$0xf]  ;;  %v6648_v5 = vld [vmem:[%s10371_s4 + $0xa4] sm:$0xf0] }
  0xaf   :  { %1571 = vmatpush.bf16.msra.mxu3 %v4851_v61  ;;  %1584 = vmatpush.bf16.msra.mxu2 %v4979_v62  ;;  %v4896_v61 = vld [vmem:[%s10369_s2 + $0x438] sm:$0xf0]  ;;  %v5043_v62 = vor.u32 %v6600_v50, %v5040_v51 }
  0xb0   :  { %v1295_v7 = vpop.f32.mrf.mxu2 }
  0xb1   :  { %1560 = vmatpush.bf16.msrb.mxu1 %v4691_v13  ;;  %1598 = vmatpush.bf16.msra.mxu0 %v5091_v16  ;;  %v4752_v13 = vld [vmem:[%s10369_s2 + $0x318] sm:$0xf0]  ;;  %v1308_v15 = vpop.f32.mrf.mxu3  ;;  %v5027_v16 = vor.u32 %v6596_v1, %v5024_v3  ;;  %v6632_v1 = vld [vmem:[%s10371_s4 + $0x24] sm:$0xf0] }
  0xb3   :  { %1572 = vmatpush.bf16.msra.mxu3 %v4835_v10  ;;  %1585 = vmatpush.bf16.msra.mxu2 %v4963_v11  ;;  %v4899_v10 = vor.u32 %v6564_v59, %v4896_v61  ;;  %v6528_v11 = vld [vmem:[%s10369_s2 + $0x30c] sm:$0xf]  ;;  %v5234_v59 = vld [vmem:[%s10371_s4 + $0xb0] sm:$0xf] }
  0xb4   :  { %v4755_v25 = vor.u32 %v6528_v11, %v4752_v13  ;;  %v6630_v13 = vld [vmem:[%s10371_s4 + $0x14] sm:$0xf0] }
  0xb5   :  { %1561 = vmatpush.bf16.msrb.mxu1 %v4675_v24  ;;  %1599 = vmatpush.bf16.msra.mxu0 %v5075_v28  ;;  %v242_v24 = vperm.slane %v8314_v6, 0 }
  0xb7   :  { %1573 = vmatpush.bf16.msra.mxu3 %v4819_v21  ;;  %1586 = vmatpush.bf16.msra.mxu2 %v4947_v22  ;;  %v5008_v21 = vld [vmem:[%s10369_s2 + $0x518] sm:$0xf0]  ;;  %v5266_v22 = vld [vmem:[%s10371_s4 + $0xf0] sm:$0xf] }
  0xb8   :  { %v5011_v28 = vor.u32 %v6592_v20, %v5008_v21  ;;  %v5267_v32 = vor.u32 %v6658_v23, %v5266_v22  ;;  %v6641_v20 = vld [vmem:[%s10371_s4 + $0x74] sm:$0xf]  ;;  %v5204_v22 = vld [vmem:[%s10371_s4 + $0x78] sm:$0xf0]  ;;  %v5210_v23 = vld [vmem:[%s10371_s4 + $0x80] sm:$0xf] }
  0xb9   :  { %1562 = vmatpush.bf16.msrb.mxu1 %v4659_v40  ;;  %1600 = vmatpush.bf16.msra.mxu0 %v5059_v45  ;;  %v1345_v38 = vpop.f32.mrf.mxu2  ;;  %v5195_v40 = vor.u32 %v6640_v31, %v5194_v30  ;;  %v5207_v31 = vor.u32 %v6641_v20, %v5204_v22  ;;  %v5156_v20 = vld [vmem:[%s10371_s4 + $0x18] sm:$0xf0]  ;;  %v6645_v22 = vld [vmem:[%s10371_s4 + $0x94] sm:$0xf] }
  0xbb   :  { %1574 = vmatpush.bf16.msra.mxu3 %v4803_v36  ;;  %1587 = vmatpush.bf16.msra.mxu2 %v4931_v37  ;;  %v6656_v36 = vld [vmem:[%s10371_s4 + $0xe4] sm:$0xf0]  ;;  %v1268_v37 = vadd.f32 %v8219_v19, %v242_v24  ;;  %v6654_v19 = vld [vmem:[%s10371_s4 + $0xd4] sm:$0xf0] }
  0xbc   :  { %v5259_v44 = vor.u32 %v6656_v36, %v5258_v33  ;;  %v6644_v24 = vld [vmem:[%s10371_s4 + $0x84] sm:$0xf0]  ;;  %v6639_v33 = vld [vmem:[%s10371_s4 + $0x64] sm:$0xf]  ;;  %v5196_v36 = vld [vmem:[%s10371_s4 + $0x68] sm:$0xf0] }
  0xbd   :  { %1563 = vmatpush.bf16.msrb.mxu1 %v4643_v56  ;;  %1601 = vmatpush.bf16.msra.mxu0 %v5043_v62  ;;  %v1281_v45 = vadd.f32 %v8239_v29, %v1268_v37  ;;  %v5242_v29 = vld [vmem:[%s10371_s4 + $0xc0] sm:$0xf]  ;;  %v6634_v56 = vld [vmem:[%s10371_s4 + $0x34] sm:$0xf0]  ;;  %v5199_v43 = vor.u32 %v6639_v33, %v5196_v36  ;;  %v5298_v33 = vld [vmem:[%s10371_s4 + $0x130] sm:$0xf] }
  0xbe   :  { %v5171_v62 = vor.u32 %v6634_v56, %v5170_v55  ;;  %v5322_v55 = vld [vmem:[%s10371_s4 + $0x160] sm:$0xf]  ;;  %v6672_v56 = vld [vmem:[%s10371_s4 + $0x164] sm:$0xf0]  ;;  %v6666_v36 = vld [vmem:[%s10371_s4 + $0x134] sm:$0xf0] }
  0xbf   :  { %1575 = vmatpush.bf16.msra.mxu3 %v4787_v52  ;;  %1588 = vmatpush.bf16.msra.mxu2 %v4915_v54 }
  0xc1   :  { %1564 = vmatpush.bf16.msrb.mxu1 %v4627_v12  ;;  %1602 = vmatpush.bf16.msra.mxu0 %v5027_v16  ;;  %v1319_v50 = vpop.f32.mrf.mxu0  ;;  %v1332_v51 = vpop.f32.mrf.mxu1  ;;  %v5154_v12 = vld [vmem:[%s10371_s4 + $0x10] sm:$0xf] }
  0xc2   :  { %v1347_v52 = vpop.f32.mrf.mxu2  ;;  %v5155_v15 = vor.u32 %v6630_v13, %v5154_v12  ;;  %v5314_v13 = vld [vmem:[%s10371_s4 + $0x150] sm:$0xf] }
  0xc3   :  { %1576 = vmatpush.bf16.msra.mxu3 %v4771_v8  ;;  %1589 = vmatpush.bf16.msra.mxu2 %v4899_v10  ;;  %v5163_v8 = vor.u32 %v6632_v1, %v5162_v0  ;;  %v5323_v0 = vor.u32 %v6672_v56, %v5322_v55  ;;  %v6649_v1 = vld [vmem:[%s10371_s4 + $0xb4] sm:$0xf]  ;;  %v6660_v55 = vld [vmem:[%s10371_s4 + $0x104] sm:$0xf0] }
  0xc4   :  { %1565 = vmatmul.bf16.vlgmr.msrb.gmra.mxu1 %v7330_v53  ;;  %v5250_v53 = vld [vmem:[%s10371_s4 + $0xd0] sm:$0xf] }
  0xc5   :  { %1616 = vmatpush.bf16.msra.mxu1 %v5139_v9  ;;  %1603 = vmatpush.bf16.msra.mxu0 %v5011_v28  ;;  %v5251_v49 = vor.u32 %v6654_v19, %v5250_v53  ;;  %v5188_v53 = vld [vmem:[%s10371_s4 + $0x58] sm:$0xf0] }
  0xc7   :  { %1577 = vmatpush.bf16.msra.mxu3 %v4755_v25  ;;  %1590 = vmatpush.bf16.msra.mxu2 %v4883_v26  ;;  %v6657_v25 = vld [vmem:[%s10371_s4 + $0xf4] sm:$0xf]  ;;  %v5268_v26 = vld [vmem:[%s10371_s4 + $0xf8] sm:$0xf0] }
  0xc8   :  { %1604 = vmatmul.bf16.vlgmr.msra.gmra.mxu0 %v7549_v39  ;;  %v1294_v39 = vadd.f32 %v8253_v35, %v1281_v45  ;;  %v6650_v35 = vld [vmem:[%s10371_s4 + $0xb4] sm:$0xf0]  ;;  %v5271_v37 = vor.u32 %v6657_v25, %v5268_v26  ;;  %v6653_v45 = vld [vmem:[%s10371_s4 + $0xd4] sm:$0xf] }
  0xc9   :  { %2033 = vmatpush.bf16.msrb.mxu1 %v5267_v32  ;;  %v5235_v2 = vor.u32 %v6650_v35, %v5234_v59  ;;  %v8409_v3 = vpop.f32.mrf.mxu3  ;;  %v1321_v4 = vpop.f32.mrf.mxu0  ;;  %v5211_v32 = vor.u32 %v6644_v24, %v5210_v23  ;;  %v243_v59 = vperm.slane %v8314_v6, 1  ;;  %v5306_v23 = vld [vmem:[%s10371_s4 + $0x140] sm:$0xf]  ;;  %v6668_v24 = vld [vmem:[%s10371_s4 + $0x144] sm:$0xf0] }
  0xca   :  { %1578 = vmatmul.bf16.vlgmr.msra.gmra.mxu3 %v7343_v60  ;;  %1591 = vmatmul.bf16.vlgmr.msra.gmra.mxu2 %v7538_v34  ;;  %v5178_v60 = vld [vmem:[%s10371_s4 + $0x40] sm:$0xf]  ;;  %v6652_v34 = vld [vmem:[%s10371_s4 + $0xc4] sm:$0xf0]  ;;  %v1307_v61 = vadd.f32 %v8258_v41, %v1294_v39  ;;  %v1334_v7 = vpop.f32.mrf.mxu1  ;;  %v5330_v39 = vld [vmem:[%s10371_s4 + $0x170] sm:$0xf]  ;;  %v5307_v26 = vor.u32 %v6668_v24, %v5306_v23 }
  0xcb   :  { %2020 = vmatpush.bf16.msrb.mxu3 %v5203_v27  ;;  %v5179_v54 = vor.u32 %v6636_v47, %v5178_v60  ;;  %v5243_v58 = vor.u32 %v6652_v34, %v5242_v29  ;;  %v5226_v41 = vld [vmem:[%s10371_s4 + $0xa0] sm:$0xf]  ;;  %v5147_v27 = vor.u32 %v6628_v18, %v5146_v17  ;;  %v6635_v47 = vld [vmem:[%s10371_s4 + $0x44] sm:$0xf]  ;;  %v5244_v34 = vld [vmem:[%s10371_s4 + $0xc8] sm:$0xf0] }
  0xcc   :  { %v1320_v63 = vadd.f32 %v1319_v50, %v1307_v61  ;;  %v5227_v57 = vor.u32 %v6648_v5, %v5226_v41  ;;  %v6651_v29 = vld [vmem:[%s10371_s4 + $0xc4] sm:$0xf]  ;;  %v6633_v61 = vld [vmem:[%s10371_s4 + $0x34] sm:$0xf]  ;;  %v1359_v41 = vadd.f32 %v8409_v3, %v243_v59  ;;  %v5164_v7 = vld [vmem:[%s10371_s4 + $0x28] sm:$0xf0] }
  0xcd   :  { %2034 = vmatpush.bf16.msrb.mxu1 %v5259_v44  ;;  %v8419_v10 = vpop.f32.mrf.mxu2  ;;  %v6637_v44 = vld [vmem:[%s10371_s4 + $0x54] sm:$0xf]  ;;  %v6631_v5 = vld [vmem:[%s10371_s4 + $0x24] sm:$0xf]  ;;  %v5228_v3 = vld [vmem:[%s10371_s4 + $0xa8] sm:$0xf0] }
  0xce   :  { %v1333_v11 = vadd.f32 %v1332_v51, %v1320_v63  ;;  %v5191_v60 = vor.u32 %v6637_v44, %v5188_v53  ;;  %v6674_v51 = vld [vmem:[%s10371_s4 + $0x174] sm:$0xf0]  ;;  %v5247_v63 = vor.u32 %v6651_v29, %v5244_v34  ;;  %v1372_v17 = vadd.f32 %v8419_v10, %v1359_v41  ;;  %v6629_v18 = vld [vmem:[%s10371_s4 + $0x14] sm:$0xf]  ;;  %v5220_v10 = vld [vmem:[%s10371_s4 + $0x98] sm:$0xf0] }
  0xcf   :  { %2021 = vmatpush.bf16.msrb.mxu3 %v5195_v40  ;;  %v5260_v40 = vld [vmem:[%s10371_s4 + $0xe8] sm:$0xf0]  ;;  %v6664_v44 = vld [vmem:[%s10371_s4 + $0x124] sm:$0xf0]  ;;  %v6673_v59 = vld [vmem:[%s10371_s4 + $0x174] sm:$0xf] }
  0xd0   :  { %v1346_v16 = vadd.f32 %v1345_v38, %v1333_v11  ;;  %v6655_v38 = vld [vmem:[%s10371_s4 + $0xe4] sm:$0xf]  ;;  %v5370_v24 = vld [vmem:[%s10371_s4 + $0x1c0] sm:$0xf] }
  0xd1   :  { %2035 = vmatpush.bf16.msrb.mxu1 %v5251_v49  ;;  %v1360_v21 = vpop.f32.mrf.mxu3  ;;  %v5263_v19 = vor.u32 %v6655_v38, %v5260_v40  ;;  %v5180_v49 = vld [vmem:[%s10371_s4 + $0x48] sm:$0xf0]  ;;  %v6647_v11 = vld [vmem:[%s10371_s4 + $0xa4] sm:$0xf]  ;;  %v5299_v40 = vor.u32 %v6666_v36, %v5298_v33 }
  0xd2   :  { %v1622_v30 = vmax.f32 %v1346_v16, 0.0  ;;  %v5167_v16 = vor.u32 %v6631_v5, %v5164_v7  ;;  %v5231_v21 = vor.u32 %v6647_v11, %v5228_v3  ;;  %v5212_v38 = vld [vmem:[%s10371_s4 + $0x88] sm:$0xf0]  ;;  %v6669_v7 = vld [vmem:[%s10371_s4 + $0x154] sm:$0xf] }
  0xd3   :  { %2022 = vmatpush.bf16.msrb.mxu3 %v5187_v46  ;;  %v5252_v46 = vld [vmem:[%s10371_s4 + $0xd8] sm:$0xf0]  ;;  %v6688_v3 = vld [vmem:[%s10371_s4 + $0x1e4] sm:$0xf0] }
  0xd4   :  { %5143 = vmatmul.msk.bf16.vlgmr.msra.gmra.mxu1 %vm1254_vm0, %v7450_v48  ;;  %v5218_v48 = vld [vmem:[%s10371_s4 + $0x90] sm:$0xf]  ;;  %v8469_v42 = vpack.c.bf16 %v1622_v30, %v1622_v30  ;;  %v5255_v50 = vor.u32 %v6653_v45, %v5252_v46  ;;  %v5148_v30 = vld [vmem:[%s10371_s4 + $0x8] sm:$0xf0] }
  0xd5   :  { %2036 = vmatpush.bf16.msrb.mxu1 %v5243_v58  ;;  %v5219_v9 = vor.u32 %v6646_v14, %v5218_v48  ;;  %v1373_v28 = vpop.f32.mrf.mxu2  ;;  %v5183_v58 = vor.u32 %v6635_v47, %v5180_v49  ;;  %v5282_v49 = vld [vmem:[%s10371_s4 + $0x110] sm:$0xf] }
  0xd6   :  { %v6627_v28 = vld [vmem:[%s10371_s4 + $0x4] sm:$0xf] }
  0xd7   :  { %2023 = vmatpush.bf16.msrb.mxu3 %v5179_v54  ;;  %v5331_v54 = vor.u32 %v6674_v51, %v5330_v39 }
  0xd9   :  { %2037 = vmatpush.bf16.msrb.mxu1 %v5235_v2  ;;  %2046 = vmatpush.bf16.msrb.mxu2 %v5331_v54  ;;  %v5236_v2 = vld [vmem:[%s10371_s4 + $0xb8] sm:$0xf0]  ;;  %v5274_v54 = vld [vmem:[%s10371_s4 + $0x100] sm:$0xf] }
  0xdb   :  { %2024 = vmatpush.bf16.msrb.mxu3 %v5171_v62  ;;  %v5172_v62 = vld [vmem:[%s10371_s4 + $0x38] sm:$0xf0] }
  0xdc   :  { %v5175_v4 = vor.u32 %v6633_v61, %v5172_v62  ;;  %v5324_v62 = vld [vmem:[%s10371_s4 + $0x168] sm:$0xf0] }
  0xdd   :  { %2038 = vmatpush.bf16.msrb.mxu1 %v5227_v57  ;;  %2047 = vmatpush.bf16.msrb.mxu2 %v5323_v0  ;;  %v6670_v57 = vld [vmem:[%s10371_s4 + $0x154] sm:$0xf0] }
  0xde   :  { %v5315_v14 = vor.u32 %v6670_v57, %v5314_v13  ;;  %v6690_v0 = vld [vmem:[%s10371_s4 + $0x1f4] sm:$0xf0] }
  0xdf   :  { %2025 = vmatpush.bf16.msrb.mxu3 %v5163_v8  ;;  %v5239_v8 = vor.u32 %v6649_v1, %v5236_v2 }
  0xe1   :  { %2039 = vmatpush.bf16.msrb.mxu1 %v5219_v9  ;;  %v1384_v52 = vpop.f32.mrf.mxu0  ;;  %v1397_v35 = vpop.f32.mrf.mxu1  ;;  %2048 = vmatpush.bf16.msrb.mxu2 %v5315_v14  ;;  %v6667_v14 = vld [vmem:[%s10371_s4 + $0x144] sm:$0xf] }
  0xe2   :  { %v1385_v25 = vadd.f32 %v1384_v52, %v1372_v17 }
  0xe3   :  { %2026 = vmatpush.bf16.msrb.mxu3 %v5155_v15 }
  0xe4   :  { %v1398_v53 = vadd.f32 %v1397_v35, %v1385_v25  ;;  %v6671_v35 = vld [vmem:[%s10371_s4 + $0x164] sm:$0xf]  ;;  %v6684_v25 = vld [vmem:[%s10371_s4 + $0x1c4] sm:$0xf0] }
  0xe5   :  { %2040 = vmatpush.bf16.msrb.mxu1 %v5211_v32  ;;  %v6643_v32 = vld [vmem:[%s10371_s4 + $0x84] sm:$0xf]  ;;  %2049 = vmatpush.bf16.msrb.mxu2 %v5307_v26  ;;  %v5327_v41 = vor.u32 %v6671_v35, %v5324_v62  ;;  %v5396_v35 = vld [vmem:[%s10371_s4 + $0x1f8] sm:$0xf0] }
  0xe6   :  { %v6663_v26 = vld [vmem:[%s10371_s4 + $0x124] sm:$0xf] }
  0xe7   :  { %2027 = vmatpush.bf16.msrb.mxu3 %v5147_v27  ;;  %v5159_v27 = vor.u32 %v6629_v18, %v5156_v20  ;;  %v5378_v20 = vld [vmem:[%s10371_s4 + $0x1d0] sm:$0xf] }
  0xe9   :  { %2085 = vmatpush.bf16.msra.mxu1 %v5271_v37  ;;  %v1410_v12 = vpop.f32.mrf.mxu3  ;;  %v1386_v48 = vpop.f32.mrf.mxu0  ;;  %2050 = vmatpush.bf16.msrb.mxu2 %v5299_v40  ;;  %v5284_v40 = vld [vmem:[%s10371_s4 + $0x118] sm:$0xf0] }
  0xea   :  { %2028 = vmatmul.bf16.vlgmr.msrb.gmra.mxu3 %v8469_v42  ;;  %v1399_v9 = vpop.f32.mrf.mxu1  ;;  %v1411_v46 = vadd.f32 %v1410_v12, %v1398_v53  ;;  %v5386_v12 = vld [vmem:[%s10371_s4 + $0x1e0] sm:$0xf] }
  0xeb   :  { %2072 = vmatpush.bf16.msra.mxu3 %v5207_v31  ;;  %v5223_v31 = vor.u32 %v6645_v22, %v5220_v10  ;;  %v5387_v13 = vor.u32 %v6688_v3, %v5386_v12  ;;  %v6686_v9 = vld [vmem:[%s10371_s4 + $0x1d4] sm:$0xf0]  ;;  %v6665_v22 = vld [vmem:[%s10371_s4 + $0x134] sm:$0xf]  ;;  %v5300_v10 = vld [vmem:[%s10371_s4 + $0x138] sm:$0xf0] }
  0xec   :  { %v5303_v23 = vor.u32 %v6665_v22, %v5300_v10  ;;  %v5354_v53 = vld [vmem:[%s10371_s4 + $0x1a0] sm:$0xf]  ;;  %v5380_v12 = vld [vmem:[%s10371_s4 + $0x1d8] sm:$0xf0]  ;;  %v6679_v10 = vld [vmem:[%s10371_s4 + $0x1a4] sm:$0xf] }
  0xed   :  { %2086 = vmatpush.bf16.msra.mxu1 %v5263_v19  ;;  %v1423_v15 = vpop.f32.mrf.mxu2  ;;  %v5151_v19 = vor.u32 %v6627_v28, %v5148_v30  ;;  %v5292_v28 = vld [vmem:[%s10371_s4 + $0x128] sm:$0xf0]  ;;  %v5362_v30 = vld [vmem:[%s10371_s4 + $0x1b0] sm:$0xf] }
  0xee   :  { %v1424_v29 = vadd.f32 %v1423_v15, %v1411_v46  ;;  %v5308_v15 = vld [vmem:[%s10371_s4 + $0x148] sm:$0xf0]  ;;  %v5295_v36 = vor.u32 %v6663_v26, %v5292_v28  ;;  %v5348_v26 = vld [vmem:[%s10371_s4 + $0x198] sm:$0xf0] }
  0xef   :  { %2073 = vmatpush.bf16.msra.mxu3 %v5199_v43  ;;  %v5290_v43 = vld [vmem:[%s10371_s4 + $0x120] sm:$0xf]  ;;  %v5311_v18 = vor.u32 %v6667_v14, %v5308_v15  ;;  %v6683_v14 = vld [vmem:[%s10371_s4 + $0x1c4] sm:$0xf]  ;;  %v5372_v15 = vld [vmem:[%s10371_s4 + $0x1c8] sm:$0xf0] }
  0xf0   :  { %v5291_v47 = vor.u32 %v6664_v44, %v5290_v43  ;;  %v244_v43 = vperm.slane %v8314_v6, 2 }
  0xf1   :  { %2087 = vmatpush.bf16.msra.mxu1 %v5255_v50  ;;  %v1412_v37 = vpop.f32.mrf.mxu3  ;;  %v6662_v50 = vld [vmem:[%s10371_s4 + $0x114] sm:$0xf0] }
  0xf2   :  { %2051 = vmatpush.bf16.msrb.mxu2 %v5291_v47  ;;  %v5283_v34 = vor.u32 %v6662_v50, %v5282_v49  ;;  %v6659_v49 = vld [vmem:[%s10371_s4 + $0x104] sm:$0xf]  ;;  %v5276_v50 = vld [vmem:[%s10371_s4 + $0x108] sm:$0xf0] }
  0xf3   :  { %2074 = vmatpush.bf16.msra.mxu3 %v5191_v60  ;;  %v5215_v60 = vor.u32 %v6643_v32, %v5212_v38  ;;  %v6661_v38 = vld [vmem:[%s10371_s4 + $0x114] sm:$0xf] }
  0xf5   :  { %2088 = vmatpush.bf16.msra.mxu1 %v5247_v63  ;;  %v1425_v45 = vpop.f32.mrf.mxu2  ;;  %v5394_v63 = vld [vmem:[%s10371_s4 + $0x1f0] sm:$0xf] }
  0xf6   :  { %2052 = vmatpush.bf16.msrb.mxu2 %v5283_v34  ;;  %v5395_v1 = vor.u32 %v6690_v0, %v5394_v63  ;;  %v5287_v45 = vor.u32 %v6661_v38, %v5284_v40  ;;  %v5279_v34 = vor.u32 %v6659_v49, %v5276_v50  ;;  %v6687_v0 = vld [vmem:[%s10371_s4 + $0x1e4] sm:$0xf] }
  0xf7   :  { %2075 = vmatpush.bf16.msra.mxu3 %v5183_v58  ;;  %v5275_v58 = vor.u32 %v6660_v55, %v5274_v54 }
  0xf8   :  { %2059 = vmatpush.bf16.msrb.mxu0 %v5395_v1  ;;  %v5388_v1 = vld [vmem:[%s10371_s4 + $0x1e8] sm:$0xf0] }
  0xf9   :  { %2089 = vmatpush.bf16.msra.mxu1 %v5239_v8  ;;  %v1436_v39 = vpop.f32.mrf.mxu3  ;;  %v5316_v8 = vld [vmem:[%s10371_s4 + $0x158] sm:$0xf0] }
  0xfa   :  { %v1437_v51 = vadd.f32 %v1436_v39, %v1424_v29  ;;  %2053 = vmatpush.bf16.msrb.mxu2 %v5275_v58  ;;  %v5319_v11 = vor.u32 %v6669_v7, %v5316_v8  ;;  %v5346_v39 = vld [vmem:[%s10371_s4 + $0x190] sm:$0xf]  ;;  %v6676_v58 = vld [vmem:[%s10371_s4 + $0x184] sm:$0xf0] }
  0xfb   :  { %2076 = vmatpush.bf16.msra.mxu3 %v5175_v4 }
  0xfc   :  { %v1623_v52 = vmax.f32 %v1437_v51, 0.0  ;;  %2060 = vmatpush.bf16.msrb.mxu0 %v5387_v13  ;;  %v6678_v51 = vld [vmem:[%s10371_s4 + $0x194] sm:$0xf0] }
  0xfd   :  { %2090 = vmatpush.bf16.msra.mxu1 %v5231_v21  ;;  %v5379_v21 = vor.u32 %v6686_v9, %v5378_v20  ;;  %v6681_v9 = vld [vmem:[%s10371_s4 + $0x1b4] sm:$0xf] }
  0xfe   :  { %v1627_v56 = vpack.c.bf16 %v1623_v52, %v1623_v52  ;;  %v5347_v52 = vor.u32 %v6678_v51, %v5346_v39 }
  0xff   :  { %2077 = vmatpush.bf16.msra.mxu3 %v5167_v16 }
 0x100   :  { %2041 = vmatmul.bf16.vlgmr.msrb.gmra.mxu1 %v1627_v56  ;;  %2061 = vmatpush.bf16.msrb.mxu0 %v5379_v21  ;;  %v5364_v21 = vld [vmem:[%s10371_s4 + $0x1b8] sm:$0xf0] }
 0x101   :  { %2091 = vmatpush.bf16.msra.mxu1 %v5223_v31  ;;  %v1438_v2 = vpop.f32.mrf.mxu3  ;;  %v8614_v4 = vpop.f32.mrf.mxu0  ;;  %v6682_v31 = vld [vmem:[%s10371_s4 + $0x1b4] sm:$0xf0]  ;;  %v5367_v22 = vor.u32 %v6681_v9, %v5364_v21  ;;  %v5500_v9 = vld [vmem:[%s10373_s6 + $0xd0] sm:$0xf0]  ;;  %v5506_v21 = vld [vmem:[%s10373_s6 + $0xc8] sm:$0xf] }
 0x102   :  { %v1449_v5 = vpop.f32.mrf.mxu1  ;;  %v5363_v37 = vor.u32 %v6682_v31, %v5362_v30  ;;  %v6675_v30 = vld [vmem:[%s10371_s4 + $0x184] sm:$0xf]  ;;  %v5340_v31 = vld [vmem:[%s10371_s4 + $0x188] sm:$0xf0] }
 0x103   :  { %2078 = vmatpush.bf16.msra.mxu3 %v5159_v27  ;;  %v5371_v27 = vor.u32 %v6684_v25, %v5370_v24  ;;  %v6677_v25 = vld [vmem:[%s10371_s4 + $0x194] sm:$0xf] }
 0x104   :  { %v5351_v28 = vor.u32 %v6677_v25, %v5348_v26  ;;  %v5508_v25 = vld [vmem:[%s10373_s6 + $0xd8] sm:$0xf0]  ;;  %v5482_v26 = vld [vmem:[%s10373_s6 + $0xa0] sm:$0xf] }
 0x105   :  { %2092 = vmatpush.bf16.msra.mxu1 %v5215_v60  ;;  %2062 = vmatpush.bf16.msrb.mxu0 %v5371_v27  ;;  %v1450_v60 = vadd.f32 %v1449_v5, %v244_v43  ;;  %v245_v27 = vperm.slane %v8314_v6, 3 }
 0x107   :  { %2079 = vmatpush.bf16.msra.mxu3 %v5151_v19  ;;  %v6680_v19 = vld [vmem:[%s10371_s4 + $0x1a4] sm:$0xf0] }
 0x108   :  { %v5355_v46 = vor.u32 %v6680_v19, %v5354_v53 }
 0x109   :  { %v1477_v48 = vpop.f32.mrf.mxu0  ;;  %2063 = vmatpush.bf16.msrb.mxu0 %v5363_v37 }
 0x10a   :  { %2080 = vmatmul.bf16.vlgmr.msra.gmra.mxu3 %v8469_v42  ;;  %v5332_v42 = vld [vmem:[%s10371_s4 + $0x178] sm:$0xf0]  ;;  %v1451_v17 = vpop.f32.mrf.mxu1 }
 0x10b   :  { %v5335_v61 = vor.u32 %v6673_v59, %v5332_v42  ;;  %v6689_v42 = vld [vmem:[%s10371_s4 + $0x1f4] sm:$0xf]  ;;  %v5375_v17 = vor.u32 %v6683_v14, %v5372_v15  ;;  %v5524_v14 = vld [vmem:[%s10373_s6 + $0xf8] sm:$0xf0] }
 0x10d   :  { %2098 = vmatpush.bf16.msra.mxu2 %v5335_v61  ;;  %v1462_v57 = vpop.f32.mrf.mxu3  ;;  %v1488_v16 = vpop.f32.mrf.mxu2  ;;  %2064 = vmatpush.bf16.msrb.mxu0 %v5355_v46  ;;  %v5399_v61 = vor.u32 %v6689_v42, %v5396_v35 }
 0x10e   :  { %v1463_v29 = vadd.f32 %v1462_v57, %v1450_v60 }
 0x110   :  { %2093 = vmatmul.bf16.vlgmr.msra.gmra.mxu1 %v1627_v56  ;;  %v1476_v55 = vadd.f32 %v8614_v4, %v1463_v29  ;;  %v5338_v56 = vld [vmem:[%s10371_s4 + $0x180] sm:$0xf] }
 0x111   :  { %2099 = vmatpush.bf16.msra.mxu2 %v5327_v41  ;;  %v1527_v33 = vpop.f32.mrf.mxu0  ;;  %2065 = vmatpush.bf16.msrb.mxu0 %v5347_v52  ;;  %v5339_v59 = vor.u32 %v6676_v58, %v5338_v56  ;;  %v5391_v41 = vor.u32 %v6687_v0, %v5388_v1 }
 0x112   :  { %v1489_v62 = vadd.f32 %v1488_v16, %v1476_v55 }
 0x115   :  { %2100 = vmatpush.bf16.msra.mxu2 %v5319_v11  ;;  %v1464_v32 = vpop.f32.mrf.mxu3  ;;  %v1490_v44 = vpop.f32.mrf.mxu2  ;;  %2066 = vmatpush.bf16.msrb.mxu0 %v5339_v59  ;;  %v6685_v11 = vld [vmem:[%s10371_s4 + $0x1d4] sm:$0xf] }
 0x116   :  { %v5383_v13 = vor.u32 %v6685_v11, %v5380_v12  ;;  %v5516_v11 = vld [vmem:[%s10373_s6 + $0xf0] sm:$0xf0]  ;;  %v5522_v12 = vld [vmem:[%s10373_s6 + $0xe8] sm:$0xf] }
 0x119   :  { %2101 = vmatpush.bf16.msra.mxu2 %v5311_v18  ;;  %v1529_v47 = vpop.f32.mrf.mxu0  ;;  %2111 = vmatpush.bf16.msra.mxu0 %v5399_v61 }
 0x11d   :  { %2102 = vmatpush.bf16.msra.mxu2 %v5303_v23  ;;  %2112 = vmatpush.bf16.msra.mxu0 %v5391_v41  ;;  %v5356_v23 = vld [vmem:[%s10371_s4 + $0x1a8] sm:$0xf0]  ;;  %v6721_v41 = vld [vmem:[%s10373_s6 + $0xec] sm:$0xf0] }
 0x11e   :  { %v5359_v24 = vor.u32 %v6679_v10, %v5356_v23 }
 0x121   :  { %2103 = vmatpush.bf16.msra.mxu2 %v5295_v36  ;;  %v1501_v54 = vpop.f32.mrf.mxu1  ;;  %2113 = vmatpush.bf16.msra.mxu0 %v5383_v13  ;;  %v5343_v36 = vor.u32 %v6675_v30, %v5340_v31  ;;  %v6711_v30 = vld [vmem:[%s10373_s6 + $0xa4] sm:$0xf]  ;;  %v5484_v31 = vld [vmem:[%s10373_s6 + $0xb0] sm:$0xf0] }
 0x122   :  { %v1502_v2 = vadd.f32 %v1501_v54, %v1489_v62  ;;  %v1694_v54 = vld [vmem:[%s10372_s5] sm:$0x3] }
 0x123   :  { %v1696_v55 = vperm.slane %v1694_v54, 0  ;;  %v1697_v62 = vperm.slane %v1694_v54, 1  ;;  %v6705_v54 = vld [vmem:[%s10373_s6 + $0x6c] sm:$0xf0] }
 0x125   :  { %2104 = vmatpush.bf16.msra.mxu2 %v5287_v45  ;;  %v1553_v63 = vpop.f32.mrf.mxu0  ;;  %2114 = vmatpush.bf16.msra.mxu0 %v5375_v17  ;;  %v6717_v17 = vld [vmem:[%s10373_s6 + $0xcc] sm:$0xf0] }
 0x129   :  { %2105 = vmatpush.bf16.msra.mxu2 %v5279_v34  ;;  %v1503_v4 = vpop.f32.mrf.mxu1  ;;  %2115 = vmatpush.bf16.msra.mxu0 %v5367_v22  ;;  %v6718_v22 = vld [vmem:[%s10373_s6 + $0xd4] sm:$0xf0] }
 0x12a   :  { %v5514_v4 = vld [vmem:[%s10373_s6 + $0xe0] sm:$0xf]  ;;  %v5507_v23 = vor.u32 %v6718_v22, %v5506_v21 }
 0x12d   :  { %v1514_v5 = vpop.f32.mrf.mxu3  ;;  %v1540_v8 = vpop.f32.mrf.mxu2  ;;  %2116 = vmatpush.bf16.msra.mxu0 %v5359_v24  ;;  %v6716_v24 = vld [vmem:[%s10373_s6 + $0xcc] sm:$0xf] }
 0x12e   :  { %v1515_v7 = vadd.f32 %v1514_v5, %v1502_v2  ;;  %v1555_v48 = vpop.f32.mrf.mxu0  ;;  %v1541_v32 = vadd.f32 %v1540_v8, %v245_v27  ;;  %v6719_v5 = vld [vmem:[%s10373_s6 + $0xe4] sm:$0xf]  ;;  %v5515_v8 = vor.u32 %v6721_v41, %v5514_v4  ;;  %v5511_v27 = vor.u32 %v6716_v24, %v5508_v25  ;;  %v5434_v41 = vld [vmem:[%s10373_s6 + $0x40] sm:$0xf]  ;;  %v6696_v24 = vld [vmem:[%s10373_s6 + $0x2c] sm:$0xf] }
 0x12f   :  { %v5519_v13 = vor.u32 %v6719_v5, %v5516_v11  ;;  %v6720_v48 = vld [vmem:[%s10373_s6 + $0xec] sm:$0xf]  ;;  %v6701_v5 = vld [vmem:[%s10373_s6 + $0x4c] sm:$0xf0] }
 0x130   :  { %v1528_v3 = vadd.f32 %v1527_v33, %v1515_v7  ;;  %v1554_v37 = vadd.f32 %v1553_v63, %v1541_v32  ;;  %2336 = vmatpush.bf16.msrb.mxu3 %v5515_v8  ;;  %v5527_v15 = vor.u32 %v6720_v48, %v5524_v14  ;;  %v6699_v8 = vld [vmem:[%s10373_s6 + $0x44] sm:$0xf]  ;;  %v5435_v11 = vor.u32 %v6701_v5, %v5434_v41  ;;  %v6700_v14 = vld [vmem:[%s10373_s6 + $0x4c] sm:$0xf]  ;;  %v6929_v41 = vld [vmem:[%s10375_s8 + $0x670] sm:$0xf0] }
 0x131   :  { %2117 = vmatpush.bf16.msra.mxu0 %v5351_v28  ;;  %2349 = vmatpush.bf16.msrb.mxu1 %v5519_v13  ;;  %v6713_v28 = vld [vmem:[%s10373_s6 + $0xac] sm:$0xf0]  ;;  %v6702_v13 = vld [vmem:[%s10373_s6 + $0x54] sm:$0xf0] }
 0x132   :  { %v1624_v57 = vmax.f32 %v1528_v3, 0.0  ;;  %v6722_v3 = vld [vmem:[%s10373_s6 + $0xf4] sm:$0xf0]  ;;  %v5483_v32 = vor.u32 %v6713_v28, %v5482_v26  ;;  %v5402_v28 = vld [vmem:[%s10373_s6] sm:$0xf] }
 0x133   :  { %v5698_v5 = vld [vmem:[%s10375_s8 + $0x150] sm:$0xf] }
 0x134   :  { %v1628_v16 = vpack.c.bf16 %v1624_v57, %v1624_v57  ;;  %v5523_v57 = vor.u32 %v6722_v3, %v5522_v12  ;;  %v5436_v12 = vld [vmem:[%s10373_s6 + $0x50] sm:$0xf0]  ;;  %v5442_v3 = vld [vmem:[%s10373_s6 + $0x48] sm:$0xf] }
 0x135   :  { %v1516_v18 = vpop.f32.mrf.mxu3  ;;  %v1542_v20 = vpop.f32.mrf.mxu2  ;;  %2118 = vmatpush.bf16.msra.mxu0 %v5343_v36  ;;  %v5490_v36 = vld [vmem:[%s10373_s6 + $0xa8] sm:$0xf]  ;;  %v5443_v48 = vor.u32 %v6702_v13, %v5442_v3  ;;  %v6880_v3 = vld [vmem:[%s10375_s8 + $0x4e8] sm:$0xf0] }
 0x136   :  { %2054 = vmatmul.bf16.vlgmr.msrb.gmra.mxu2 %v1628_v16  ;;  %v6715_v18 = vld [vmem:[%s10373_s6 + $0xc4] sm:$0xf] }
 0x137   :  { %2362 = vmatpush.bf16.msrb.mxu2 %v5523_v57  ;;  %v5503_v10 = vor.u32 %v6715_v18, %v5500_v9  ;;  %v5439_v57 = vor.u32 %v6699_v8, %v5436_v12  ;;  %v6697_v18 = vld [vmem:[%s10373_s6 + $0x2c] sm:$0xf0]  ;;  %v5420_v9 = vld [vmem:[%s10373_s6 + $0x30] sm:$0xf0]  ;;  %v6768_v8 = vld [vmem:[%s10375_s8 + $0x168] sm:$0xf0] }
 0x138   :  { %v6146_v12 = vld [vmem:[%s10375_s8 + $0x4d0] sm:$0xf] }
 0x139   :  { %2350 = vmatpush.bf16.msrb.mxu1 %v5503_v10  ;;  %v5426_v10 = vld [vmem:[%s10373_s6 + $0x28] sm:$0xf] }
 0x13b   :  { %2363 = vmatpush.bf16.msrb.mxu2 %v5507_v23  ;;  %v6698_v23 = vld [vmem:[%s10373_s6 + $0x34] sm:$0xf0] }
 0x13c   :  { %v5427_v26 = vor.u32 %v6698_v23, %v5426_v10 }
 0x141   :  { %v1566_v33 = vpop.f32.mrf.mxu1 }
 0x142   :  { %v1567_v40 = vadd.f32 %v1566_v33, %v1554_v37  ;;  %v5487_v33 = vor.u32 %v6711_v30, %v5484_v31  ;;  %v6714_v37 = vld [vmem:[%s10373_s6 + $0xb4] sm:$0xf0]  ;;  %v6693_v30 = vld [vmem:[%s10373_s6 + $0xc] sm:$0xf0] }
 0x144   :  { %2351 = vmatpush.bf16.msrb.mxu1 %v5487_v33  ;;  %v5404_v33 = vld [vmem:[%s10373_s6 + $0x10] sm:$0xf0] }
 0x145   :  { %v1605_v38 = vpop.f32.mrf.mxu0 }
 0x146   :  { %2106 = vmatmul.bf16.vlgmr.msra.gmra.mxu2 %v1628_v16  ;;  %v5498_v16 = vld [vmem:[%s10373_s6 + $0xc0] sm:$0xf] }
 0x147   :  { %v5499_v20 = vor.u32 %v6717_v17, %v5498_v16  ;;  %v5418_v16 = vld [vmem:[%s10373_s6 + $0x20] sm:$0xf] }
 0x148   :  { %v5419_v21 = vor.u32 %v6697_v18, %v5418_v16  ;;  %v5670_v16 = vld [vmem:[%s10375_s8 + $0x118] sm:$0xf] }
 0x149   :  { %v1568_v6 = vpop.f32.mrf.mxu1  ;;  %2337 = vmatpush.bf16.msrb.mxu3 %v5499_v20  ;;  %v6695_v20 = vld [vmem:[%s10373_s6 + $0x24] sm:$0xf]  ;;  %v6118_v18 = vld [vmem:[%s10375_s8 + $0x498] sm:$0xf] }
 0x14a   :  { %v5491_v6 = vor.u32 %v6714_v37, %v5490_v36  ;;  %v5423_v22 = vor.u32 %v6695_v20, %v5420_v9  ;;  %v5410_v36 = vld [vmem:[%s10373_s6 + $0x8] sm:$0xf]  ;;  %v5403_v37 = vor.u32 %v6693_v30, %v5402_v28  ;;  %v6314_v20 = vld [vmem:[%s10375_s8 + $0x620] sm:$0xf]  ;;  %v6922_v9 = vld [vmem:[%s10375_s8 + $0x638] sm:$0xf0] }
 0x14b   :  { %v6090_v28 = vld [vmem:[%s10375_s8 + $0x460] sm:$0xf]  ;;  %v6315_v30 = vor.u32 %v6922_v9, %v6314_v20  ;;  %v6940_v20 = vld [vmem:[%s10375_s8 + $0x6cc] sm:$0xf] }
 0x14c   :  { %2364 = vmatpush.bf16.msrb.mxu2 %v5491_v6  ;;  %v5412_v6 = vld [vmem:[%s10373_s6 + $0x18] sm:$0xf0] }
 0x14d   :  { %v1579_v43 = vpop.f32.mrf.mxu3  ;;  %v1592_v53 = vpop.f32.mrf.mxu2  ;;  %2338 = vmatpush.bf16.msrb.mxu3 %v5483_v32  ;;  %v6691_v32 = vld [vmem:[%s10373_s6 + $0x4] sm:$0xf] }
 0x14e   :  { %v1580_v44 = vadd.f32 %v1579_v43, %v1567_v40  ;;  %v1607_v45 = vpop.f32.mrf.mxu0  ;;  %v5492_v43 = vld [vmem:[%s10373_s6 + $0xb8] sm:$0xf0] }
 0x14f   :  { %v6707_v45 = vld [vmem:[%s10373_s6 + $0x84] sm:$0xf] }
 0x150   :  { %v1593_v19 = vadd.f32 %v1592_v53, %v1580_v44  ;;  %v5466_v53 = vld [vmem:[%s10373_s6 + $0x80] sm:$0xf] }
 0x151   :  { %v1618_v60 = vpop.f32.mrf.mxu1 }
 0x152   :  { %v1606_v46 = vadd.f32 %v1605_v38, %v1593_v19  ;;  %v6712_v38 = vld [vmem:[%s10373_s6 + $0xac] sm:$0xf]  ;;  %v6709_v19 = vld [vmem:[%s10373_s6 + $0x8c] sm:$0xf0] }
 0x153   :  { %v5495_v44 = vor.u32 %v6712_v38, %v5492_v43  ;;  %v6694_v38 = vld [vmem:[%s10373_s6 + $0x14] sm:$0xf0] }
 0x154   :  { %v1619_v47 = vadd.f32 %v1618_v60, %v1606_v46  ;;  %v5467_v46 = vor.u32 %v6709_v19, %v5466_v53  ;;  %v5468_v60 = vld [vmem:[%s10373_s6 + $0x90] sm:$0xf0]  ;;  %v5411_v53 = vor.u32 %v6694_v38, %v5410_v36  ;;  %v6915_v36 = vld [vmem:[%s10375_s8 + $0x600] sm:$0xf0] }
 0x155   :  { %v1581_v49 = vpop.f32.mrf.mxu3  ;;  %v1594_v50 = vpop.f32.mrf.mxu2 }
 0x156   :  { %v1625_v29 = vmax.f32 %v1619_v47, 0.0  ;;  %v5474_v47 = vld [vmem:[%s10373_s6 + $0x88] sm:$0xf]  ;;  %v6710_v49 = vld [vmem:[%s10373_s6 + $0x94] sm:$0xf0]  ;;  %v5471_v50 = vor.u32 %v6707_v45, %v5468_v60  ;;  %2339 = vmatpush.bf16.msrb.mxu3 %v5467_v46 }
 0x157   :  { %v5950_v60 = vld [vmem:[%s10375_s8 + $0x348] sm:$0xf] }
 0x158   :  { %v1629_v34 = vpack.c.bf16 %v1625_v29, %v1625_v29  ;;  %v5475_v29 = vor.u32 %v6710_v49, %v5474_v47  ;;  %2352 = vmatpush.bf16.msrb.mxu1 %v5471_v50  ;;  %v6943_v49 = vld [vmem:[%s10375_s8 + $0x6e0] sm:$0xf0]  ;;  %v5922_v50 = vld [vmem:[%s10375_s8 + $0x310] sm:$0xf] }
 0x159   :  { %v1620_v39 = vpop.f32.mrf.mxu1 }
 0x15a   :  { %2067 = vmatmul.bf16.vlgmr.msrb.gmra.mxu0 %v1629_v34  ;;  %v5476_v39 = vld [vmem:[%s10373_s6 + $0x98] sm:$0xf0]  ;;  %2365 = vmatpush.bf16.msrb.mxu2 %v5475_v29  ;;  %v6824_v29 = vld [vmem:[%s10375_s8 + $0x328] sm:$0xf0] }
 0x15b   :  { %2375 = vmatpush.bf16.msrb.mxu0 %v5527_v15  ;;  %v5444_v15 = vld [vmem:[%s10373_s6 + $0x58] sm:$0xf0] }
 0x15c   :  { %v5447_v17 = vor.u32 %v6700_v14, %v5444_v15  ;;  %v6810_v14 = vld [vmem:[%s10375_s8 + $0x2b8] sm:$0xf0] }
 0x15f   :  { %2376 = vmatpush.bf16.msrb.mxu0 %v5511_v27  ;;  %v5428_v27 = vld [vmem:[%s10373_s6 + $0x38] sm:$0xf0] }
 0x160   :  { %v5431_v31 = vor.u32 %v6696_v24, %v5428_v27  ;;  %v5642_v24 = vld [vmem:[%s10375_s8 + $0xe0] sm:$0xf]  ;;  %v6754_v27 = vld [vmem:[%s10375_s8 + $0xf8] sm:$0xf0] }
 0x161   :  { %v5643_v38 = vor.u32 %v6754_v27, %v5642_v24  ;;  %v6726_v24 = vld [vmem:[%s10375_s8 + $0x18] sm:$0xf0] }
 0x163   :  { %2377 = vmatpush.bf16.msrb.mxu0 %v5495_v44  ;;  %v5407_v44 = vor.u32 %v6691_v32, %v5404_v33  ;;  %v6803_v32 = vld [vmem:[%s10375_s8 + $0x280] sm:$0xf0]  ;;  %v6286_v33 = vld [vmem:[%s10375_s8 + $0x5e8] sm:$0xf] }
 0x16a   :  { %2119 = vmatmul.bf16.vlgmr.msra.gmra.mxu0 %v1629_v34  ;;  %v6708_v34 = vld [vmem:[%s10373_s6 + $0x8c] sm:$0xf] }
 0x16d   :  { %v2029_v51 = vpop.f32.mrf.mxu3 }
 0x16e   :  { %v2030_v56 = vadd.f32 %v2029_v51, %v1696_v55  ;;  %v5479_v51 = vor.u32 %v6708_v34, %v5476_v39  ;;  %v6703_v55 = vld [vmem:[%s10373_s6 + $0x64] sm:$0xf]  ;;  %v6370_v39 = vld [vmem:[%s10375_s8 + $0x690] sm:$0xf] }
 0x170   :  { %2378 = vmatpush.bf16.msrb.mxu0 %v5479_v51  ;;  %v6936_v51 = vld [vmem:[%s10375_s8 + $0x6a8] sm:$0xf0] }
 0x175   :  { %v2031_v52 = vpop.f32.mrf.mxu3 }
 0x176   :  { %v5450_v52 = vld [vmem:[%s10373_s6 + $0x60] sm:$0xf] }
 0x17d   :  { %v2042_v58 = vpop.f32.mrf.mxu1 }
 0x17e   :  { %v8748_v42 = vadd.f32 %v2042_v58, %v2030_v56  ;;  %v5451_v58 = vor.u32 %v6705_v54, %v5450_v52  ;;  %v5726_v52 = vld [vmem:[%s10375_s8 + $0x188] sm:$0xf] }
 0x180   :  { %2340 = vmatpush.bf16.msrb.mxu3 %v5451_v58  ;;  %v6775_v58 = vld [vmem:[%s10375_s8 + $0x1a0] sm:$0xf0] }
 0x184   :  { %2341 = vmatpush.bf16.msrb.mxu3 %v5435_v11  ;;  %v5699_v11 = vor.u32 %v6768_v8, %v5698_v5  ;;  %v6733_v8 = vld [vmem:[%s10375_s8 + $0x50] sm:$0xf0] }
 0x185   :  { %v2044_v35 = vpop.f32.mrf.mxu1 }
 0x186   :  { %v5458_v35 = vld [vmem:[%s10373_s6 + $0x68] sm:$0xf] }
 0x188   :  { %2342 = vmatpush.bf16.msrb.mxu3 %v5419_v21  ;;  %v6873_v21 = vld [vmem:[%s10375_s8 + $0x4b0] sm:$0xf0] }
 0x189   :  { %v6119_v23 = vor.u32 %v6873_v21, %v6118_v18  ;;  %v5952_v18 = vld [vmem:[%s10375_s8 + $0x364] sm:$0xf0] }
 0x18c   :  { %2343 = vmatpush.bf16.msrb.mxu3 %v5403_v37 }
 0x18d   :  { %v2081_v59 = vpop.f32.mrf.mxu3  ;;  %v2094_v0 = vpop.f32.mrf.mxu1 }
 0x18e   :  { %v2082_v63 = vadd.f32 %v2081_v59, %v1697_v62  ;;  %v5452_v59 = vld [vmem:[%s10373_s6 + $0x70] sm:$0xf0] }
 0x18f   :  { %v5455_v62 = vor.u32 %v6703_v55, %v5452_v59  ;;  %v5923_v55 = vor.u32 %v6824_v29, %v5922_v50  ;;  %v6174_v59 = vld [vmem:[%s10375_s8 + $0x508] sm:$0xf]  ;;  %v2126_v50 = vld [vmem:[%s10368_s1] sm:$0xf] }
 0x190   :  { %v8750_v1 = vadd.f32 %v2094_v0, %v2082_v63  ;;  %v6704_v0 = vld [vmem:[%s10373_s6 + $0x6c] sm:$0xf] }
 0x191   :  { %2353 = vmatpush.bf16.msrb.mxu1 %v5455_v62  ;;  %v5727_v62 = vor.u32 %v6775_v58, %v5726_v52  ;;  %v6852_v58 = vld [vmem:[%s10375_s8 + $0x408] sm:$0xf0] }
 0x193   :  { %3820 = vmatpush.bf16.msra.mxu3 %v5727_v62  ;;  %v2127_v62 = vunpack.c.l.bf16 %v2126_v50  ;;  %v5896_v50 = vld [vmem:[%s10375_s8 + $0x2f4] sm:$0xf0] }
 0x195   :  { %v2083_v61 = vpop.f32.mrf.mxu3  ;;  %v2096_v2 = vpop.f32.mrf.mxu1  ;;  %2354 = vmatpush.bf16.msrb.mxu1 %v5439_v57  ;;  %v6147_v57 = vor.u32 %v6880_v3, %v6146_v12  ;;  %v6845_v12 = vld [vmem:[%s10375_s8 + $0x3d0] sm:$0xf0] }
 0x196   :  { %v6706_v61 = vld [vmem:[%s10373_s6 + $0x74] sm:$0xf0]  ;;  %v5460_v2 = vld [vmem:[%s10373_s6 + $0x78] sm:$0xf0] }
 0x197   :  { %v5459_v63 = vor.u32 %v6706_v61, %v5458_v35  ;;  %v5463_v4 = vor.u32 %v6704_v0, %v5460_v2  ;;  %v6887_v35 = vld [vmem:[%s10375_s8 + $0x520] sm:$0xf0]  ;;  %v6371_v61 = vor.u32 %v6936_v51, %v6370_v39  ;;  %v5894_v0 = vld [vmem:[%s10375_s8 + $0x2d8] sm:$0xf]  ;;  %v6817_v2 = vld [vmem:[%s10375_s8 + $0x2f0] sm:$0xf0]  ;;  %3821 = vmatpush.bf16.msra.mxu3 %v5699_v11 }
 0x198   :  { %v5895_v13 = vor.u32 %v6817_v2, %v5894_v0  ;;  %v5586_v39 = vld [vmem:[%s10375_s8 + $0x70] sm:$0xf]  ;;  %v6901_v0 = vld [vmem:[%s10375_s8 + $0x590] sm:$0xf0]  ;;  %v6006_v11 = vld [vmem:[%s10375_s8 + $0x3b8] sm:$0xf] }
 0x199   :  { %2366 = vmatpush.bf16.msrb.mxu2 %v5459_v63  ;;  %2379 = vmatpush.bf16.msrb.mxu0 %v5463_v4  ;;  %v6175_v63 = vor.u32 %v6887_v35, %v6174_v59  ;;  %v6342_v4 = vld [vmem:[%s10375_s8 + $0x658] sm:$0xf]  ;;  %v6007_v21 = vor.u32 %v6845_v12, %v6006_v11  ;;  %v6092_v11 = vld [vmem:[%s10375_s8 + $0x47c] sm:$0xf0] }
 0x19a   :  { %2355 = vmatpush.bf16.msrb.mxu1 %v5423_v22  ;;  %v6343_v15 = vor.u32 %v6929_v41, %v6342_v4  ;;  %v5782_v35 = vld [vmem:[%s10375_s8 + $0x1f8] sm:$0xf] }
 0x19b   :  { %v5558_v41 = vld [vmem:[%s10375_s8 + $0x38] sm:$0xf] }
 0x19c   :  { %v5559_v9 = vor.u32 %v6733_v8, %v5558_v41  ;;  %v6751_v41 = vld [vmem:[%s10375_s8 + $0xe4] sm:$0xf] }
 0x19d   :  { %2367 = vmatpush.bf16.msrb.mxu2 %v5443_v48  ;;  %2380 = vmatpush.bf16.msrb.mxu0 %v5447_v17  ;;  %v5866_v48 = vld [vmem:[%s10375_s8 + $0x2a0] sm:$0xf]  ;;  %v6761_v17 = vld [vmem:[%s10375_s8 + $0x130] sm:$0xf0]  ;;  %v6863_v8 = vld [vmem:[%s10375_s8 + $0x464] sm:$0xf] }
 0x19e   :  { %2356 = vmatpush.bf16.msrb.mxu1 %v5407_v44  ;;  %v5671_v10 = vor.u32 %v6761_v17, %v5670_v16  ;;  %v6747_v44 = vld [vmem:[%s10375_s8 + $0xc0] sm:$0xf0]  ;;  %v6894_v16 = vld [vmem:[%s10375_s8 + $0x558] sm:$0xf0]  ;;  %v6828_v17 = vld [vmem:[%s10375_s8 + $0x34c] sm:$0xf] }
 0x1a0   :  { %3822 = vmatpush.bf16.msra.mxu3 %v5671_v10  ;;  %v6400_v10 = vld [vmem:[%s10375_s8 + $0x6e4] sm:$0xf0] }
 0x1a1   :  { %2368 = vmatpush.bf16.msrb.mxu2 %v5427_v26  ;;  %2381 = vmatpush.bf16.msrb.mxu0 %v5431_v31  ;;  %v5867_v26 = vor.u32 %v6810_v14, %v5866_v48  ;;  %v5838_v31 = vld [vmem:[%s10375_s8 + $0x268] sm:$0xf]  ;;  %v6782_v14 = vld [vmem:[%s10375_s8 + $0x1d8] sm:$0xf0] }
 0x1a4   :  { %3823 = vmatpush.bf16.msra.mxu3 %v5643_v38  ;;  %v6933_v38 = vld [vmem:[%s10375_s8 + $0x694] sm:$0xf] }
 0x1a5   :  { %2369 = vmatpush.bf16.msrb.mxu2 %v5411_v53  ;;  %v6062_v53 = vld [vmem:[%s10375_s8 + $0x428] sm:$0xf] }
 0x1a9   :  { %3846 = vmatpush.bf16.msra.mxu2 %v6175_v63  ;;  %v6230_v63 = vld [vmem:[%s10375_s8 + $0x578] sm:$0xf] }
 0x1ad   :  { %3847 = vmatpush.bf16.msra.mxu2 %v6147_v57  ;;  %v5754_v57 = vld [vmem:[%s10375_s8 + $0x1c0] sm:$0xf] }
 0x1b1   :  { %3848 = vmatpush.bf16.msra.mxu2 %v6119_v23  ;;  %v5530_v23 = vld [vmem:[%s10375_s8] sm:$0xf] }
 0x1b9   :  { %v8761_v7 = vpop.f32.mrf.mxu2 }
 0x1ba   :  { %v2056_v43 = vadd.f32 %v8761_v7, %v8748_v42  ;;  %v6831_v42 = vld [vmem:[%s10375_s8 + $0x360] sm:$0xf0]  ;;  %v6398_v7 = vld [vmem:[%s10375_s8 + $0x6c8] sm:$0xf] }
 0x1bb   :  { %v5951_v47 = vor.u32 %v6831_v42, %v5950_v60  ;;  %v6399_v34 = vor.u32 %v6943_v49, %v6398_v7  ;;  %v6287_v60 = vor.u32 %v6915_v36, %v6286_v33  ;;  %v5810_v42 = vld [vmem:[%s10375_s8 + $0x230] sm:$0xf]  ;;  %v6796_v7 = vld [vmem:[%s10375_s8 + $0x248] sm:$0xf0]  ;;  %v6403_v33 = vor.u32 %v6940_v20, %v6400_v10  ;;  %v6821_v36 = vld [vmem:[%s10375_s8 + $0x314] sm:$0xf] }
 0x1bc   :  { %v6908_v49 = vld [vmem:[%s10375_s8 + $0x5c8] sm:$0xf0]  ;;  %v5811_v52 = vor.u32 %v6796_v7, %v5810_v42  ;;  %v6148_v42 = vld [vmem:[%s10375_s8 + $0x4ec] sm:$0xf0]  ;;  %v6793_v20 = vld [vmem:[%s10375_s8 + $0x234] sm:$0xf] }
 0x1bd   :  { %3833 = vmatpush.bf16.msra.mxu1 %v5951_v47  ;;  %v6258_v47 = vld [vmem:[%s10375_s8 + $0x5b0] sm:$0xf] }
 0x1be   :  { %v6259_v59 = vor.u32 %v6908_v49, %v6258_v47  ;;  %v6814_v49 = vld [vmem:[%s10375_s8 + $0x2dc] sm:$0xf] }
 0x1c1   :  { %v2057_v40 = vpop.f32.mrf.mxu2  ;;  %3834 = vmatpush.bf16.msra.mxu1 %v5923_v55  ;;  %v6034_v55 = vld [vmem:[%s10375_s8 + $0x3f0] sm:$0xf] }
 0x1c2   :  { %v6692_v40 = vld [vmem:[%s10373_s6 + $0xc] sm:$0xf]  ;;  %v6035_v4 = vor.u32 %v6852_v58, %v6034_v55  ;;  %v6870_v55 = vld [vmem:[%s10375_s8 + $0x49c] sm:$0xf]  ;;  %v6120_v58 = vld [vmem:[%s10375_s8 + $0x4b4] sm:$0xf0] }
 0x1c3   :  { %v5415_v45 = vor.u32 %v6692_v40, %v5412_v6  ;;  %v5614_v6 = vld [vmem:[%s10375_s8 + $0xa8] sm:$0xf] }
 0x1c4   :  { %v5615_v29 = vor.u32 %v6747_v44, %v5614_v6  ;;  %v5531_v6 = vor.u32 %v6726_v24, %v5530_v23  ;;  %v6744_v24 = vld [vmem:[%s10375_s8 + $0xac] sm:$0xf] }
 0x1c5   :  { %2382 = vmatpush.bf16.msrb.mxu0 %v5415_v45  ;;  %3835 = vmatpush.bf16.msra.mxu1 %v5895_v13  ;;  %v6231_v13 = vor.u32 %v6901_v0, %v6230_v63  ;;  %v6919_v63 = vld [vmem:[%s10375_s8 + $0x624] sm:$0xf]  ;;  %v6316_v0 = vld [vmem:[%s10375_s8 + $0x63c] sm:$0xf0] }
 0x1c6   :  { %3824 = vmatpush.bf16.msra.mxu3 %v5615_v29  ;;  %v6926_v29 = vld [vmem:[%s10375_s8 + $0x65c] sm:$0xf] }
 0x1c9   :  { %v8859_v56 = vpop.f32.mrf.mxu2  ;;  %3859 = vmatpush.bf16.msra.mxu0 %v6399_v34  ;;  %3836 = vmatpush.bf16.msra.mxu1 %v5867_v26  ;;  %v6772_v26 = vld [vmem:[%s10375_s8 + $0x18c] sm:$0xf] }
 0x1ca   :  { %v2108_v22 = vadd.f32 %v8859_v56, %v8750_v1  ;;  %v6866_v1 = vld [vmem:[%s10375_s8 + $0x478] sm:$0xf0] }
 0x1cb   :  { %v6091_v40 = vor.u32 %v6866_v1, %v6090_v28  ;;  %v5755_v28 = vor.u32 %v6782_v14, %v5754_v57  ;;  %v5840_v57 = vld [vmem:[%s10375_s8 + $0x284] sm:$0xf0] }
 0x1cc   :  { %v6288_v14 = vld [vmem:[%s10375_s8 + $0x604] sm:$0xf0] }
 0x1cd   :  { %3860 = vmatpush.bf16.msra.mxu0 %v6371_v61  ;;  %3849 = vmatpush.bf16.msra.mxu2 %v6091_v40  ;;  %v6789_v61 = vld [vmem:[%s10375_s8 + $0x210] sm:$0xf0]  ;;  %v6372_v40 = vld [vmem:[%s10375_s8 + $0x6ac] sm:$0xf0] }
 0x1ce   :  { %v5783_v5 = vor.u32 %v6789_v61, %v5782_v35  ;;  %v6375_v47 = vor.u32 %v6933_v38, %v6372_v40  ;;  %v6807_v61 = vld [vmem:[%s10375_s8 + $0x2a4] sm:$0xf]  ;;  %v6849_v38 = vld [vmem:[%s10375_s8 + $0x3f4] sm:$0xf] }
 0x1d1   :  { %v2109_v25 = vpop.f32.mrf.mxu2  ;;  %3861 = vmatpush.bf16.msra.mxu0 %v6343_v15  ;;  %v6202_v15 = vld [vmem:[%s10375_s8 + $0x540] sm:$0xf] }
 0x1d2   :  { %v6203_v1 = vor.u32 %v6894_v16, %v6202_v15  ;;  %v6095_v16 = vor.u32 %v6863_v8, %v6092_v11  ;;  %v6944_v8 = vld [vmem:[%s10375_s8 + $0x6e8] sm:$0xf0] }
 0x1d5   :  { %3862 = vmatpush.bf16.msra.mxu0 %v6315_v30  ;;  %v6884_v30 = vld [vmem:[%s10375_s8 + $0x50c] sm:$0xf] }
 0x1d7   :  { %v2068_v19 = vpop.f32.mrf.mxu0 }
 0x1d8   :  { %v8950_v46 = vadd.f32 %v2068_v19, %v2056_v43  ;;  %v5839_v43 = vor.u32 %v6803_v32, %v5838_v31  ;;  %v6859_v19 = vld [vmem:[%s10375_s8 + $0x440] sm:$0xf0]  ;;  %v6176_v31 = vld [vmem:[%s10375_s8 + $0x524] sm:$0xf0]  ;;  %v5955_v32 = vor.u32 %v6828_v17, %v5952_v18 }
 0x1d9   :  { %v6063_v34 = vor.u32 %v6859_v19, %v6062_v53  ;;  %3863 = vmatpush.bf16.msra.mxu0 %v6287_v60  ;;  %v6179_v53 = vor.u32 %v6884_v30, %v6176_v31  ;;  %v6765_v19 = vld [vmem:[%s10375_s8 + $0x154] sm:$0xf]  ;;  %v6898_v31 = vld [vmem:[%s10375_s8 + $0x57c] sm:$0xf] }
 0x1da   :  { %2124 = vst [vmem:[#allocation4] sm:$0xff] %v8950_v46  ;;  %3837 = vmatpush.bf16.msra.mxu1 %v5839_v43  ;;  %v6877_v60 = vld [vmem:[%s10375_s8 + $0x4d4] sm:$0xf] }
 0x1db   :  { %3850 = vmatpush.bf16.msra.mxu2 %v6063_v34  ;;  %v6344_v34 = vld [vmem:[%s10375_s8 + $0x674] sm:$0xf0] }
 0x1dc   :  { %v6347_v35 = vor.u32 %v6926_v29, %v6344_v34  ;;  %v6008_v29 = vld [vmem:[%s10375_s8 + $0x3d4] sm:$0xf0] }
 0x1dd   :  { %3864 = vmatpush.bf16.msra.mxu0 %v6259_v59  ;;  %v5899_v59 = vor.u32 %v6814_v49, %v5896_v50  ;;  %v6842_v49 = vld [vmem:[%s10375_s8 + $0x3bc] sm:$0xf] }
 0x1de   :  { %3838 = vmatpush.bf16.msra.mxu1 %v5811_v52  ;;  %v6758_v52 = vld [vmem:[%s10375_s8 + $0x11c] sm:$0xf]  ;;  %v6011_v34 = vor.u32 %v6842_v49, %v6008_v29  ;;  %v6923_v29 = vld [vmem:[%s10375_s8 + $0x640] sm:$0xf0] }
 0x1df   :  { %v2070_v54 = vpop.f32.mrf.mxu0  ;;  %3851 = vmatpush.bf16.msra.mxu2 %v6035_v4  ;;  %v6123_v4 = vor.u32 %v6870_v55, %v6120_v58  ;;  %v5980_v55 = vld [vmem:[%s10375_s8 + $0x39c] sm:$0xf0] }
 0x1e0   :  { %v6740_v54 = vld [vmem:[%s10375_s8 + $0x88] sm:$0xf0] }
 0x1e1   :  { %v5587_v2 = vor.u32 %v6740_v54, %v5586_v39  ;;  %3865 = vmatpush.bf16.msra.mxu0 %v6231_v13  ;;  %v5672_v54 = vld [vmem:[%s10375_s8 + $0x134] sm:$0xf0]  ;;  %v6800_v13 = vld [vmem:[%s10375_s8 + $0x26c] sm:$0xf] }
 0x1e2   :  { %3839 = vmatpush.bf16.msra.mxu1 %v5783_v5  ;;  %v5644_v5 = vld [vmem:[%s10375_s8 + $0xfc] sm:$0xf0]  ;;  %v5843_v17 = vor.u32 %v6800_v13, %v5840_v57 }
 0x1e3   :  { %3825 = vmatpush.bf16.msra.mxu3 %v5587_v2  ;;  %3852 = vmatpush.bf16.msra.mxu2 %v6007_v21  ;;  %v5675_v2 = vor.u32 %v6758_v52, %v5672_v54  ;;  %v5647_v15 = vor.u32 %v6751_v41, %v5644_v5  ;;  %v6905_v21 = vld [vmem:[%s10375_s8 + $0x5b4] sm:$0xf]  ;;  %v6835_v54 = vld [vmem:[%s10375_s8 + $0x384] sm:$0xf]  ;;  %v6406_v5 = vld [vmem:[%s10375_s8 + $0x6d0] sm:$0xf] }
 0x1e4   :  { %v5983_v58 = vor.u32 %v6835_v54, %v5980_v55  ;;  %v6126_v55 = vld [vmem:[%s10375_s8 + $0x4a0] sm:$0xf] }
 0x1e5   :  { %3866 = vmatpush.bf16.msra.mxu0 %v6203_v1  ;;  %v6786_v1 = vld [vmem:[%s10375_s8 + $0x1fc] sm:$0xf] }
 0x1e6   :  { %3840 = vmatpush.bf16.msra.mxu1 %v5755_v28 }
 0x1e7   :  { %v2120_v25 = vpop.f32.mrf.mxu0  ;;  %3826 = vmatpush.bf16.msra.mxu3 %v5559_v9  ;;  %v5812_v9 = vld [vmem:[%s10375_s8 + $0x24c] sm:$0xf0] }
 0x1e8   :  { %v2121_v56 = vadd.f32 %v2120_v25, %v2108_v22  ;;  %v5978_v25 = vld [vmem:[%s10375_s8 + $0x380] sm:$0xf]  ;;  %v5815_v10 = vor.u32 %v6793_v20, %v5812_v9  ;;  %v6378_v20 = vld [vmem:[%s10375_s8 + $0x698] sm:$0xf]  ;;  %v6937_v9 = vld [vmem:[%s10375_s8 + $0x6b0] sm:$0xf0] }
 0x1ea   :  { %2125 = vst [vmem:[#allocation4 + $0x8] sm:$0xff] %v2121_v56  ;;  %v2128_v37 = vmul.f32 0.5, %v2121_v56  ;;  %v5728_v56 = vld [vmem:[%s10375_s8 + $0x1a4] sm:$0xf0] }
 0x1eb   :  { %v5731_v44 = vor.u32 %v6772_v26, %v5728_v56  ;;  %3827 = vmatpush.bf16.msra.mxu3 %v5531_v6  ;;  %v5784_v56 = vld [vmem:[%s10375_s8 + $0x214] sm:$0xf0]  ;;  %v6036_v6 = vld [vmem:[%s10375_s8 + $0x40c] sm:$0xf0] }
 0x1ec   :  { %v2129_v45 = vmul.f32 1.442695, %v2128_v37  ;;  %v5924_v37 = vld [vmem:[%s10375_s8 + $0x32c] sm:$0xf0]  ;;  %v5787_v30 = vor.u32 %v6786_v1, %v5784_v56  ;;  %v6379_v56 = vor.u32 %v6937_v9, %v6378_v20  ;;  %v6748_v20 = vld [vmem:[%s10375_s8 + $0xc8] sm:$0xf0] }
 0x1ed   :  { %v5927_v7 = vor.u32 %v6821_v36, %v5924_v37  ;;  %v6737_v36 = vld [vmem:[%s10375_s8 + $0x74] sm:$0xf]  ;;  %v5588_v37 = vld [vmem:[%s10375_s8 + $0x8c] sm:$0xf0] }
 0x1ee   :  { %6949 = vpow2.f32 %v2129_v45  ;;  %v5700_v45 = vld [vmem:[%s10375_s8 + $0x16c] sm:$0xf0]  ;;  %v5591_v40 = vor.u32 %v6737_v36, %v5588_v37  ;;  %v6350_v36 = vld [vmem:[%s10375_s8 + $0x660] sm:$0xf]  ;;  %v6930_v37 = vld [vmem:[%s10375_s8 + $0x678] sm:$0xf0] }
 0x1ef   :  { %v2122_v51 = vpop.f32.mrf.mxu0  ;;  %v5703_v39 = vor.u32 %v6765_v19, %v5700_v45  ;;  %v6891_v19 = vld [vmem:[%s10375_s8 + $0x544] sm:$0xf] }
 0x1f0   :  { %v6151_v51 = vor.u32 %v6877_v60, %v6148_v42  ;;  %v6204_v60 = vld [vmem:[%s10375_s8 + $0x55c] sm:$0xf0] }
 0x1f1   :  { %v6207_v42 = vor.u32 %v6891_v19, %v6204_v60  ;;  %v6154_v19 = vld [vmem:[%s10375_s8 + $0x4d8] sm:$0xf]  ;;  %v6351_v60 = vor.u32 %v6930_v37, %v6350_v36  ;;  %v6783_v36 = vld [vmem:[%s10375_s8 + $0x1e0] sm:$0xf0]  ;;  %v6210_v37 = vld [vmem:[%s10375_s8 + $0x548] sm:$0xf] }
 0x1f4   :  { %v6950_v3 = vpop.eup %6949 }
 0x1f5   :  { %v2131_v48 = vmul.f32 %v6950_v3, %v2127_v62  ;;  %v5868_v62 = vld [vmem:[%s10375_s8 + $0x2bc] sm:$0xf0]  ;;  %v6319_v3 = vor.u32 %v6919_v63, %v6316_v0 }
 0x1f6   :  { %v5871_v12 = vor.u32 %v6807_v61, %v5868_v62 }
 0x1f7   :  { %v2132_v22 = vadd.f32 %v2131_v48, %v8950_v46  ;;  %v6838_v46 = vld [vmem:[%s10375_s8 + $0x398] sm:$0xf0]  ;;  %v6912_v48 = vld [vmem:[%s10375_s8 + $0x5ec] sm:$0xf] }
 0x1f8   :  { %v5979_v43 = vor.u32 %v6838_v46, %v5978_v25  ;;  %v6291_v18 = vor.u32 %v6912_v48, %v6288_v14  ;;  %v5616_v25 = vld [vmem:[%s10375_s8 + $0xc4] sm:$0xf0]  ;;  %v6856_v46 = vld [vmem:[%s10375_s8 + $0x42c] sm:$0xf]  ;;  %v6407_v14 = vor.u32 %v6944_v8, %v6406_v5 }
 0x1f9   :  { %v2133_v27 = vpack.c.bf16 %v2132_v22, %v2132_v22  ;;  %v6260_v22 = vld [vmem:[%s10375_s8 + $0x5cc] sm:$0xf0]  ;;  %v5619_v26 = vor.u32 %v6744_v24, %v5616_v25  ;;  %v6098_v8 = vld [vmem:[%s10375_s8 + $0x468] sm:$0xf] }
 0x1fa   :  { %3853 = vmatpush.bf16.msra.mxu2 %v5979_v43  ;;  %v6263_v23 = vor.u32 %v6905_v21, %v6260_v22  ;;  %v6039_v43 = vor.u32 %v6849_v38, %v6036_v6  ;;  %v5706_v6 = vld [vmem:[%s10375_s8 + $0x158] sm:$0xf] }
 0x1fb   :  { %2344 = vmatmul.bf16.vlgmr.msrb.gmra.mxu3 %v2133_v27  ;;  %2357 = vmatmul.bf16.vlgmr.msrb.gmra.mxu1 %v2133_v27 }
 0x1fc   :  { %2370 = vmatmul.bf16.vlgmr.msrb.gmra.mxu2 %v2133_v27  ;;  %2383 = vmatmul.bf16.vlgmr.msrb.gmra.mxu0 %v2133_v27  ;;  %v6064_v27 = vld [vmem:[%s10375_s8 + $0x444] sm:$0xf0] }
 0x1fd   :  { %3885 = vmatpush.bf16.msrb.mxu1 %v5955_v32  ;;  %3911 = vmatpush.bf16.msrb.mxu0 %v6403_v33  ;;  %v6067_v28 = vor.u32 %v6856_v46, %v6064_v27  ;;  %v6232_v32 = vld [vmem:[%s10375_s8 + $0x594] sm:$0xf0]  ;;  %v6888_v27 = vld [vmem:[%s10375_s8 + $0x528] sm:$0xf0] }
 0x1fe   :  { %3872 = vmatpush.bf16.msrb.mxu3 %v5731_v44  ;;  %3898 = vmatpush.bf16.msrb.mxu2 %v6179_v53  ;;  %v6235_v33 = vor.u32 %v6898_v31, %v6232_v32  ;;  %v6779_v44 = vld [vmem:[%s10375_s8 + $0x1c4] sm:$0xf]  ;;  %v5756_v53 = vld [vmem:[%s10375_s8 + $0x1dc] sm:$0xf0]  ;;  %v6818_v31 = vld [vmem:[%s10375_s8 + $0x2f8] sm:$0xf0] }
 0x1ff   :  { %v5759_v45 = vor.u32 %v6779_v44, %v5756_v53 }
 0x201   :  { %3886 = vmatpush.bf16.msrb.mxu1 %v5927_v7  ;;  %3912 = vmatpush.bf16.msrb.mxu0 %v6375_v47  ;;  %v6730_v7 = vld [vmem:[%s10375_s8 + $0x3c] sm:$0xf]  ;;  %v5560_v47 = vld [vmem:[%s10375_s8 + $0x54] sm:$0xf0] }
 0x202   :  { %3873 = vmatpush.bf16.msrb.mxu3 %v5703_v39  ;;  %3899 = vmatpush.bf16.msrb.mxu2 %v6151_v51  ;;  %v5563_v50 = vor.u32 %v6730_v7, %v5560_v47  ;;  %v6723_v39 = vld [vmem:[%s10375_s8 + $0x4] sm:$0xf]  ;;  %v5532_v51 = vld [vmem:[%s10375_s8 + $0x1c] sm:$0xf0] }
 0x203   :  { %v5535_v52 = vor.u32 %v6723_v39, %v5532_v51  ;;  %v6811_v7 = vld [vmem:[%s10375_s8 + $0x2c0] sm:$0xf0]  ;;  %v5678_v51 = vld [vmem:[%s10375_s8 + $0x120] sm:$0xf] }
 0x205   :  { %3887 = vmatpush.bf16.msrb.mxu1 %v5899_v59  ;;  %3913 = vmatpush.bf16.msrb.mxu0 %v6347_v35  ;;  %v2166_v59 = vld [vmem:[%s10374_s7] sm:$0xf] }
 0x206   :  { %3874 = vmatpush.bf16.msrb.mxu3 %v5675_v2  ;;  %3900 = vmatpush.bf16.msrb.mxu2 %v6123_v4  ;;  %v2169_v35 = vperm.slane %v2166_v59, 1  ;;  %v2171_v61 = vperm.slane %v2166_v59, 3  ;;  %v5958_v2 = vld [vmem:[%s10375_s8 + $0x350] sm:$0xf]  ;;  %v6832_v4 = vld [vmem:[%s10375_s8 + $0x368] sm:$0xf0] }
 0x207   :  { %v2170_v13 = vperm.slane %v2166_v59, 2  ;;  %v5959_v57 = vor.u32 %v6832_v4, %v5958_v2  ;;  %v5650_v4 = vld [vmem:[%s10375_s8 + $0xe8] sm:$0xf] }
 0x209   :  { %3888 = vmatpush.bf16.msrb.mxu1 %v5871_v12  ;;  %3914 = vmatpush.bf16.msrb.mxu0 %v6319_v3  ;;  %v2168_v12 = vperm.slane %v2166_v59, 0 }
 0x20a   :  { %3875 = vmatpush.bf16.msrb.mxu3 %v5647_v15  ;;  %3901 = vmatpush.bf16.msrb.mxu2 %v6095_v16  ;;  %v5930_v15 = vld [vmem:[%s10375_s8 + $0x318] sm:$0xf]  ;;  %v6825_v16 = vld [vmem:[%s10375_s8 + $0x330] sm:$0xf0] }
 0x20b   :  { %v5931_v46 = vor.u32 %v6825_v16, %v5930_v15  ;;  %v6909_v15 = vld [vmem:[%s10375_s8 + $0x5d0] sm:$0xf0] }
 0x20d   :  { %3889 = vmatpush.bf16.msrb.mxu1 %v5843_v17  ;;  %3915 = vmatpush.bf16.msrb.mxu0 %v6291_v18 }
 0x20e   :  { %3876 = vmatpush.bf16.msrb.mxu3 %v5619_v26  ;;  %3902 = vmatpush.bf16.msrb.mxu2 %v6067_v28  ;;  %v6182_v26 = vld [vmem:[%s10375_s8 + $0x510] sm:$0xf] }
 0x211   :  { %3890 = vmatpush.bf16.msrb.mxu1 %v5815_v10  ;;  %3916 = vmatpush.bf16.msrb.mxu0 %v6263_v23  ;;  %v5734_v10 = vld [vmem:[%s10375_s8 + $0x190] sm:$0xf]  ;;  %v6776_v23 = vld [vmem:[%s10375_s8 + $0x1a8] sm:$0xf0] }
 0x212   :  { %3877 = vmatpush.bf16.msrb.mxu3 %v5591_v40  ;;  %3903 = vmatpush.bf16.msrb.mxu2 %v6039_v43  ;;  %v6183_v40 = vor.u32 %v6888_v27, %v6182_v26  ;;  %v6769_v43 = vld [vmem:[%s10375_s8 + $0x170] sm:$0xf0]  ;;  %v6902_v26 = vld [vmem:[%s10375_s8 + $0x598] sm:$0xf0] }
 0x213   :  { %v5707_v49 = vor.u32 %v6769_v43, %v5706_v6  ;;  %v6829_v43 = vld [vmem:[%s10375_s8 + $0x354] sm:$0xf] }
 0x215   :  { %3891 = vmatpush.bf16.msrb.mxu1 %v5787_v30  ;;  %3917 = vmatpush.bf16.msrb.mxu0 %v6235_v33  ;;  %v5902_v30 = vld [vmem:[%s10375_s8 + $0x2e0] sm:$0xf]  ;;  %v5735_v33 = vor.u32 %v6776_v23, %v5734_v10 }
 0x216   :  { %3878 = vmatpush.bf16.msrb.mxu3 %v5563_v50  ;;  %3904 = vmatpush.bf16.msrb.mxu2 %v6011_v34  ;;  %v5903_v53 = vor.u32 %v6818_v31, %v5902_v30  ;;  %v6322_v50 = vld [vmem:[%s10375_s8 + $0x628] sm:$0xf]  ;;  %v5790_v23 = vld [vmem:[%s10375_s8 + $0x200] sm:$0xf]  ;;  %v6042_v30 = vld [vmem:[%s10375_s8 + $0x3f8] sm:$0xf] }
 0x217   :  { %v6323_v59 = vor.u32 %v6923_v29, %v6322_v50  ;;  %v6853_v31 = vld [vmem:[%s10375_s8 + $0x410] sm:$0xf0]  ;;  %v6846_v50 = vld [vmem:[%s10375_s8 + $0x3d8] sm:$0xf0] }
 0x219   :  { %3892 = vmatpush.bf16.msrb.mxu1 %v5759_v45  ;;  %3918 = vmatpush.bf16.msrb.mxu0 %v6207_v42  ;;  %v6881_v45 = vld [vmem:[%s10375_s8 + $0x4f0] sm:$0xf0]  ;;  %v5874_v42 = vld [vmem:[%s10375_s8 + $0x2a8] sm:$0xf] }
 0x21a   :  { %3879 = vmatpush.bf16.msrb.mxu3 %v5535_v52  ;;  %3905 = vmatpush.bf16.msrb.mxu2 %v5983_v58  ;;  %v6155_v39 = vor.u32 %v6881_v45, %v6154_v19  ;;  %v6762_v52 = vld [vmem:[%s10375_s8 + $0x138] sm:$0xf0]  ;;  %v5875_v54 = vor.u32 %v6811_v7, %v5874_v42  ;;  %v6941_v19 = vld [vmem:[%s10375_s8 + $0x6d4] sm:$0xf]  ;;  %v6043_v45 = vor.u32 %v6853_v31, %v6042_v30  ;;  %v5566_v42 = vld [vmem:[%s10375_s8 + $0x40] sm:$0xf] }
 0x21b   :  { %v6874_v58 = vld [vmem:[%s10375_s8 + $0x4b8] sm:$0xf0]  ;;  %v6871_v30 = vld [vmem:[%s10375_s8 + $0x4a4] sm:$0xf]  ;;  %v6128_v31 = vld [vmem:[%s10375_s8 + $0x4bc] sm:$0xf0] }
 0x21c   :  { %v6127_v2 = vor.u32 %v6874_v58, %v6126_v55  ;;  %v6734_v7 = vld [vmem:[%s10375_s8 + $0x58] sm:$0xf0]  ;;  %v6380_v58 = vld [vmem:[%s10375_s8 + $0x6b4] sm:$0xf0] }
 0x21d   :  { %v6934_v55 = vld [vmem:[%s10375_s8 + $0x69c] sm:$0xf] }
 0x278   :  { %v2358_v62 = vpop.f32.mrf.mxu1 }
 0x279   :  { %v2359_v63 = vadd.f32 %v2358_v62, %v2169_v35  ;;  %v2384_v0 = vpop.f32.mrf.mxu0  ;;  %v5846_v35 = vld [vmem:[%s10375_s8 + $0x270] sm:$0xf]  ;;  %v5679_v62 = vor.u32 %v6762_v52, %v5678_v51  ;;  %v5567_v52 = vor.u32 %v6734_v7, %v5566_v42  ;;  %v6100_v42 = vld [vmem:[%s10375_s8 + $0x484] sm:$0xf0] }
 0x27a   :  { %v2385_v41 = vadd.f32 %v2384_v0, %v2171_v61  ;;  %v6804_v61 = vld [vmem:[%s10375_s8 + $0x288] sm:$0xf0] }
 0x27b   :  { %v2389_v11 = vmax.f32 %v2359_v63, 0.0  ;;  %v6294_v63 = vld [vmem:[%s10375_s8 + $0x5f0] sm:$0xf]  ;;  %v6916_v0 = vld [vmem:[%s10375_s8 + $0x608] sm:$0xf0]  ;;  %v5847_v5 = vor.u32 %v6804_v61, %v5846_v35 }
 0x27c   :  { %v2391_v3 = vmax.f32 %v2385_v41, 0.0  ;;  %v6755_v41 = vld [vmem:[%s10375_s8 + $0x100] sm:$0xf0]  ;;  %v5538_v35 = vld [vmem:[%s10375_s8 + $0x8] sm:$0xf] }
 0x27d   :  { %v9358_v48 = vpack.c.bf16 %v2389_v11, %v2389_v11  ;;  %v6867_v11 = vld [vmem:[%s10375_s8 + $0x480] sm:$0xf0] }
 0x27e   :  { %v9366_v17 = vpack.c.bf16 %v2391_v3, %v2391_v3  ;;  %v2345_v18 = vpop.f32.mrf.mxu3  ;;  %v5818_v3 = vld [vmem:[%s10375_s8 + $0x238] sm:$0xf]  ;;  %v6099_v16 = vor.u32 %v6867_v11, %v6098_v8  ;;  %v6727_v61 = vld [vmem:[%s10375_s8 + $0x20] sm:$0xf0]  ;;  %v6383_v8 = vor.u32 %v6934_v55, %v6380_v58  ;;  %v6857_v55 = vld [vmem:[%s10375_s8 + $0x434] sm:$0xf] }
 0x27f   :  { %v2346_v21 = vadd.f32 %v2345_v18, %v2168_v12  ;;  %v2371_v22 = vpop.f32.mrf.mxu2  ;;  %3841 = vmatmul.bf16.vlgmr.msra.gmra.mxu1 %v9358_v48  ;;  %v6295_v12 = vor.u32 %v6916_v0, %v6294_v63  ;;  %v5622_v18 = vld [vmem:[%s10375_s8 + $0xb0] sm:$0xf]  ;;  %v6839_v63 = vld [vmem:[%s10375_s8 + $0x3a0] sm:$0xf0]  ;;  %v6773_v0 = vld [vmem:[%s10375_s8 + $0x194] sm:$0xf]  ;;  %v5539_v11 = vor.u32 %v6727_v61, %v5538_v35 }
 0x280   :  { %v2372_v24 = vadd.f32 %v2371_v22, %v2170_v13  ;;  %3867 = vmatmul.bf16.vlgmr.msra.gmra.mxu0 %v9366_v17  ;;  %3937 = vmatpush.bf16.msra.mxu1 %v5959_v57  ;;  %v2360_v25 = vpop.f32.mrf.mxu1  ;;  %v6797_v13 = vld [vmem:[%s10375_s8 + $0x250] sm:$0xf0]  ;;  %v5651_v57 = vor.u32 %v6755_v41, %v5650_v4  ;;  %v6860_v22 = vld [vmem:[%s10375_s8 + $0x448] sm:$0xf0]  ;;  %v6072_v58 = vld [vmem:[%s10375_s8 + $0x44c] sm:$0xf0] }
 0x281   :  { %v2388_v28 = vmax.f32 %v2346_v21, 0.0  ;;  %3963 = vmatpush.bf16.msra.mxu0 %v6407_v14  ;;  %v2386_v1 = vpop.f32.mrf.mxu0  ;;  %v6266_v14 = vld [vmem:[%s10375_s8 + $0x5b8] sm:$0xf]  ;;  %v5819_v9 = vor.u32 %v6797_v13, %v5818_v3  ;;  %v6070_v21 = vld [vmem:[%s10375_s8 + $0x430] sm:$0xf]  ;;  %v5623_v25 = vor.u32 %v6748_v20, %v5622_v18 }
 0x282   :  { %v2390_v32 = vmax.f32 %v2372_v24, 0.0  ;;  %v6267_v10 = vor.u32 %v6909_v15, %v6266_v14  ;;  %v6790_v24 = vld [vmem:[%s10375_s8 + $0x218] sm:$0xf0]  ;;  %v6071_v27 = vor.u32 %v6860_v22, %v6070_v21  ;;  %v6741_v1 = vld [vmem:[%s10375_s8 + $0x90] sm:$0xf0] }
 0x283   :  { %v9400_v38 = vpack.c.bf16 %v2388_v28, %v2388_v28  ;;  %v5594_v28 = vld [vmem:[%s10375_s8 + $0x78] sm:$0xf]  ;;  %v6885_v41 = vld [vmem:[%s10375_s8 + $0x514] sm:$0xf]  ;;  %v5904_v3 = vld [vmem:[%s10375_s8 + $0x2fc] sm:$0xf0] }
 0x284   :  { %v9408_v44 = vpack.c.bf16 %v2390_v32, %v2390_v32  ;;  %3938 = vmatpush.bf16.msra.mxu1 %v5931_v46  ;;  %v6238_v46 = vld [vmem:[%s10375_s8 + $0x580] sm:$0xf]  ;;  %v5762_v32 = vld [vmem:[%s10375_s8 + $0x1c8] sm:$0xf]  ;;  %v5595_v6 = vor.u32 %v6741_v1, %v5594_v28  ;;  %v6927_v14 = vld [vmem:[%s10375_s8 + $0x664] sm:$0xf] }
 0x285   :  { %3964 = vmatpush.bf16.msra.mxu0 %v6379_v56  ;;  %3828 = vmatmul.bf16.vlgmr.msra.gmra.mxu3 %v9400_v38  ;;  %v5791_v56 = vor.u32 %v6790_v24, %v5790_v23  ;;  %v6352_v15 = vld [vmem:[%s10375_s8 + $0x67c] sm:$0xf0]  ;;  %v6766_v18 = vld [vmem:[%s10375_s8 + $0x15c] sm:$0xf]  ;;  %v5708_v20 = vld [vmem:[%s10375_s8 + $0x174] sm:$0xf0] }
 0x286   :  { %3854 = vmatmul.bf16.vlgmr.msra.gmra.mxu2 %v9408_v44  ;;  %3924 = vmatpush.bf16.msra.mxu3 %v5735_v33  ;;  %v2347_v47 = vpop.f32.mrf.mxu3  ;;  %v6239_v33 = vor.u32 %v6902_v26, %v6238_v46  ;;  %v6878_v21 = vld [vmem:[%s10375_s8 + $0x4dc] sm:$0xf]  ;;  %v6156_v22 = vld [vmem:[%s10375_s8 + $0x4f4] sm:$0xf0]  ;;  %v6808_v23 = vld [vmem:[%s10375_s8 + $0x2ac] sm:$0xf] }
 0x287   :  { %3950 = vmatpush.bf16.msra.mxu2 %v6183_v40  ;;  %v2373_v34 = vpop.f32.mrf.mxu2  ;;  %v6895_v40 = vld [vmem:[%s10375_s8 + $0x560] sm:$0xf0]  ;;  %v5763_v47 = vor.u32 %v6783_v36, %v5762_v32  ;;  %v5876_v24 = vld [vmem:[%s10375_s8 + $0x2c4] sm:$0xf0]  ;;  %v6920_v46 = vld [vmem:[%s10375_s8 + $0x62c] sm:$0xf] }
 0x288   :  { %3939 = vmatpush.bf16.msra.mxu1 %v5903_v53  ;;  %v5960_v53 = vld [vmem:[%s10375_s8 + $0x36c] sm:$0xf0]  ;;  %v6211_v29 = vor.u32 %v6895_v40, %v6210_v37  ;;  %v6324_v26 = vld [vmem:[%s10375_s8 + $0x644] sm:$0xf0]  ;;  %v6759_v28 = vld [vmem:[%s10375_s8 + $0x124] sm:$0xf] }
 0x289   :  { %3965 = vmatpush.bf16.msra.mxu0 %v6351_v60  ;;  %v6408_v60 = vld [vmem:[%s10375_s8 + $0x6ec] sm:$0xf0]  ;;  %v5963_v34 = vor.u32 %v6829_v43, %v5960_v53  ;;  %v5680_v1 = vld [vmem:[%s10375_s8 + $0x13c] sm:$0xf0]  ;;  %v6327_v32 = vor.u32 %v6920_v46, %v6324_v26  ;;  %v6913_v40 = vld [vmem:[%s10375_s8 + $0x5f4] sm:$0xf]  ;;  %v6131_v43 = vor.u32 %v6871_v30, %v6128_v31 }
 0x28a   :  { %3925 = vmatpush.bf16.msra.mxu3 %v5707_v49  ;;  %v6014_v49 = vld [vmem:[%s10375_s8 + $0x3c0] sm:$0xf]  ;;  %v6411_v51 = vor.u32 %v6941_v19, %v6408_v60  ;;  %v5848_v36 = vld [vmem:[%s10375_s8 + $0x28c] sm:$0xf0]  ;;  %v5683_v37 = vor.u32 %v6759_v28, %v5680_v1  ;;  %v6752_v53 = vld [vmem:[%s10375_s8 + $0xec] sm:$0xf] }
 0x28b   :  { %3951 = vmatpush.bf16.msra.mxu2 %v6155_v39  ;;  %v6822_v39 = vld [vmem:[%s10375_s8 + $0x31c] sm:$0xf]  ;;  %v5652_v19 = vld [vmem:[%s10375_s8 + $0x104] sm:$0xf0]  ;;  %v6864_v60 = vld [vmem:[%s10375_s8 + $0x46c] sm:$0xf] }
 0x28c   :  { %3940 = vmatpush.bf16.msra.mxu1 %v5875_v54  ;;  %v5932_v54 = vld [vmem:[%s10375_s8 + $0x334] sm:$0xf0]  ;;  %v6787_v35 = vld [vmem:[%s10375_s8 + $0x204] sm:$0xf]  ;;  %v5792_v61 = vld [vmem:[%s10375_s8 + $0x21c] sm:$0xf0] }
 0x28d   :  { %3966 = vmatpush.bf16.msra.mxu0 %v6323_v59  ;;  %v6015_v59 = vor.u32 %v6846_v50, %v6014_v49  ;;  %v5935_v4 = vor.u32 %v6822_v39, %v5932_v54  ;;  %v5820_v49 = vld [vmem:[%s10375_s8 + $0x254] sm:$0xf0]  ;;  %v5655_v50 = vor.u32 %v6752_v53, %v5652_v19  ;;  %v6103_v39 = vor.u32 %v6864_v60, %v6100_v42  ;;  %v6386_v30 = vld [vmem:[%s10375_s8 + $0x6a0] sm:$0xf]  ;;  %v6938_v31 = vld [vmem:[%s10375_s8 + $0x6b8] sm:$0xf0] }
 0x28e   :  { %3926 = vmatpush.bf16.msra.mxu3 %v5679_v62  ;;  %v5986_v62 = vld [vmem:[%s10375_s8 + $0x388] sm:$0xf]  ;;  %v6190_v19 = vld [vmem:[%s10375_s8 + $0x518] sm:$0xf]  ;;  %v6387_v60 = vor.u32 %v6938_v31, %v6386_v30  ;;  %v6861_v31 = vld [vmem:[%s10375_s8 + $0x450] sm:$0xf0] }
 0x28f   :  { %3952 = vmatpush.bf16.msra.mxu2 %v6127_v2  ;;  %3893 = vmatmul.bf16.vlgmr.msrb.gmra.mxu1 %v9358_v48  ;;  %v5736_v2 = vld [vmem:[%s10375_s8 + $0x1ac] sm:$0xf0]  ;;  %v5987_v13 = vor.u32 %v6839_v63, %v5986_v62  ;;  %v6899_v63 = vld [vmem:[%s10375_s8 + $0x584] sm:$0xf]  ;;  %v6078_v30 = vld [vmem:[%s10375_s8 + $0x438] sm:$0xf] }
 0x290   :  { %3919 = vmatmul.bf16.vlgmr.msrb.gmra.mxu0 %v9366_v17  ;;  %3941 = vmatpush.bf16.msra.mxu1 %v5847_v5  ;;  %v6184_v5 = vld [vmem:[%s10375_s8 + $0x52c] sm:$0xf0] }
 0x291   :  { %3967 = vmatpush.bf16.msra.mxu0 %v6295_v12  ;;  %v6815_v12 = vld [vmem:[%s10375_s8 + $0x2e4] sm:$0xf] }
 0x292   :  { %3927 = vmatpush.bf16.msra.mxu3 %v5651_v57  ;;  %v5739_v57 = vor.u32 %v6773_v0, %v5736_v2  ;;  %v6240_v0 = vld [vmem:[%s10375_s8 + $0x59c] sm:$0xf0]  ;;  %v6075_v2 = vor.u32 %v6857_v55, %v6072_v58  ;;  %v6882_v58 = vld [vmem:[%s10375_s8 + $0x4f8] sm:$0xf0] }
 0x293   :  { %3953 = vmatpush.bf16.msra.mxu2 %v6099_v16  ;;  %v6187_v16 = vor.u32 %v6885_v41, %v6184_v5  ;;  %v5596_v41 = vld [vmem:[%s10375_s8 + $0x94] sm:$0xf0]  ;;  %v5795_v5 = vor.u32 %v6787_v35, %v5792_v61  ;;  %v6162_v55 = vld [vmem:[%s10375_s8 + $0x4e0] sm:$0xf]  ;;  %v5882_v35 = vld [vmem:[%s10375_s8 + $0x2b0] sm:$0xf] }
 0x294   :  { %3942 = vmatpush.bf16.msra.mxu1 %v5819_v9  ;;  %v5907_v9 = vor.u32 %v6815_v12, %v5904_v3  ;;  %v6780_v12 = vld [vmem:[%s10375_s8 + $0x1cc] sm:$0xf]  ;;  %v6243_v3 = vor.u32 %v6899_v63, %v6240_v0  ;;  %v6330_v63 = vld [vmem:[%s10375_s8 + $0x630] sm:$0xf] }
 0x295   :  { %3968 = vmatpush.bf16.msra.mxu0 %v6267_v10  ;;  %3880 = vmatmul.bf16.vlgmr.msrb.gmra.mxu3 %v9400_v38  ;;  %v6355_v10 = vor.u32 %v6927_v14, %v6352_v15  ;;  %v6212_v14 = vld [vmem:[%s10375_s8 + $0x564] sm:$0xf0]  ;;  %v6812_v61 = vld [vmem:[%s10375_s8 + $0x2c8] sm:$0xf0] }
 0x296   :  { %3906 = vmatmul.bf16.vlgmr.msrb.gmra.mxu2 %v9408_v44  ;;  %3928 = vmatpush.bf16.msra.mxu3 %v5623_v25  ;;  %v5711_v25 = vor.u32 %v6766_v18, %v5708_v20  ;;  %v6833_v18 = vld [vmem:[%s10375_s8 + $0x370] sm:$0xf0]  ;;  %v6414_v20 = vld [vmem:[%s10375_s8 + $0x6d8] sm:$0xf]  ;;  %v6924_v0 = vld [vmem:[%s10375_s8 + $0x648] sm:$0xf0] }
 0x297   :  { %3954 = vmatpush.bf16.msra.mxu2 %v6071_v27  ;;  %v6159_v27 = vor.u32 %v6878_v21, %v6156_v22  ;;  %v6945_v21 = vld [vmem:[%s10375_s8 + $0x6f0] sm:$0xf0]  ;;  %v6731_v22 = vld [vmem:[%s10375_s8 + $0x44] sm:$0xf] }
 0x298   :  { %3943 = vmatpush.bf16.msra.mxu1 %v5791_v56  ;;  %v5879_v56 = vor.u32 %v6808_v23, %v5876_v24  ;;  %v6843_v24 = vld [vmem:[%s10375_s8 + $0x3c4] sm:$0xf]  ;;  %v6415_v28 = vor.u32 %v6945_v21, %v6414_v20  ;;  %v6756_v20 = vld [vmem:[%s10375_s8 + $0x108] sm:$0xf0]  ;;  %v6106_v21 = vld [vmem:[%s10375_s8 + $0x470] sm:$0xf] }
 0x299   :  { %3969 = vmatpush.bf16.msra.mxu0 %v6239_v33  ;;  %v6801_v33 = vld [vmem:[%s10375_s8 + $0x274] sm:$0xf] }
 0x29a   :  { %3929 = vmatpush.bf16.msra.mxu3 %v5595_v6  ;;  %v6296_v6 = vld [vmem:[%s10375_s8 + $0x60c] sm:$0xf0] }
 0x29b   :  { %3955 = vmatpush.bf16.msra.mxu2 %v6043_v45  ;;  %v5851_v45 = vor.u32 %v6801_v33, %v5848_v36  ;;  %v6299_v7 = vor.u32 %v6913_v40, %v6296_v6  ;;  %v6724_v33 = vld [vmem:[%s10375_s8 + $0xc] sm:$0xf]  ;;  %v5540_v36 = vld [vmem:[%s10375_s8 + $0x24] sm:$0xf0]  ;;  %v5742_v6 = vld [vmem:[%s10375_s8 + $0x198] sm:$0xf] }
 0x29c   :  { %3944 = vmatpush.bf16.msra.mxu1 %v5763_v47  ;;  %v6794_v47 = vld [vmem:[%s10375_s8 + $0x23c] sm:$0xf]  ;;  %v5988_v40 = vld [vmem:[%s10375_s8 + $0x3a4] sm:$0xf0]  ;;  %v5543_v42 = vor.u32 %v6724_v33, %v5540_v36  ;;  %v6791_v36 = vld [vmem:[%s10375_s8 + $0x220] sm:$0xf0] }
 0x29d   :  { %3970 = vmatpush.bf16.msra.mxu0 %v6211_v29  ;;  %v6906_v29 = vld [vmem:[%s10375_s8 + $0x5bc] sm:$0xf]  ;;  %v5823_v54 = vor.u32 %v6794_v47, %v5820_v49  ;;  %v6819_v47 = vld [vmem:[%s10375_s8 + $0x300] sm:$0xf0]  ;;  %v5798_v33 = vld [vmem:[%s10375_s8 + $0x208] sm:$0xf] }
 0x29e   :  { %3930 = vmatpush.bf16.msra.mxu3 %v5567_v52  ;;  %v5624_v52 = vld [vmem:[%s10375_s8 + $0xcc] sm:$0xf0] }
 0x29f   :  { %3956 = vmatpush.bf16.msra.mxu2 %v6015_v59  ;;  %3945 = vmatmul.bf16.vlgmr.msra.gmra.mxu1 %v9358_v48 }
 0x2a0   :  { %3989 = vmatpush.bf16.msrb.mxu1 %v5963_v34  ;;  %3971 = vmatmul.bf16.vlgmr.msra.gmra.mxu0 %v9366_v17  ;;  %v6268_v34 = vld [vmem:[%s10375_s8 + $0x5d4] sm:$0xf0] }
 0x2a1   :  { %4015 = vmatpush.bf16.msrb.mxu0 %v6411_v51  ;;  %v6745_v51 = vld [vmem:[%s10375_s8 + $0xb4] sm:$0xf]  ;;  %v6271_v59 = vor.u32 %v6906_v29, %v6268_v34  ;;  %v6358_v29 = vld [vmem:[%s10375_s8 + $0x668] sm:$0xf]  ;;  %v6931_v34 = vld [vmem:[%s10375_s8 + $0x680] sm:$0xf0] }
 0x2a2   :  { %3931 = vmatpush.bf16.msra.mxu3 %v5539_v11  ;;  %v5627_v62 = vor.u32 %v6745_v51, %v5624_v52  ;;  %v6044_v11 = vld [vmem:[%s10375_s8 + $0x414] sm:$0xf0]  ;;  %v5714_v51 = vld [vmem:[%s10375_s8 + $0x160] sm:$0xf]  ;;  %v6770_v52 = vld [vmem:[%s10375_s8 + $0x178] sm:$0xf0] }
 0x2a3   :  { %3957 = vmatpush.bf16.msra.mxu2 %v5987_v13  ;;  %v5764_v13 = vld [vmem:[%s10375_s8 + $0x1e4] sm:$0xf0] }
 0x2a4   :  { %3990 = vmatpush.bf16.msrb.mxu1 %v5935_v4  ;;  %v6738_v4 = vld [vmem:[%s10375_s8 + $0x7c] sm:$0xf]  ;;  %v5767_v23 = vor.u32 %v6780_v12, %v5764_v13  ;;  %v6331_v12 = vor.u32 %v6924_v0, %v6330_v63  ;;  %v6805_v13 = vld [vmem:[%s10375_s8 + $0x290] sm:$0xf0] }
 0x2a5   :  { %4016 = vmatpush.bf16.msrb.mxu0 %v6383_v8  ;;  %3932 = vmatmul.bf16.vlgmr.msra.gmra.mxu3 %v9400_v38  ;;  %v6850_v8 = vld [vmem:[%s10375_s8 + $0x3fc] sm:$0xf]  ;;  %v5599_v15 = vor.u32 %v6738_v4, %v5596_v41  ;;  %v5686_v4 = vld [vmem:[%s10375_s8 + $0x128] sm:$0xf]  ;;  %v6763_v41 = vld [vmem:[%s10375_s8 + $0x140] sm:$0xf0] }
 0x2a6   :  { %3976 = vmatpush.bf16.msrb.mxu3 %v5739_v57  ;;  %3958 = vmatmul.bf16.vlgmr.msra.gmra.mxu2 %v9408_v44  ;;  %v6892_v57 = vld [vmem:[%s10375_s8 + $0x54c] sm:$0xf] }
 0x2a7   :  { %4002 = vmatpush.bf16.msrb.mxu2 %v6187_v16  ;;  %v5966_v16 = vld [vmem:[%s10375_s8 + $0x358] sm:$0xf]  ;;  %v6215_v46 = vor.u32 %v6892_v57, %v6212_v14  ;;  %v5687_v57 = vor.u32 %v6763_v41, %v5686_v4 }
 0x2a8   :  { %3991 = vmatpush.bf16.msrb.mxu1 %v5907_v9  ;;  %v6047_v9 = vor.u32 %v6850_v8, %v6044_v11  ;;  %v5967_v26 = vor.u32 %v6833_v18, %v5966_v16  ;;  %v6134_v8 = vld [vmem:[%s10375_s8 + $0x4a8] sm:$0xf]  ;;  %v6875_v11 = vld [vmem:[%s10375_s8 + $0x4c0] sm:$0xf0]  ;;  %v6302_v14 = vld [vmem:[%s10375_s8 + $0x5f8] sm:$0xf] }
 0x2a9   :  { %4017 = vmatpush.bf16.msrb.mxu0 %v6355_v10  ;;  %v5568_v10 = vld [vmem:[%s10375_s8 + $0x5c] sm:$0xf0]  ;;  %v6135_v16 = vor.u32 %v6875_v11, %v6134_v8  ;;  %v5658_v18 = vld [vmem:[%s10375_s8 + $0xf0] sm:$0xf]  ;;  %v6935_v8 = vld [vmem:[%s10375_s8 + $0x6a4] sm:$0xf] }
 0x2aa   :  { %3977 = vmatpush.bf16.msrb.mxu3 %v5711_v25  ;;  %v6016_v25 = vld [vmem:[%s10375_s8 + $0x3dc] sm:$0xf0]  ;;  %v5571_v1 = vor.u32 %v6731_v22, %v5568_v10  ;;  %v6868_v22 = vld [vmem:[%s10375_s8 + $0x488] sm:$0xf0] }
 0x2ab   :  { %4003 = vmatpush.bf16.msrb.mxu2 %v6159_v27  ;;  %v5938_v27 = vld [vmem:[%s10375_s8 + $0x320] sm:$0xf] }
 0x2ac   :  { %3992 = vmatpush.bf16.msrb.mxu1 %v5879_v56  ;;  %v6826_v56 = vld [vmem:[%s10375_s8 + $0x338] sm:$0xf0]  ;;  %v6388_v11 = vld [vmem:[%s10375_s8 + $0x6bc] sm:$0xf0] }
 0x2ad   :  { %4018 = vmatpush.bf16.msrb.mxu0 %v6327_v32  ;;  %v6019_v32 = vor.u32 %v6843_v24, %v6016_v25  ;;  %v5939_v53 = vor.u32 %v6826_v56, %v5938_v27  ;;  %v6798_v24 = vld [vmem:[%s10375_s8 + $0x258] sm:$0xf0]  ;;  %v5659_v25 = vor.u32 %v6756_v20, %v5658_v18  ;;  %v6107_v27 = vor.u32 %v6868_v22, %v6106_v21 }
 0x2ae   :  { %3978 = vmatpush.bf16.msrb.mxu3 %v5683_v37  ;;  %v6836_v37 = vld [vmem:[%s10375_s8 + $0x38c] sm:$0xf]  ;;  %v6886_v20 = vld [vmem:[%s10375_s8 + $0x51c] sm:$0xf]  ;;  %v6391_v21 = vor.u32 %v6935_v8, %v6388_v11  ;;  %v6080_v11 = vld [vmem:[%s10375_s8 + $0x454] sm:$0xf0] }
 0x2af   :  { %4004 = vmatpush.bf16.msrb.mxu2 %v6131_v43  ;;  %v6777_v43 = vld [vmem:[%s10375_s8 + $0x1b0] sm:$0xf0]  ;;  %v5991_v49 = vor.u32 %v6836_v37, %v5988_v40  ;;  %v6246_v40 = vld [vmem:[%s10375_s8 + $0x588] sm:$0xf]  ;;  %v6858_v8 = vld [vmem:[%s10375_s8 + $0x43c] sm:$0xf] }
 0x2b0   :  { %3993 = vmatpush.bf16.msrb.mxu1 %v5851_v45  ;;  %v6889_v45 = vld [vmem:[%s10375_s8 + $0x530] sm:$0xf0] }
 0x2b1   :  { %4019 = vmatpush.bf16.msrb.mxu0 %v6299_v7  ;;  %v5910_v7 = vld [vmem:[%s10375_s8 + $0x2e8] sm:$0xf] }
 0x2b2   :  { %3979 = vmatpush.bf16.msrb.mxu3 %v5655_v50  ;;  %v5743_v50 = vor.u32 %v6777_v43, %v5742_v6  ;;  %v6903_v6 = vld [vmem:[%s10375_s8 + $0x5a0] sm:$0xf0]  ;;  %v6079_v43 = vor.u32 %v6861_v31, %v6078_v30  ;;  %v6164_v31 = vld [vmem:[%s10375_s8 + $0x4fc] sm:$0xf0] }
 0x2b3   :  { %4005 = vmatpush.bf16.msrb.mxu2 %v6103_v39  ;;  %v6191_v39 = vor.u32 %v6889_v45, %v6190_v19  ;;  %v6742_v19 = vld [vmem:[%s10375_s8 + $0x98] sm:$0xf0]  ;;  %v5799_v45 = vor.u32 %v6791_v36, %v5798_v33  ;;  %v6879_v30 = vld [vmem:[%s10375_s8 + $0x4e4] sm:$0xf]  ;;  %v6809_v33 = vld [vmem:[%s10375_s8 + $0x2b4] sm:$0xf] }
 0x2b4   :  { %3994 = vmatpush.bf16.msrb.mxu1 %v5823_v54  ;;  %v5911_v54 = vor.u32 %v6819_v47, %v5910_v7  ;;  %v5770_v7 = vld [vmem:[%s10375_s8 + $0x1d0] sm:$0xf]  ;;  %v6247_v47 = vor.u32 %v6903_v6, %v6246_v40  ;;  %v6921_v40 = vld [vmem:[%s10375_s8 + $0x634] sm:$0xf] }
 0x2b5   :  { %4020 = vmatpush.bf16.msrb.mxu0 %v6271_v59  ;;  %v6359_v59 = vor.u32 %v6931_v34, %v6358_v29  ;;  %v6896_v29 = vld [vmem:[%s10375_s8 + $0x568] sm:$0xf0]  ;;  %v5884_v36 = vld [vmem:[%s10375_s8 + $0x2cc] sm:$0xf0] }
 0x2b6   :  { %3980 = vmatpush.bf16.msrb.mxu3 %v5627_v62  ;;  %v5715_v62 = vor.u32 %v6770_v52, %v5714_v51  ;;  %v5968_v51 = vld [vmem:[%s10375_s8 + $0x374] sm:$0xf0]  ;;  %v6942_v52 = vld [vmem:[%s10375_s8 + $0x6dc] sm:$0xf]  ;;  %v6332_v6 = vld [vmem:[%s10375_s8 + $0x64c] sm:$0xf0] }
 0x2b7   :  { %4006 = vmatpush.bf16.msrb.mxu2 %v6075_v2  ;;  %v6163_v2 = vor.u32 %v6882_v58, %v6162_v55  ;;  %v6416_v55 = vld [vmem:[%s10375_s8 + $0x6f4] sm:$0xf0]  ;;  %v5574_v58 = vld [vmem:[%s10375_s8 + $0x48] sm:$0xf] }
 0x2b8   :  { %3995 = vmatpush.bf16.msrb.mxu1 %v5795_v5  ;;  %v5883_v5 = vor.u32 %v6812_v61, %v5882_v35  ;;  %v6022_v61 = vld [vmem:[%s10375_s8 + $0x3c8] sm:$0xf]  ;;  %v6419_v4 = vor.u32 %v6942_v52, %v6416_v55  ;;  %v5660_v52 = vld [vmem:[%s10375_s8 + $0x10c] sm:$0xf0]  ;;  %v6865_v55 = vld [vmem:[%s10375_s8 + $0x474] sm:$0xf] }
 0x2b9   :  { %4021 = vmatpush.bf16.msrb.mxu0 %v6243_v3  ;;  %v5854_v3 = vld [vmem:[%s10375_s8 + $0x278] sm:$0xf] }
 0x2ba   :  { %3981 = vmatpush.bf16.msrb.mxu3 %v5599_v15  ;;  %v6917_v15 = vld [vmem:[%s10375_s8 + $0x610] sm:$0xf0] }
 0x2bb   :  { %4007 = vmatpush.bf16.msrb.mxu2 %v6047_v9  ;;  %v5855_v9 = vor.u32 %v6805_v13, %v5854_v3  ;;  %v6303_v10 = vor.u32 %v6917_v15, %v6302_v14  ;;  %v5546_v3 = vld [vmem:[%s10375_s8 + $0x10] sm:$0xf]  ;;  %v6728_v13 = vld [vmem:[%s10375_s8 + $0x28] sm:$0xf0]  ;;  %v6774_v15 = vld [vmem:[%s10375_s8 + $0x19c] sm:$0xf] }
 0x2bc   :  { %3996 = vmatpush.bf16.msrb.mxu1 %v5767_v23  ;;  %v5826_v23 = vld [vmem:[%s10375_s8 + $0x240] sm:$0xf]  ;;  %v6840_v14 = vld [vmem:[%s10375_s8 + $0x3a8] sm:$0xf0]  ;;  %v5547_v22 = vor.u32 %v6728_v13, %v5546_v3  ;;  %v5800_v13 = vld [vmem:[%s10375_s8 + $0x224] sm:$0xf0] }
 0x2bd   :  { %4022 = vmatpush.bf16.msrb.mxu0 %v6215_v46  ;;  %v6274_v46 = vld [vmem:[%s10375_s8 + $0x5c0] sm:$0xf]  ;;  %v5827_v56 = vor.u32 %v6798_v24, %v5826_v23  ;;  %v5912_v23 = vld [vmem:[%s10375_s8 + $0x304] sm:$0xf0]  ;;  %v6788_v3 = vld [vmem:[%s10375_s8 + $0x20c] sm:$0xf] }
 0x2be   :  { %3982 = vmatpush.bf16.msrb.mxu3 %v5571_v1  ;;  %v6749_v1 = vld [vmem:[%s10375_s8 + $0xd0] sm:$0xf0] }
 0x2bf   :  { %4008 = vmatpush.bf16.msrb.mxu2 %v6019_v32  ;;  %3997 = vmatmul.bf16.vlgmr.msrb.gmra.mxu1 %v9358_v48 }
 0x2c0   :  { %4041 = vmatpush.bf16.msra.mxu1 %v5967_v26  ;;  %4023 = vmatmul.bf16.vlgmr.msrb.gmra.mxu0 %v9366_v17  ;;  %v6910_v26 = vld [vmem:[%s10375_s8 + $0x5d8] sm:$0xf0] }
 0x2c1   :  { %4067 = vmatpush.bf16.msra.mxu0 %v6415_v28  ;;  %v5630_v28 = vld [vmem:[%s10375_s8 + $0xb8] sm:$0xf]  ;;  %v6275_v32 = vor.u32 %v6910_v26, %v6274_v46  ;;  %v6928_v46 = vld [vmem:[%s10375_s8 + $0x66c] sm:$0xf]  ;;  %v6360_v26 = vld [vmem:[%s10375_s8 + $0x684] sm:$0xf0] }
 0x2c2   :  { %3983 = vmatpush.bf16.msrb.mxu3 %v5543_v42  ;;  %v5631_v37 = vor.u32 %v6749_v1, %v5630_v28  ;;  %v6854_v42 = vld [vmem:[%s10375_s8 + $0x418] sm:$0xf0]  ;;  %v6767_v28 = vld [vmem:[%s10375_s8 + $0x164] sm:$0xf]  ;;  %v5716_v1 = vld [vmem:[%s10375_s8 + $0x17c] sm:$0xf0] }
 0x2c3   :  { %4009 = vmatpush.bf16.msrb.mxu2 %v5991_v49  ;;  %v6784_v49 = vld [vmem:[%s10375_s8 + $0x1e8] sm:$0xf0] }
 0x2c4   :  { %4042 = vmatpush.bf16.msra.mxu1 %v5939_v53  ;;  %v5602_v53 = vld [vmem:[%s10375_s8 + $0x80] sm:$0xf]  ;;  %v5771_v35 = vor.u32 %v6784_v49, %v5770_v7  ;;  %v6335_v7 = vor.u32 %v6921_v40, %v6332_v6  ;;  %v5856_v49 = vld [vmem:[%s10375_s8 + $0x294] sm:$0xf0] }
 0x2c5   :  { %4068 = vmatpush.bf16.msra.mxu0 %v6387_v60  ;;  %3984 = vmatmul.bf16.vlgmr.msrb.gmra.mxu3 %v9400_v38  ;;  %v6050_v60 = vld [vmem:[%s10375_s8 + $0x400] sm:$0xf]  ;;  %v5603_v34 = vor.u32 %v6742_v19, %v5602_v53  ;;  %v6760_v53 = vld [vmem:[%s10375_s8 + $0x12c] sm:$0xf]  ;;  %v5688_v19 = vld [vmem:[%s10375_s8 + $0x144] sm:$0xf0] }
 0x2c6   :  { %4028 = vmatpush.bf16.msra.mxu3 %v5743_v50  ;;  %4010 = vmatmul.bf16.vlgmr.msrb.gmra.mxu2 %v9408_v44  ;;  %v6218_v50 = vld [vmem:[%s10375_s8 + $0x550] sm:$0xf] }
 0x2c7   :  { %4054 = vmatpush.bf16.msra.mxu2 %v6191_v39  ;;  %v6830_v39 = vld [vmem:[%s10375_s8 + $0x35c] sm:$0xf]  ;;  %v6219_v63 = vor.u32 %v6896_v29, %v6218_v50  ;;  %v5691_v50 = vor.u32 %v6760_v53, %v5688_v19 }
 0x2c8   :  { %4043 = vmatpush.bf16.msra.mxu1 %v5911_v54  ;;  %v6051_v54 = vor.u32 %v6854_v42, %v6050_v60  ;;  %v5971_v0 = vor.u32 %v6830_v39, %v5968_v51  ;;  %v6872_v60 = vld [vmem:[%s10375_s8 + $0x4ac] sm:$0xf]  ;;  %v6136_v42 = vld [vmem:[%s10375_s8 + $0x4c4] sm:$0xf0]  ;;  %v6914_v29 = vld [vmem:[%s10375_s8 + $0x5fc] sm:$0xf] }
 0x2c9   :  { %4069 = vmatpush.bf16.msra.mxu0 %v6359_v59  ;;  %v6735_v59 = vld [vmem:[%s10375_s8 + $0x60] sm:$0xf0]  ;;  %v6139_v39 = vor.u32 %v6872_v60, %v6136_v42  ;;  %v6753_v51 = vld [vmem:[%s10375_s8 + $0xf4] sm:$0xf]  ;;  %v6394_v60 = vld [vmem:[%s10375_s8 + $0x6a8] sm:$0xf] }
 0x2ca   :  { %4029 = vmatpush.bf16.msra.mxu3 %v5715_v62  ;;  %v6847_v62 = vld [vmem:[%s10375_s8 + $0x3e0] sm:$0xf0]  ;;  %v5575_v41 = vor.u32 %v6735_v59, %v5574_v58  ;;  %v6108_v58 = vld [vmem:[%s10375_s8 + $0x48c] sm:$0xf0] }
 0x2cb   :  { %4055 = vmatpush.bf16.msra.mxu2 %v6163_v2  ;;  %v6823_v2 = vld [vmem:[%s10375_s8 + $0x324] sm:$0xf] }
 0x2cc   :  { %4044 = vmatpush.bf16.msra.mxu1 %v5883_v5  ;;  %v5940_v5 = vld [vmem:[%s10375_s8 + $0x33c] sm:$0xf0]  ;;  %v6939_v42 = vld [vmem:[%s10375_s8 + $0x6c0] sm:$0xf0] }
 0x2cd   :  { %4070 = vmatpush.bf16.msra.mxu0 %v6331_v12  ;;  %v6023_v12 = vor.u32 %v6847_v62, %v6022_v61  ;;  %v5943_v18 = vor.u32 %v6823_v2, %v5940_v5  ;;  %v5828_v61 = vld [vmem:[%s10375_s8 + $0x25c] sm:$0xf0]  ;;  %v5663_v62 = vor.u32 %v6753_v51, %v5660_v52  ;;  %v6111_v2 = vor.u32 %v6865_v55, %v6108_v58 }
 0x2ce   :  { %4030 = vmatpush.bf16.msra.mxu3 %v5687_v57  ;;  %v5994_v57 = vld [vmem:[%s10375_s8 + $0x390] sm:$0xf]  ;;  %v6198_v52 = vld [vmem:[%s10375_s8 + $0x520] sm:$0xf]  ;;  %v6395_v55 = vor.u32 %v6939_v42, %v6394_v60  ;;  %v6750_v42 = vld [vmem:[%s10375_s8 + $0xd8] sm:$0xf0] }
 0x2cf   :  { %4056 = vmatpush.bf16.msra.mxu2 %v6135_v16  ;;  %v5744_v16 = vld [vmem:[%s10375_s8 + $0x1b4] sm:$0xf0]  ;;  %v5995_v24 = vor.u32 %v6840_v14, %v5994_v57  ;;  %v6900_v14 = vld [vmem:[%s10375_s8 + $0x58c] sm:$0xf]  ;;  %v5638_v60 = vld [vmem:[%s10375_s8 + $0xc0] sm:$0xf] }
 0x2d0   :  { %4045 = vmatpush.bf16.msra.mxu1 %v5855_v9  ;;  %v6192_v9 = vld [vmem:[%s10375_s8 + $0x534] sm:$0xf0] }
 0x2d1   :  { %4071 = vmatpush.bf16.msra.mxu0 %v6303_v10  ;;  %v6816_v10 = vld [vmem:[%s10375_s8 + $0x2ec] sm:$0xf] }
 0x2d2   :  { %4031 = vmatpush.bf16.msra.mxu3 %v5659_v25  ;;  %v5747_v25 = vor.u32 %v6774_v15, %v5744_v16  ;;  %v6248_v15 = vld [vmem:[%s10375_s8 + $0x5a4] sm:$0xf0]  ;;  %v6083_v16 = vor.u32 %v6858_v8, %v6080_v11  ;;  %v6883_v11 = vld [vmem:[%s10375_s8 + $0x500] sm:$0xf0] }
 0x2d3   :  { %4057 = vmatpush.bf16.msra.mxu2 %v6107_v27  ;;  %v6195_v27 = vor.u32 %v6886_v20, %v6192_v9  ;;  %v5604_v20 = vld [vmem:[%s10375_s8 + $0x9c] sm:$0xf0]  ;;  %v5803_v9 = vor.u32 %v6788_v3, %v5800_v13  ;;  %v6170_v8 = vld [vmem:[%s10375_s8 + $0x4e8] sm:$0xf]  ;;  %v5890_v3 = vld [vmem:[%s10375_s8 + $0x2b8] sm:$0xf] }
 0x2d4   :  { %4046 = vmatpush.bf16.msra.mxu1 %v5827_v56  ;;  %v5915_v56 = vor.u32 %v6816_v10, %v5912_v23  ;;  %v6781_v10 = vld [vmem:[%s10375_s8 + $0x1d4] sm:$0xf]  ;;  %v6251_v23 = vor.u32 %v6900_v14, %v6248_v15  ;;  %v6338_v14 = vld [vmem:[%s10375_s8 + $0x638] sm:$0xf] }
 0x2d5   :  { %4072 = vmatpush.bf16.msra.mxu0 %v6275_v32  ;;  %v6363_v32 = vor.u32 %v6928_v46, %v6360_v26  ;;  %v6220_v46 = vld [vmem:[%s10375_s8 + $0x56c] sm:$0xf0]  ;;  %v6813_v13 = vld [vmem:[%s10375_s8 + $0x2d0] sm:$0xf0] }
 0x2d6   :  { %4032 = vmatpush.bf16.msra.mxu3 %v5631_v37  ;;  %v5719_v37 = vor.u32 %v6767_v28, %v5716_v1  ;;  %v6834_v28 = vld [vmem:[%s10375_s8 + $0x378] sm:$0xf0]  ;;  %v6422_v1 = vld [vmem:[%s10375_s8 + $0x6e0] sm:$0xf]  ;;  %v6925_v15 = vld [vmem:[%s10375_s8 + $0x650] sm:$0xf0] }
 0x2d7   :  { %4058 = vmatpush.bf16.msra.mxu2 %v6079_v43  ;;  %v6167_v43 = vor.u32 %v6879_v30, %v6164_v31  ;;  %v6946_v30 = vld [vmem:[%s10375_s8 + $0x6f8] sm:$0xf0]  ;;  %v6732_v31 = vld [vmem:[%s10375_s8 + $0x4c] sm:$0xf] }
 0x2d8   :  { %4047 = vmatpush.bf16.msra.mxu1 %v5799_v45  ;;  %v5887_v45 = vor.u32 %v6809_v33, %v5884_v36  ;;  %v6844_v36 = vld [vmem:[%s10375_s8 + $0x3cc] sm:$0xf]  ;;  %v6423_v53 = vor.u32 %v6946_v30, %v6422_v1  ;;  %v6757_v30 = vld [vmem:[%s10375_s8 + $0x110] sm:$0xf0] }
 0x2d9   :  { %4073 = vmatpush.bf16.msra.mxu0 %v6247_v47  ;;  %v6802_v47 = vld [vmem:[%s10375_s8 + $0x27c] sm:$0xf] }
 0x2da   :  { %4033 = vmatpush.bf16.msra.mxu3 %v5603_v34  ;;  %v6304_v34 = vld [vmem:[%s10375_s8 + $0x614] sm:$0xf0] }
 0x2db   :  { %4059 = vmatpush.bf16.msra.mxu2 %v6051_v54  ;;  %v5859_v54 = vor.u32 %v6802_v47, %v5856_v49  ;;  %v6307_v59 = vor.u32 %v6914_v29, %v6304_v34  ;;  %v6725_v47 = vld [vmem:[%s10375_s8 + $0x14] sm:$0xf]  ;;  %v5548_v49 = vld [vmem:[%s10375_s8 + $0x2c] sm:$0xf0]  ;;  %v5750_v34 = vld [vmem:[%s10375_s8 + $0x1a0] sm:$0xf] }
 0x2dc   :  { %4048 = vmatpush.bf16.msra.mxu1 %v5771_v35  ;;  %v6795_v35 = vld [vmem:[%s10375_s8 + $0x244] sm:$0xf]  ;;  %v5996_v29 = vld [vmem:[%s10375_s8 + $0x3ac] sm:$0xf0]  ;;  %v5551_v58 = vor.u32 %v6725_v47, %v5548_v49  ;;  %v6086_v49 = vld [vmem:[%s10375_s8 + $0x440] sm:$0xf] }
 0x2dd   :  { %4074 = vmatpush.bf16.msra.mxu0 %v6219_v63  ;;  %v6907_v63 = vld [vmem:[%s10375_s8 + $0x5c4] sm:$0xf]  ;;  %v5831_v5 = vor.u32 %v6795_v35, %v5828_v61  ;;  %v6820_v35 = vld [vmem:[%s10375_s8 + $0x308] sm:$0xf0] }
 0x2de   :  { %4034 = vmatpush.bf16.msra.mxu3 %v5575_v41  ;;  %v5632_v41 = vld [vmem:[%s10375_s8 + $0xd4] sm:$0xf0] }
 0x2df   :  { %4060 = vmatpush.bf16.msra.mxu2 %v6023_v12  ;;  %4049 = vmatmul.bf16.vlgmr.msra.gmra.mxu1 %v9358_v48 }
 0x2e0   :  { %4093 = vmatpush.bf16.msrb.mxu1 %v5971_v0  ;;  %4075 = vmatmul.bf16.vlgmr.msra.gmra.mxu0 %v9366_v17  ;;  %v6276_v0 = vld [vmem:[%s10375_s8 + $0x5dc] sm:$0xf0] }
 0x2e1   :  { %4119 = vmatpush.bf16.msrb.mxu0 %v6419_v4  ;;  %v6746_v4 = vld [vmem:[%s10375_s8 + $0xbc] sm:$0xf]  ;;  %v6279_v12 = vor.u32 %v6907_v63, %v6276_v0  ;;  %v6366_v63 = vld [vmem:[%s10375_s8 + $0x670] sm:$0xf]  ;;  %v6932_v0 = vld [vmem:[%s10375_s8 + $0x688] sm:$0xf0] }
 0x2e2   :  { %4035 = vmatpush.bf16.msra.mxu3 %v5547_v22  ;;  %v5635_v57 = vor.u32 %v6746_v4, %v5632_v41  ;;  %v6052_v22 = vld [vmem:[%s10375_s8 + $0x41c] sm:$0xf0]  ;;  %v5722_v4 = vld [vmem:[%s10375_s8 + $0x168] sm:$0xf]  ;;  %v6771_v41 = vld [vmem:[%s10375_s8 + $0x180] sm:$0xf0] }
 0x2e3   :  { %4061 = vmatpush.bf16.msra.mxu2 %v5995_v24  ;;  %v5772_v24 = vld [vmem:[%s10375_s8 + $0x1ec] sm:$0xf0] }
 0x2e4   :  { %4094 = vmatpush.bf16.msrb.mxu1 %v5943_v18  ;;  %v6739_v18 = vld [vmem:[%s10375_s8 + $0x84] sm:$0xf]  ;;  %v5775_v33 = vor.u32 %v6781_v10, %v5772_v24  ;;  %v6876_v10 = vld [vmem:[%s10375_s8 + $0x4c8] sm:$0xf0]  ;;  %v6339_v24 = vor.u32 %v6925_v15, %v6338_v14  ;;  %v5582_v15 = vld [vmem:[%s10375_s8 + $0x50] sm:$0xf] }
 0x2e5   :  { %4120 = vmatpush.bf16.msrb.mxu0 %v6391_v21  ;;  %4036 = vmatmul.bf16.vlgmr.msra.gmra.mxu3 %v9400_v38  ;;  %v6851_v21 = vld [vmem:[%s10375_s8 + $0x404] sm:$0xf]  ;;  %v5607_v26 = vor.u32 %v6739_v18, %v5604_v20  ;;  %v5694_v18 = vld [vmem:[%s10375_s8 + $0x130] sm:$0xf]  ;;  %v6764_v20 = vld [vmem:[%s10375_s8 + $0x148] sm:$0xf0] }
 0x2e6   :  { %4080 = vmatpush.bf16.msrb.mxu3 %v5747_v25  ;;  %4062 = vmatmul.bf16.vlgmr.msra.gmra.mxu2 %v9408_v44  ;;  %v6893_v25 = vld [vmem:[%s10375_s8 + $0x554] sm:$0xf] }
 0x2e7   :  { %4106 = vmatpush.bf16.msrb.mxu2 %v6195_v27  ;;  %v5974_v27 = vld [vmem:[%s10375_s8 + $0x360] sm:$0xf]  ;;  %v6223_v40 = vor.u32 %v6893_v25, %v6220_v46  ;;  %v6806_v46 = vld [vmem:[%s10375_s8 + $0x298] sm:$0xf0] }
 0x2e8   :  { %4095 = vmatpush.bf16.msrb.mxu1 %v5915_v56  ;;  %v6055_v56 = vor.u32 %v6851_v21, %v6052_v22  ;;  %v5975_v6 = vor.u32 %v6834_v28, %v5974_v27  ;;  %v5891_v21 = vor.u32 %v6813_v13, %v5890_v3  ;;  %v6142_v22 = vld [vmem:[%s10375_s8 + $0x4b0] sm:$0xf]  ;;  %v5862_v25 = vld [vmem:[%s10375_s8 + $0x280] sm:$0xf]  ;;  %v6918_v28 = vld [vmem:[%s10375_s8 + $0x618] sm:$0xf0] }
 0x2e9   :  { %4121 = vmatpush.bf16.msrb.mxu0 %v6363_v32  ;;  %v5576_v32 = vld [vmem:[%s10375_s8 + $0x64] sm:$0xf0]  ;;  %v6310_v27 = vld [vmem:[%s10375_s8 + $0x600] sm:$0xf]  ;;  %v6143_v1 = vor.u32 %v6876_v10, %v6142_v22  ;;  %v6226_v3 = vld [vmem:[%s10375_s8 + $0x558] sm:$0xf] }
 0x2ea   :  { %4081 = vmatpush.bf16.msrb.mxu3 %v5719_v37  ;;  %v6024_v37 = vld [vmem:[%s10375_s8 + $0x3e4] sm:$0xf0]  ;;  %v5579_v19 = vor.u32 %v6732_v31, %v5576_v32  ;;  %v5863_v31 = vor.u32 %v6806_v46, %v5862_v25  ;;  %v6114_v32 = vld [vmem:[%s10375_s8 + $0x478] sm:$0xf]  ;;  %v6897_v13 = vld [vmem:[%s10375_s8 + $0x570] sm:$0xf0] }
 0x2eb   :  { %4107 = vmatpush.bf16.msrb.mxu2 %v6167_v43  ;;  %v5946_v43 = vld [vmem:[%s10375_s8 + $0x328] sm:$0xf] }
 0x2ec   :  { %4096 = vmatpush.bf16.msrb.mxu1 %v5887_v45  ;;  %v6827_v45 = vld [vmem:[%s10375_s8 + $0x340] sm:$0xf0] }
 0x2ed   :  { %4122 = vmatpush.bf16.msrb.mxu0 %v6335_v7  ;;  %v6027_v7 = vor.u32 %v6844_v36, %v6024_v37  ;;  %v5947_v51 = vor.u32 %v6827_v45, %v5946_v43  ;;  %v6311_v36 = vor.u32 %v6918_v28, %v6310_v27  ;;  %v5834_v37 = vld [vmem:[%s10375_s8 + $0x248] sm:$0xf]  ;;  %v5554_v27 = vld [vmem:[%s10375_s8 + $0x18] sm:$0xf]  ;;  %v6729_v28 = vld [vmem:[%s10375_s8 + $0x30] sm:$0xf0] }
 0x2ee   :  { %4082 = vmatpush.bf16.msrb.mxu3 %v5691_v50  ;;  %v6837_v50 = vld [vmem:[%s10375_s8 + $0x394] sm:$0xf]  ;;  %v6282_v43 = vld [vmem:[%s10375_s8 + $0x5c8] sm:$0xf] }
 0x2ef   :  { %4108 = vmatpush.bf16.msrb.mxu2 %v6139_v39  ;;  %v6778_v39 = vld [vmem:[%s10375_s8 + $0x1b8] sm:$0xf0]  ;;  %v5999_v61 = vor.u32 %v6837_v50, %v5996_v29 }
 0x2f0   :  { %4097 = vmatpush.bf16.msrb.mxu1 %v5859_v54  ;;  %v6890_v54 = vld [vmem:[%s10375_s8 + $0x538] sm:$0xf0] }
 0x2f1   :  { %4123 = vmatpush.bf16.msrb.mxu0 %v6307_v59  ;;  %v5918_v59 = vld [vmem:[%s10375_s8 + $0x2f0] sm:$0xf]  ;;  %v6862_v50 = vld [vmem:[%s10375_s8 + $0x458] sm:$0xf0] }
 0x2f2   :  { %4083 = vmatpush.bf16.msrb.mxu3 %v5663_v62  ;;  %v5751_v62 = vor.u32 %v6778_v39, %v5750_v34 }
 0x2f3   :  { %4109 = vmatpush.bf16.msrb.mxu2 %v6111_v2  ;;  %v6199_v2 = vor.u32 %v6890_v54, %v6198_v52  ;;  %v6792_v52 = vld [vmem:[%s10375_s8 + $0x228] sm:$0xf0]  ;;  %v5639_v54 = vor.u32 %v6750_v42, %v5638_v60 }
 0x2f4   :  { %4098 = vmatpush.bf16.msrb.mxu1 %v5831_v5  ;;  %v5919_v5 = vor.u32 %v6820_v35, %v5918_v59  ;;  %v6087_v59 = vor.u32 %v6862_v50, %v6086_v49  ;;  %v5610_v35 = vld [vmem:[%s10375_s8 + $0x88] sm:$0xf] }
 0x2f5   :  { %4124 = vmatpush.bf16.msrb.mxu0 %v6279_v12  ;;  %v6367_v12 = vor.u32 %v6932_v0, %v6366_v63  ;;  %v6058_v0 = vld [vmem:[%s10375_s8 + $0x408] sm:$0xf] }
 0x2f6   :  { %4084 = vmatpush.bf16.msrb.mxu3 %v5635_v57  ;;  %v5723_v57 = vor.u32 %v6771_v41, %v5722_v4 }
 0x2f7   :  { %4110 = vmatpush.bf16.msrb.mxu2 %v6083_v16  ;;  %v6171_v16 = vor.u32 %v6883_v11, %v6170_v8  ;;  %v5778_v8 = vld [vmem:[%s10375_s8 + $0x1d8] sm:$0xf]  ;;  %v6785_v11 = vld [vmem:[%s10375_s8 + $0x1f0] sm:$0xf0] }
 0x2f8   :  { %4099 = vmatpush.bf16.msrb.mxu1 %v5803_v9 }
 0x2f9   :  { %4125 = vmatpush.bf16.msrb.mxu0 %v6251_v23 }
 0x2fa   :  { %4085 = vmatpush.bf16.msrb.mxu3 %v5607_v26  ;;  %v5695_v26 = vor.u32 %v6764_v20, %v5694_v18  ;;  %v5779_v20 = vor.u32 %v6785_v11, %v5778_v8 }
 0x2fb   :  { %4111 = vmatpush.bf16.msrb.mxu2 %v6055_v56  ;;  %v5666_v56 = vld [vmem:[%s10375_s8 + $0xf8] sm:$0xf] }
 0x2fc   :  { %4100 = vmatpush.bf16.msrb.mxu1 %v5775_v33  ;;  %v10223_v9 = vpop.f32.mrf.mxu1  ;;  %v6869_v33 = vld [vmem:[%s10375_s8 + $0x490] sm:$0xf0] }
 0x2fd   :  { %4126 = vmatpush.bf16.msrb.mxu0 %v6223_v40  ;;  %v10232_v23 = vpop.f32.mrf.mxu0  ;;  %v6799_v40 = vld [vmem:[%s10375_s8 + $0x260] sm:$0xf0]  ;;  %v6115_v45 = vor.u32 %v6869_v33, %v6114_v32  ;;  %v5555_v32 = vor.u32 %v6729_v28, %v5554_v27 }
 0x2fe   :  { %4086 = vmatpush.bf16.msrb.mxu3 %v5579_v19  ;;  %v10273_v19 = vld [vmem:[%s10376_s9] sm:$0x7f]  ;;  %v5835_v47 = vor.u32 %v6799_v40, %v5834_v37 }
 0x2ff   :  { %4112 = vmatpush.bf16.msrb.mxu2 %v6027_v7  ;;  %4101 = vmatmul.bf16.vlgmr.msrb.gmra.mxu1 %v9358_v48  ;;  %v2654_v39 = vperm.slane %v10273_v19, 0  ;;  %v2655_v40 = vperm.slane %v10273_v19, 1 }
 0x300   :  { %4145 = vmatpush.bf16.msra.mxu1 %v5975_v6  ;;  %4127 = vmatmul.bf16.vlgmr.msrb.gmra.mxu0 %v9366_v17  ;;  %v5667_v6 = vor.u32 %v6757_v30, %v5666_v56  ;;  %v6002_v56 = vld [vmem:[%s10375_s8 + $0x398] sm:$0xf] }
 0x301   :  { %4171 = vmatpush.bf16.msra.mxu0 %v6423_v53  ;;  %v6911_v53 = vld [vmem:[%s10375_s8 + $0x5e0] sm:$0xf0] }
 0x302   :  { %4087 = vmatpush.bf16.msrb.mxu3 %v5551_v58  ;;  %v6283_v34 = vor.u32 %v6911_v53, %v6282_v43  ;;  %v6904_v58 = vld [vmem:[%s10375_s8 + $0x5a8] sm:$0xf0] }
 0x303   :  { %4113 = vmatpush.bf16.msrb.mxu2 %v5999_v61  ;;  %v6743_v61 = vld [vmem:[%s10375_s8 + $0xa0] sm:$0xf0] }
 0x304   :  { %4146 = vmatpush.bf16.msra.mxu1 %v5947_v51  ;;  %v3844_v7 = vpop.f32.mrf.mxu1  ;;  %v5806_v51 = vld [vmem:[%s10375_s8 + $0x210] sm:$0xf] }
 0x305   :  { %4172 = vmatpush.bf16.msra.mxu0 %v6395_v55  ;;  %4088 = vmatmul.bf16.vlgmr.msrb.gmra.mxu3 %v9400_v38  ;;  %v3870_v29 = vpop.f32.mrf.mxu0  ;;  %v6254_v55 = vld [vmem:[%s10375_s8 + $0x590] sm:$0xf]  ;;  %v5807_v63 = vor.u32 %v6792_v52, %v5806_v51 }
 0x306   :  { %4132 = vmatpush.bf16.msra.mxu3 %v5751_v62  ;;  %4114 = vmatmul.bf16.vlgmr.msrb.gmra.mxu2 %v9408_v44 }
 0x307   :  { %4158 = vmatpush.bf16.msra.mxu2 %v6199_v2  ;;  %v6855_v2 = vld [vmem:[%s10375_s8 + $0x420] sm:$0xf0] }
 0x308   :  { %4147 = vmatpush.bf16.msra.mxu1 %v5919_v5  ;;  %v3829_v62 = vpop.f32.mrf.mxu3  ;;  %v6255_v5 = vor.u32 %v6904_v58, %v6254_v55  ;;  %v6059_v14 = vor.u32 %v6855_v2, %v6058_v0 }
 0x309   :  { %4173 = vmatpush.bf16.msra.mxu0 %v6367_v12  ;;  %v3830_v4 = vadd.f32 %v3829_v62, %v2654_v39  ;;  %v3855_v41 = vpop.f32.mrf.mxu2  ;;  %v5611_v12 = vor.u32 %v6743_v61, %v5610_v35 }
 0x30a   :  { %4133 = vmatpush.bf16.msra.mxu3 %v5723_v57 }
 0x30b   :  { %4159 = vmatpush.bf16.msra.mxu2 %v6171_v16  ;;  %v3843_v57 = vadd.f32 %v10223_v9, %v3830_v4  ;;  %v6736_v16 = vld [vmem:[%s10375_s8 + $0x68] sm:$0xf0] }
 0x30c   :  { %4148 = vmatpush.bf16.msra.mxu1 %v5891_v21  ;;  %v3894_v18 = vpop.f32.mrf.mxu1  ;;  %v6030_v21 = vld [vmem:[%s10375_s8 + $0x3d0] sm:$0xf]  ;;  %v6848_v9 = vld [vmem:[%s10375_s8 + $0x3e8] sm:$0xf0]  ;;  %v5583_v25 = vor.u32 %v6736_v16, %v5582_v15 }
 0x30d   :  { %4174 = vmatpush.bf16.msra.mxu0 %v6339_v24  ;;  %v3856_v22 = vadd.f32 %v3855_v41, %v3843_v57  ;;  %v3920_v10 = vpop.f32.mrf.mxu0  ;;  %v6227_v24 = vor.u32 %v6897_v13, %v6226_v3 }
 0x30e   :  { %4134 = vmatpush.bf16.msra.mxu3 %v5695_v26  ;;  %v6031_v26 = vor.u32 %v6848_v9, %v6030_v21 }
 0x30f   :  { %4160 = vmatpush.bf16.msra.mxu2 %v6143_v1  ;;  %v3869_v46 = vadd.f32 %v10232_v23, %v3856_v22  ;;  %v6841_v23 = vld [vmem:[%s10375_s8 + $0x3b0] sm:$0xf0]  ;;  %s7031_s8 = smov [#allocation4]  }
 0x310   :  { %4149 = vmatpush.bf16.msra.mxu1 %v5863_v31  ;;  %v3831_v1 = vpop.f32.mrf.mxu3  ;;  %v6003_v33 = vor.u32 %v6841_v23, %v6002_v56  ;;  %v2657_v56 = vperm.slane %v10273_v19, 3  ;;  %s4340_s1 = sshll.u32 %s7031_s8, 4  ;;  %s4341_s1 = int_to_ptr.vmem [resolvable:$true] %s4340_s1 }
 0x311   :  { %4175 = vmatpush.bf16.msra.mxu0 %v6311_v36  ;;  %v6424_v30 = vmul.f32 -1.442695, %v3869_v46  ;;  %v3857_v31 = vpop.f32.mrf.mxu2  ;;  %4345 = dma.vmem_to_hbm [thread:$0]  %s4341_s1, 256, %s4343_s21, [#allocation5]  }
 0x312   :  { %4135 = vmatpush.bf16.msra.mxu3 %v5667_v6 }
 0x313   :  { %4161 = vmatpush.bf16.msra.mxu2 %v6115_v45  ;;  %6951 = vpow2.f32 %v6424_v30 }
 0x314   :  { %4150 = vmatpush.bf16.msra.mxu1 %v5835_v47  ;;  %v3896_v36 = vpop.f32.mrf.mxu1 }
 0x315   :  { %4176 = vmatpush.bf16.msra.mxu0 %v6283_v34  ;;  %v3922_v37 = vpop.f32.mrf.mxu0 }
 0x316   :  { %4136 = vmatpush.bf16.msra.mxu3 %v5639_v54 }
 0x317   :  { %4162 = vmatpush.bf16.msra.mxu2 %v6087_v59 }
 0x318   :  { %4151 = vmatpush.bf16.msra.mxu1 %v5807_v63  ;;  %v3881_v6 = vpop.f32.mrf.mxu3 }
 0x319   :  { %4177 = vmatpush.bf16.msra.mxu0 %v6255_v5  ;;  %v6952_v43 = vpop.eup %6951  ;;  %v3882_v53 = vadd.f32 %v3881_v6, %v2655_v40  ;;  %v3907_v45 = vpop.f32.mrf.mxu2 }
 0x31a   :  { %4137 = vmatpush.bf16.msra.mxu3 %v5611_v12  ;;  %v4205_v60 = vadd.f32 1.0, %v6952_v43 }
 0x31b   :  { %4163 = vmatpush.bf16.msra.mxu2 %v6059_v14  ;;  %v3895_v42 = vadd.f32 %v3894_v18, %v3882_v53 }
 0x31c   :  { %4152 = vmatpush.bf16.msra.mxu1 %v5779_v20  ;;  %6953 = vrcp.f32 %v4205_v60  ;;  %v4221_v58 = vand.u32 2147483647, %v4205_v60  ;;  %vm4217_vm2 = vweird.f32 %v4205_v60 }
 0x31d   :  { %4178 = vmatpush.bf16.msra.mxu0 %v6227_v24  ;;  %v3908_v7 = vadd.f32 %v3907_v45, %v3895_v42 }
 0x31e   :  { %4138 = vmatpush.bf16.msra.mxu3 %v5583_v25  ;;  %vm4222_vm4 = vcmp.eq.f32.partialorder %v4221_v58, 8.507059e+37 }
 0x31f   :  { %4164 = vmatpush.bf16.msra.mxu2 %v6031_v26  ;;  %4153 = vmatmul.bf16.vlgmr.msra.gmra.mxu1 %v9358_v48  ;;  %v3946_v48 = vpop.f32.mrf.mxu1  ;;  %v3921_v47 = vadd.f32 %v3920_v10, %v3908_v7 }
 0x320   :  { %4179 = vmatmul.bf16.vlgmr.msra.gmra.mxu0 %v9366_v17  ;;  %v3972_v17 = vpop.f32.mrf.mxu0  ;;  %v3883_v49 = vpop.f32.mrf.mxu3 }
 0x321   :  { %v6425_v50 = vmul.f32 -1.442695, %v3921_v47  ;;  %v3909_v29 = vpop.f32.mrf.mxu2 }
 0x322   :  { %4139 = vmatpush.bf16.msra.mxu3 %v5555_v32  ;;  %v6954_v34 = vpop.eup %6953 }
 0x323   :  { %4165 = vmatpush.bf16.msra.mxu2 %v6003_v33  ;;  %v4213_v39 = vmul.f32 %v6954_v34, %v4205_v60  ;;  %6955 = vpow2.f32 %v6425_v50  ;;  %vm4218_vm1 = vweird.f32 %v6954_v34 }
 0x324   :  { %vm4219_vm3 = vmor %vm4217_vm2, %vm4218_vm1 }
 0x325   :  { %4140 = vmatmul.bf16.vlgmr.msra.gmra.mxu3 %v9400_v38  ;;  %v4214_v52 = vsub.f32 1.0, %v4213_v39  ;;  %v2656_v38 = vperm.slane %v10273_v19, 2 }
 0x326   :  { %4166 = vmatmul.bf16.vlgmr.msra.gmra.mxu2 %v9408_v44  ;;  %v4223_v44 = vand.u32 2147483648, %v4205_v60 }
 0x327   :  { %v3948_v51 = vpop.f32.mrf.mxu1  ;;  %v4215_v55 = vmul.f32 %v6954_v34, %v4214_v52 }
 0x328   :  { %v3974_v54 = vpop.f32.mrf.mxu0  ;;  %v3933_v59 = vpop.f32.mrf.mxu3  ;;  %v4224_v4 = vor.u32 1.1754944e-38, %v4223_v44 }
 0x329   :  { %v6956_v35 = vpop.eup %6955  ;;  %v4216_v61 = vadd.f32 %v6954_v34, %v4215_v55  ;;  %v3934_v62 = vadd.f32 %v3933_v59, %v2656_v38  ;;  %v3959_v63 = vpop.f32.mrf.mxu2  ;;  %v2658_v54 = vperm.slane %v10273_v19, 4 }
 0x32a   :  { %v4206_v0 = vadd.f32 1.0, %v6956_v35 }
 0x32b   :  { %v4220_v2 = vsel %vm4219_vm3, %v6954_v34, %v4216_v61  ;;  %v3947_v41 = vadd.f32 %v3946_v48, %v3934_v62 }
 0x32c   :  { %6957 = vrcp.f32 %v4206_v0  ;;  %v4225_v8 = vsel %vm4222_vm4, %v4224_v4, %v4220_v2  ;;  %v4238_v18 = vand.u32 2147483648, %v4206_v0  ;;  %v4236_v20 = vand.u32 2147483647, %v4206_v0 }
 0x32d   :  { %v3960_v5 = vadd.f32 %v3959_v63, %v3947_v41  ;;  %4317 = vst [vmem:[#allocation2] sm:$0xff] %v4225_v8  ;;  %vm4232_vm6 = vweird.f32 %v4206_v0 }
 0x32e   :  { %v4239_v46 = vor.u32 1.1754944e-38, %v4238_v18  ;;  %vm4237_vm8 = vcmp.eq.f32.partialorder %v4236_v20, 8.507059e+37 }
 0x32f   :  { %v3973_v11 = vadd.f32 %v3972_v17, %v3960_v5 }
 0x330   :  { %v3935_v12 = vpop.f32.mrf.mxu3 }
 0x331   :  { %v6426_v3 = vmul.f32 -1.442695, %v3973_v11  ;;  %v3961_v13 = vpop.f32.mrf.mxu2 }
 0x332   :  { %v6958_v57 = vpop.eup %6957 }
 0x333   :  { %v4228_v14 = vmul.f32 %v6958_v57, %v4206_v0  ;;  %6959 = vpow2.f32 %v6426_v3  ;;  %vm4233_vm5 = vweird.f32 %v6958_v57 }
 0x334   :  { %vm4234_vm7 = vmor %vm4232_vm6, %vm4233_vm5 }
 0x335   :  { %v4229_v15 = vsub.f32 1.0, %v4228_v14 }
 0x337   :  { %v4230_v16 = vmul.f32 %v6958_v57, %v4229_v15 }
 0x339   :  { %v6960_v21 = vpop.eup %6959  ;;  %v4231_v9 = vadd.f32 %v6958_v57, %v4230_v16 }
 0x33a   :  { %v4207_v10 = vadd.f32 1.0, %v6960_v21  ;;  %v2659_v21 = vperm.slane %v10273_v19, 5 }
 0x33b   :  { %v4235_v25 = vsel %vm4234_vm7, %v6958_v57, %v4231_v9 }
 0x33c   :  { %v3998_v22 = vpop.f32.mrf.mxu1  ;;  %6961 = vrcp.f32 %v4207_v10  ;;  %v4240_v26 = vsel %vm4237_vm8, %v4239_v46, %v4235_v25  ;;  %v4253_v32 = vand.u32 2147483648, %v4207_v10  ;;  %v4251_v40 = vand.u32 2147483647, %v4207_v10 }
 0x33d   :  { %v4024_v24 = vpop.f32.mrf.mxu0  ;;  %4318 = vst [vmem:[#allocation2 + $0x8] sm:$0xff] %v4240_v26  ;;  %vm4247_vm10 = vweird.f32 %v4207_v10 }
 0x33e   :  { %v4254_v53 = vor.u32 1.1754944e-38, %v4253_v32  ;;  %vm4252_vm12 = vcmp.eq.f32.partialorder %v4251_v40, 8.507059e+37 }
 0x342   :  { %v6962_v28 = vpop.eup %6961 }
 0x343   :  { %v4243_v23 = vmul.f32 %v6962_v28, %v4207_v10  ;;  %vm4248_vm9 = vweird.f32 %v6962_v28 }
 0x344   :  { %v4000_v27 = vpop.f32.mrf.mxu1  ;;  %vm4249_vm11 = vmor %vm4247_vm10, %vm4248_vm9 }
 0x345   :  { %v4026_v1 = vpop.f32.mrf.mxu0  ;;  %v4244_v30 = vsub.f32 1.0, %v4243_v23 }
 0x347   :  { %v4245_v37 = vmul.f32 %v6962_v28, %v4244_v30 }
 0x348   :  { %v3985_v31 = vpop.f32.mrf.mxu3 }
 0x349   :  { %v3986_v33 = vadd.f32 %v3985_v31, %v2657_v56  ;;  %v4011_v36 = vpop.f32.mrf.mxu2  ;;  %v4246_v43 = vadd.f32 %v6962_v28, %v4245_v37 }
 0x34b   :  { %v3999_v6 = vadd.f32 %v3998_v22, %v3986_v33  ;;  %v4250_v60 = vsel %vm4249_vm11, %v6962_v28, %v4246_v43 }
 0x34c   :  { %v4255_v48 = vsel %vm4252_vm12, %v4254_v53, %v4250_v60 }
 0x34d   :  { %v4012_v45 = vadd.f32 %v4011_v36, %v3999_v6  ;;  %4319 = vst [vmem:[#allocation2 + $0x10] sm:$0xff] %v4255_v48  ;;  %v2660_v48 = vperm.slane %v10273_v19, 6 }
 0x34f   :  { %v4025_v42 = vadd.f32 %v4024_v24, %v4012_v45 }
 0x350   :  { %v3987_v7 = vpop.f32.mrf.mxu3 }
 0x351   :  { %v6427_v17 = vmul.f32 -1.442695, %v4025_v42  ;;  %v4013_v47 = vpop.f32.mrf.mxu2 }
 0x353   :  { %6963 = vpow2.f32 %v6427_v17 }
 0x359   :  { %v6964_v49 = vpop.eup %6963 }
 0x35a   :  { %v4208_v29 = vadd.f32 1.0, %v6964_v49 }
 0x35c   :  { %v4050_v50 = vpop.f32.mrf.mxu1  ;;  %6965 = vrcp.f32 %v4208_v29  ;;  %v4268_v58 = vand.u32 2147483648, %v4208_v29  ;;  %v4266_v62 = vand.u32 2147483647, %v4208_v29  ;;  %vm4262_vm14 = vweird.f32 %v4208_v29 }
 0x35d   :  { %v4076_v34 = vpop.f32.mrf.mxu0 }
 0x35e   :  { %v4269_v2 = vor.u32 1.1754944e-38, %v4268_v58  ;;  %vm4267_vm1 = vcmp.eq.f32.partialorder %v4266_v62, 8.507059e+37 }
 0x362   :  { %v6966_v51 = vpop.eup %6965 }
 0x363   :  { %v4258_v38 = vmul.f32 %v6966_v51, %v4208_v29  ;;  %vm4263_vm13 = vweird.f32 %v6966_v51 }
 0x364   :  { %v4052_v39 = vpop.f32.mrf.mxu1  ;;  %vm4264_vm15 = vmor %vm4262_vm14, %vm4263_vm13 }
 0x365   :  { %v4078_v52 = vpop.f32.mrf.mxu0  ;;  %v4259_v55 = vsub.f32 1.0, %v4258_v38 }
 0x367   :  { %v4260_v61 = vmul.f32 %v6966_v51, %v4259_v55 }
 0x368   :  { %v4037_v44 = vpop.f32.mrf.mxu3 }
 0x369   :  { %v4038_v59 = vadd.f32 %v4037_v44, %v2658_v54  ;;  %v4063_v35 = vpop.f32.mrf.mxu2  ;;  %v4261_v0 = vadd.f32 %v6966_v51, %v4260_v61 }
 0x36b   :  { %v4051_v63 = vadd.f32 %v4050_v50, %v4038_v59  ;;  %v4265_v41 = vsel %vm4264_vm15, %v6966_v51, %v4261_v0 }
 0x36c   :  { %v4270_v8 = vsel %vm4267_vm1, %v4269_v2, %v4265_v41 }
 0x36d   :  { %v4064_v4 = vadd.f32 %v4063_v35, %v4051_v63  ;;  %4320 = vst [vmem:[#allocation2 + $0x18] sm:$0xff] %v4270_v8 }
 0x36f   :  { %v4077_v5 = vadd.f32 %v4076_v34, %v4064_v4 }
 0x370   :  { %v4039_v11 = vpop.f32.mrf.mxu3 }
 0x371   :  { %v6428_v12 = vmul.f32 -1.442695, %v4077_v5  ;;  %v4065_v3 = vpop.f32.mrf.mxu2 }
 0x373   :  { %6967 = vpow2.f32 %v6428_v12 }
 0x379   :  { %v6968_v13 = vpop.eup %6967 }
 0x37a   :  { %v4209_v14 = vadd.f32 1.0, %v6968_v13 }
 0x37c   :  { %v4102_v57 = vpop.f32.mrf.mxu1  ;;  %6969 = vrcp.f32 %v4209_v14  ;;  %v4283_v24 = vand.u32 2147483648, %v4209_v14  ;;  %v4281_v27 = vand.u32 2147483647, %v4209_v14  ;;  %vm4277_vm3 = vweird.f32 %v4209_v14 }
 0x37d   :  { %v4128_v15 = vpop.f32.mrf.mxu0 }
 0x37e   :  { %v4284_v56 = vor.u32 1.1754944e-38, %v4283_v24  ;;  %vm4282_vm5 = vcmp.eq.f32.partialorder %v4281_v27, 8.507059e+37 }
 0x382   :  { %v6970_v18 = vpop.eup %6969 }
 0x383   :  { %v4273_v9 = vmul.f32 %v6970_v18, %v4209_v14  ;;  %vm4278_vm2 = vweird.f32 %v6970_v18 }
 0x384   :  { %v4104_v16 = vpop.f32.mrf.mxu1  ;;  %vm4279_vm4 = vmor %vm4277_vm3, %vm4278_vm2 }
 0x385   :  { %v4130_v20 = vpop.f32.mrf.mxu0  ;;  %v4274_v22 = vsub.f32 1.0, %v4273_v9 }
 0x387   :  { %v4275_v26 = vmul.f32 %v6970_v18, %v4274_v22 }
 0x388   :  { %v4089_v10 = vpop.f32.mrf.mxu3 }
 0x389   :  { %v4090_v25 = vadd.f32 %v4089_v10, %v2659_v21  ;;  %v4115_v46 = vpop.f32.mrf.mxu2  ;;  %v4276_v1 = vadd.f32 %v6970_v18, %v4275_v26 }
 0x38b   :  { %v4103_v28 = vadd.f32 %v4102_v57, %v4090_v25  ;;  %v4280_v30 = vsel %vm4279_vm4, %v6970_v18, %v4276_v1 }
 0x38c   :  { %v4285_v32 = vsel %vm4282_vm5, %v4284_v56, %v4280_v30 }
 0x38d   :  { %v4116_v23 = vadd.f32 %v4115_v46, %v4103_v28  ;;  %4321 = vst [vmem:[#allocation2 + $0x20] sm:$0xff] %v4285_v32 }
 0x38f   :  { %v4129_v31 = vadd.f32 %v4128_v15, %v4116_v23 }
 0x390   :  { %v4091_v33 = vpop.f32.mrf.mxu3 }
 0x391   :  { %v6429_v36 = vmul.f32 -1.442695, %v4129_v31  ;;  %v4117_v37 = vpop.f32.mrf.mxu2 }
 0x393   :  { %6971 = vpow2.f32 %v6429_v36 }
 0x399   :  { %v6972_v40 = vpop.eup %6971 }
 0x39a   :  { %v4210_v43 = vadd.f32 1.0, %v6972_v40 }
 0x39c   :  { %v4154_v6 = vpop.f32.mrf.mxu1  ;;  %6973 = vrcp.f32 %v4210_v43  ;;  %v4298_v49 = vand.u32 2147483648, %v4210_v43  ;;  %v4296_v39 = vand.u32 2147483647, %v4210_v43  ;;  %vm4292_vm7 = vweird.f32 %v4210_v43 }
 0x39d   :  { %v4180_v53 = vpop.f32.mrf.mxu0 }
 0x39e   :  { %v4299_v54 = vor.u32 1.1754944e-38, %v4298_v49  ;;  %vm4297_vm9 = vcmp.eq.f32.partialorder %v4296_v39, 8.507059e+37 }
 0x3a2   :  { %v6974_v60 = vpop.eup %6973 }
 0x3a3   :  { %v4288_v7 = vmul.f32 %v6974_v60, %v4210_v43  ;;  %vm4293_vm6 = vweird.f32 %v6974_v60 }
 0x3a4   :  { %v4156_v45 = vpop.f32.mrf.mxu1  ;;  %vm4294_vm8 = vmor %vm4292_vm7, %vm4293_vm6 }
 0x3a5   :  { %v4182_v42 = vpop.f32.mrf.mxu0  ;;  %v4289_v17 = vsub.f32 1.0, %v4288_v7 }
 0x3a7   :  { %v4290_v34 = vmul.f32 %v6974_v60, %v4289_v17 }
 0x3a8   :  { %v4141_v47 = vpop.f32.mrf.mxu3 }
 0x3a9   :  { %v4142_v50 = vadd.f32 %v4141_v47, %v2660_v48  ;;  %v4167_v29 = vpop.f32.mrf.mxu2  ;;  %v4291_v52 = vadd.f32 %v6974_v60, %v4290_v34 }
 0x3ab   :  { %v4155_v51 = vadd.f32 %v4154_v6, %v4142_v50  ;;  %v4295_v55 = vsel %vm4294_vm8, %v6974_v60, %v4291_v52 }
 0x3ac   :  { %v4300_v58 = vsel %vm4297_vm9, %v4299_v54, %v4295_v55 }
 0x3ad   :  { %v4168_v38 = vadd.f32 %v4167_v29, %v4155_v51  ;;  %4322 = vst [vmem:[#allocation2 + $0x28] sm:$0xff] %v4300_v58 }
 0x3af   :  { %v4181_v44 = vadd.f32 %v4180_v53, %v4168_v38 }
 0x3b0   :  { %v4143_v19 = vpop.f32.mrf.mxu3 }
 0x3b1   :  { %v6430_v59 = vmul.f32 -1.442695, %v4181_v44  ;;  %v4169_v35 = vpop.f32.mrf.mxu2 }
 0x3b3   :  { %6975 = vpow2.f32 %v6430_v59 }
 0x3b9   :  { %v6976_v61 = vpop.eup %6975 }
 0x3ba   :  { %v4211_v62 = vadd.f32 1.0, %v6976_v61 }
 0x3bc   :  { %6977 = vrcp.f32 %v4211_v62  ;;  %v4313_v4 = vand.u32 2147483648, %v4211_v62  ;;  %v4311_v5 = vand.u32 2147483647, %v4211_v62  ;;  %vm4307_vm11 = vweird.f32 %v4211_v62 }
 0x3be   :  { %v4314_v11 = vor.u32 1.1754944e-38, %v4313_v4  ;;  %vm4312_vm13 = vcmp.eq.f32.partialorder %v4311_v5, 8.507059e+37 }
 0x3c2   :  { %v6978_v63 = vpop.eup %6977 }
 0x3c3   :  { %v4303_v0 = vmul.f32 %v6978_v63, %v4211_v62  ;;  %vm4308_vm10 = vweird.f32 %v6978_v63 }
 0x3c4   :  { %vm4309_vm12 = vmor %vm4307_vm11, %vm4308_vm10 }
 0x3c5   :  { %v4304_v2 = vsub.f32 1.0, %v4303_v0 }
 0x3c7   :  { %v4305_v41 = vmul.f32 %v6978_v63, %v4304_v2 }
 0x3c9   :  { %v4306_v8 = vadd.f32 %v6978_v63, %v4305_v41 }
 0x3cb   :  { %v4310_v12 = vsel %vm4309_vm12, %v6978_v63, %v4306_v8 }
 0x3cc   :  { %v4315_v3 = vsel %vm4312_vm13, %v4314_v11, %v4310_v12 }
 0x3cd   :  { %4323 = vst.msk [vmem:[#allocation2 + $0x30] sm:$0xff] %vm1254_vm0, %v4315_v3 }
 0x3ce   :  { %4334 = dma.vmem_to_hbm [thread:$0]  %s4330_s22, 896, %s4332_s24, [#allocation3]  }
 0x3cf   :  { %7027 = dma.done.wait [#allocation3], 896  }
 0x3d0   :  { %7028 = vsyncadd [#allocation3], 4294966400 }
 0x3d1   :  { %7029 = dma.done.wait [#allocation5], 256  }
 0x3d2   :  { %7030 = vsyncadd [#allocation5], 4294967040 }
 0x3d3   :  { %4354 = vsyncpa [#allocation3], 1 }
 0x3d4   :  { %4355 = vsyncpa [#allocation5], 1 }

</bundles_post_ra>
